<compile_context>
chip_gen: v5e
topology: v5e:2x2
jax: 0.10.0
libtpu: 0.0.40
codegen_flags: <defaults>
</compile_context>

<pallas_src>
import functools

import jax
import jax.numpy as jnp
from jax.experimental import pallas as pl
from jax.experimental.pallas import tpu as pltpu

LEAKY_SLOPE = 0.01   # F.leaky_relu default
BN_EPS = 1e-5        # nn.BatchNorm1d default
N = 50

# Padded kernel-side feature dims (logical 750, 200, 50, 50).
H1, H2, H3, H4 = 768, 256, 64, 64
HEAD = 32            # logical 20: cols 0..9 = mu, 10..19 = log_var
LATENT = 10
OUT_W = 48           # output slab: z @ [0:10], mu @ [16:26], log_var @ [26:36]

# 128-aligned lane offsets inside the packed small-parameter vector (f32).
_B1_OFF, _B2_OFF, _B3_OFF, _B4_OFF = 0, 768, 1024, 1152
_BNG_OFF, _BNB_OFF, _BH_OFF = 1280, 1408, 1536
_S1_OFF = 1664                       # per-output-column dequant scales for int8 w1
_PACK_W = _S1_OFF + H1               # 2432 = 19 * 128


def _round_up(x, m):
    return (x + m - 1) // m * m


def _leaky_relu(x):
    return jnp.where(x > 0, x, LEAKY_SLOPE * x)


def rearange_to_half(C, n):
    """JAX port of the PyTorch helper: (B, N, N) -> (B, N+1, N/2)."""
    n_half = n // 2
    b = C.shape[0]
    tril = jnp.tril(C)
    l1 = tril[:, :, :n_half]
    l2 = tril[:, :, n_half:]
    zeros = jnp.zeros((b, 1, n_half), C.dtype)
    l1 = jnp.concatenate([zeros, l1], axis=1)
    l2 = jnp.concatenate([jnp.flip(l2, axis=(1, 2)), zeros], axis=1)
    return l1 + l2


def encoder_kernel(x_ref, w1_ref, w2_ref, w3_ref, w4_ref, wh_ref,
                   pb_ref, eps_ref, out_ref):
    # Packed small params (f32), static slices at 128-aligned lane offsets.
    b1 = pb_ref[:, _B1_OFF:_B1_OFF + H1]
    b2 = pb_ref[:, _B2_OFF:_B2_OFF + H2]
    b3 = pb_ref[:, _B3_OFF:_B3_OFF + H3]
    b4 = pb_ref[:, _B4_OFF:_B4_OFF + H4]
    bn_g = pb_ref[:, _BNG_OFF:_BNG_OFF + H4]
    bn_b = pb_ref[:, _BNB_OFF:_BNB_OFF + H4]
    bh = pb_ref[:, _BH_OFF:_BH_OFF + HEAD]
    s1 = pb_ref[:, _S1_OFF:_S1_OFF + H1]

    # Layer 1: int8-stored weight (halved HBM DMA), exact int8->bf16 dequant
    # on-chip; per-column scale folded in after the f32 MXU accumulation.
    x = x_ref[...]                                            # (B, IN_PAD) bf16
    w1 = w1_ref[...].astype(jnp.bfloat16)
    h = _leaky_relu(jnp.dot(x, w1, preferred_element_type=jnp.float32) * s1 + b1)
    h = _leaky_relu(jnp.dot(h.astype(jnp.bfloat16), w2_ref[...],
                            preferred_element_type=jnp.float32) + b2)
    h = _leaky_relu(jnp.dot(h.astype(jnp.bfloat16), w3_ref[...],
                            preferred_element_type=jnp.float32) + b3)
    h4 = jnp.dot(h.astype(jnp.bfloat16), w4_ref[...],
                 preferred_element_type=jnp.float32) + b4

    # BatchNorm1d in training mode: full-batch mean / biased variance.
    # Padded columns (>= 50) are identically zero and stay zero.
    # TODO(synk): running_mean / running_var tracking is a stateful torch side
    # effect that does not affect this forward output; not reproduced here.
    mean = jnp.mean(h4, axis=0, keepdims=True)
    var = jnp.mean((h4 - mean) ** 2, axis=0, keepdims=True)
    h = _leaky_relu((h4 - mean) * jax.lax.rsqrt(var + BN_EPS) * bn_g + bn_b)

    # Fused fmu / fvar head (one matmul): cols 0..9 -> mu, cols 10..19 -> log_var.
    head = jnp.dot(h.astype(jnp.bfloat16), wh_ref[...],
                   preferred_element_type=jnp.float32) + bh
    head = jnp.maximum(head, 0.0)        # F.relu on both heads, as in the torch spec
    mu = head[:, 0:LATENT]
    log_var = head[:, LATENT:2 * LATENT]

    # Reparameterization with caller-supplied standard-normal eps.
    z = mu + eps_ref[...] * jnp.exp(0.5 * log_var)

    # Build the (B, 48) slab in registers and do a single full-width store:
    # [ z (10) | 0 (6) | head (32: mu @16..25, log_var @26..35, zero pad) ].
    zero6 = jnp.zeros((z.shape[0], 16 - LATENT), jnp.float32)
    out_ref[...] = jnp.concatenate([z, zero6, head], axis=1)


def init_params(key, in_dim):
    """PyTorch-default (uniform +/- 1/sqrt(fan_in)) init, logical shapes.
    Weights are stored (in_features, out_features)."""
    dims = {"h1": (in_dim, 750), "h2": (750, 200), "h3": (200, 50),
            "h4": (50, 50), "fmu": (50, 10), "fvar": (50, 10)}
    keys = jax.random.split(key, 2 * len(dims))
    p = {}
    for i, (name, (fi, fo)) in enumerate(dims.items()):
        bound = 1.0 / (fi ** 0.5)
        p[name + "_w"] = jax.random.uniform(keys[2 * i], (fi, fo),
                                            jnp.float32, -bound, bound)
        p[name + "_b"] = jax.random.uniform(keys[2 * i + 1], (fo,),
                                            jnp.float32, -bound, bound)
    p["bn_gamma"] = jnp.ones((50,), jnp.float32)   # BatchNorm1d(50) defaults
    p["bn_beta"] = jnp.zeros((50,), jnp.float32)
    return p


def pack_params(p, in_dim):
    """Pad / cast / fuse logical params into the kernel layout: int8 w1 (+
    per-column f32 scales), bf16 remaining weights, and one packed f32 vector
    for every small per-feature parameter."""
    in_pad = _round_up(in_dim, 128)

    def pad2(w, rows, cols):
        return jnp.pad(w, ((0, rows - w.shape[0]), (0, cols - w.shape[1])))

    # w1: symmetric per-output-column int8 quantization (padded columns get
    # scale 1.0 and all-zero weights, so they stay numerically neutral).
    w1f = pad2(p["h1_w"], in_pad, H1)
    amax = jnp.max(jnp.abs(w1f), axis=0, keepdims=True)
    s1 = jnp.where(amax > 0, amax / 127.0, 1.0).astype(jnp.float32)     # (1, H1)
    w1 = jnp.clip(jnp.round(w1f / s1), -127, 127).astype(jnp.int8)

    w2 = pad2(p["h2_w"], H1, H2).astype(jnp.bfloat16)
    w3 = pad2(p["h3_w"], H2, H3).astype(jnp.bfloat16)
    w4 = pad2(p["h4_w"], H3, H4).astype(jnp.bfloat16)
    wh = pad2(jnp.concatenate([p["fmu_w"], p["fvar_w"]], axis=1),
              H4, HEAD).astype(jnp.bfloat16)

    pb = jnp.zeros((1, _PACK_W), jnp.float32)
    for off, v in ((_B1_OFF, p["h1_b"]), (_B2_OFF, p["h2_b"]),
                   (_B3_OFF, p["h3_b"]), (_B4_OFF, p["h4_b"]),
                   (_BNG_OFF, p["bn_gamma"]), (_BNB_OFF, p["bn_beta"]),
                   (_BH_OFF, jnp.concatenate([p["fmu_b"], p["fvar_b"]])),
                   (_S1_OFF, s1[0])):
        pb = pb.at[0, off:off + v.shape[0]].set(v)
    return w1, w2, w3, w4, wh, pb


@functools.partial(jax.jit, static_argnums=(3,))
def block_encoder_quad(X, packed, eps, do_half):
    """Returns (z, mu, log_var), matching the PyTorch forward.  The whole
    forward (glue + pallas_call + slicing) is one jitted XLA executable."""
    if do_half:
        x = rearange_to_half(X, N).reshape(-1, (N + 1) * (N // 2))   # (B, 1275)
    else:
        x = X.reshape(-1, N * N)                                     # (B, 2500)
    in_dim = x.shape[1]
    in_pad = _round_up(in_dim, 128)
    # Cast to bf16 BEFORE padding so the pad writes half the bytes.
    x = jnp.pad(x.astype(jnp.bfloat16), ((0, 0), (0, in_pad - in_dim)))
    B = x.shape[0]

    w1, w2, w3, w4, wh, pb = packed
    assert w1.shape[0] == in_pad, "packed params do not match do_half setting"

    vmem = pl.BlockSpec(memory_space=pltpu.MemorySpace.VMEM)
    # TODO(synk): for repeated calls, hide the ~1.4 MB weight DMA with a
    # cross-call prefetch (P10: pl.ANY weights + make_async_copy futures); for
    # large B add a batch grid with dimension_semantics=("parallel",), resident
    # weights via constant index_maps, and a two-pass full-batch BatchNorm.
    # This grid-less call targets the small-batch latency case where the whole
    # net (~1.5 MB) fits comfortably in VMEM on v5e/v6e/v7x.
    out = pl.pallas_call(
        encoder_kernel,
        out_shape=jax.ShapeDtypeStruct((B, OUT_W), jnp.float32),
        in_specs=[vmem] * 8,
        out_specs=vmem,
        compiler_params=pltpu.CompilerParams(vmem_limit_bytes=16 << 20),
    )(x, w1, w2, w3, w4, wh, pb, eps.astype(jnp.float32))

    z = out[:, 0:LATENT]
    mu = out[:, 16:16 + LATENT]
    log_var = out[:, 16 + LATENT:16 + 2 * LATENT]
    return z, mu, log_var


if __name__ == "__main__":
    key = jax.random.PRNGKey(0)
    k_x, k_p, k_eps = jax.random.split(key, 3)

    B = 8                         # multiple of the 8-row sublane
    do_half = True
    in_dim = (N + 1) * (N // 2) if do_half else N * N

    # Synthetic "covariance" input (B, 50, 50); symmetrized for realism.
    X = jax.random.normal(k_x, (B, N, N), jnp.float32)
    X = 0.5 * (X + jnp.transpose(X, (0, 2, 1)))

    params = init_params(k_p, in_dim)
    packed = pack_params(params, in_dim)
    # eps for the reparameterization trick (std.data.new(...).normal_())
    eps = jax.random.normal(k_eps, (B, 10), jnp.float32)

    z, mu, log_var = block_encoder_quad(X, packed, eps, do_half)
    jax.block_until_ready((z, mu, log_var))

    assert z.shape == (B, 10) and mu.shape == (B, 10) and log_var.shape == (B, 10)
    assert bool(jnp.all(jnp.isfinite(z)))
    assert bool(jnp.all(mu >= 0.0)) and bool(jnp.all(log_var >= 0.0))
    print("KERNEL_OK")
</pallas_src>

<mosaic_0001>
module attributes {stable_mosaic.version = 11 : i64} {
  func.func @encoder_kernel(%arg0: memref<8x1280xbf16, #tpu.memory_space<vmem>>, %arg1: memref<1280x768xi8, #tpu.memory_space<vmem>>, %arg2: memref<768x256xbf16, #tpu.memory_space<vmem>>, %arg3: memref<256x64xbf16, #tpu.memory_space<vmem>>, %arg4: memref<64x64xbf16, #tpu.memory_space<vmem>>, %arg5: memref<64x32xbf16, #tpu.memory_space<vmem>>, %arg6: memref<1x2432xf32, #tpu.memory_space<vmem>>, %arg7: memref<8x10xf32, #tpu.memory_space<vmem>>, %arg8: memref<8x48xf32, #tpu.memory_space<vmem>>) attributes {dimension_semantics = [], scalar_prefetch = 0 : i64, scratch_operands = 0 : i64, tpu.core_type = #tpu.core_type<tc>} {
    %c0 = arith.constant 0 : index
    %c0_0 = arith.constant 0 : index
    %0 = vector.load %arg6[%c0, %c0_0] : memref<1x2432xf32, #tpu.memory_space<vmem>>, vector<1x768xf32>
    %c0_1 = arith.constant 0 : index
    %c768 = arith.constant 768 : index
    %1 = vector.load %arg6[%c0_1, %c768] : memref<1x2432xf32, #tpu.memory_space<vmem>>, vector<1x256xf32>
    %c0_2 = arith.constant 0 : index
    %c1024 = arith.constant 1024 : index
    %2 = vector.load %arg6[%c0_2, %c1024] : memref<1x2432xf32, #tpu.memory_space<vmem>>, vector<1x64xf32>
    %c0_3 = arith.constant 0 : index
    %c1152 = arith.constant 1152 : index
    %3 = vector.load %arg6[%c0_3, %c1152] : memref<1x2432xf32, #tpu.memory_space<vmem>>, vector<1x64xf32>
    %c0_4 = arith.constant 0 : index
    %c1280 = arith.constant 1280 : index
    %4 = vector.load %arg6[%c0_4, %c1280] : memref<1x2432xf32, #tpu.memory_space<vmem>>, vector<1x64xf32>
    %c0_5 = arith.constant 0 : index
    %c1408 = arith.constant 1408 : index
    %5 = vector.load %arg6[%c0_5, %c1408] : memref<1x2432xf32, #tpu.memory_space<vmem>>, vector<1x64xf32>
    %c0_6 = arith.constant 0 : index
    %c1536 = arith.constant 1536 : index
    %6 = vector.load %arg6[%c0_6, %c1536] : memref<1x2432xf32, #tpu.memory_space<vmem>>, vector<1x32xf32>
    %c0_7 = arith.constant 0 : index
    %c1664 = arith.constant 1664 : index
    %7 = vector.load %arg6[%c0_7, %c1664] : memref<1x2432xf32, #tpu.memory_space<vmem>>, vector<1x768xf32>
    %c0_8 = arith.constant 0 : index
    %c0_9 = arith.constant 0 : index
    %8 = vector.load %arg0[%c0_8, %c0_9] : memref<8x1280xbf16, #tpu.memory_space<vmem>>, vector<8x1280xbf16>
    %c0_10 = arith.constant 0 : index
    %c0_11 = arith.constant 0 : index
    %9 = vector.load %arg1[%c0_10, %c0_11] : memref<1280x768xi8, #tpu.memory_space<vmem>>, vector<1280x768xi8>
    %10 = arith.sitofp %9 : vector<1280x768xi8> to vector<1280x768xbf16>
    %cst = arith.constant dense<0.000000e+00> : vector<8x768xf32>
    %11 = tpu.matmul %8, %10, %cst {dimension_numbers = #tpu.dot_dimension_numbers<[1], [0], [0], [1], [0, 0, 1, 1], [], []>} : vector<8x1280xbf16>, vector<1280x768xbf16>, vector<8x768xf32> -> vector<8x768xf32>
    %12 = vector.broadcast %7 : vector<1x768xf32> to vector<8x768xf32>
    %13 = arith.mulf %11, %12 : vector<8x768xf32>
    %14 = vector.broadcast %0 : vector<1x768xf32> to vector<8x768xf32>
    %15 = arith.addf %13, %14 : vector<8x768xf32>
    %cst_12 = arith.constant 0.000000e+00 : f32
    %16 = vector.broadcast %cst_12 : f32 to vector<8x768xf32>
    %17 = arith.cmpf ogt, %15, %16 : vector<8x768xf32>
    %cst_13 = arith.constant 0.00999999977 : f32
    %18 = vector.broadcast %cst_13 : f32 to vector<8x768xf32>
    %19 = arith.mulf %18, %15 : vector<8x768xf32>
    %20 = arith.select %17, %15, %19 : vector<8x768xi1>, vector<8x768xf32>
    %21 = arith.truncf %20 : vector<8x768xf32> to vector<8x768xbf16>
    %c0_14 = arith.constant 0 : index
    %c0_15 = arith.constant 0 : index
    %22 = vector.load %arg2[%c0_14, %c0_15] : memref<768x256xbf16, #tpu.memory_space<vmem>>, vector<768x256xbf16>
    %cst_16 = arith.constant dense<0.000000e+00> : vector<8x256xf32>
    %23 = tpu.matmul %21, %22, %cst_16 {dimension_numbers = #tpu.dot_dimension_numbers<[1], [0], [0], [1], [0, 0, 1, 1], [], []>} : vector<8x768xbf16>, vector<768x256xbf16>, vector<8x256xf32> -> vector<8x256xf32>
    %24 = vector.broadcast %1 : vector<1x256xf32> to vector<8x256xf32>
    %25 = arith.addf %23, %24 : vector<8x256xf32>
    %cst_17 = arith.constant 0.000000e+00 : f32
    %26 = vector.broadcast %cst_17 : f32 to vector<8x256xf32>
    %27 = arith.cmpf ogt, %25, %26 : vector<8x256xf32>
    %cst_18 = arith.constant 0.00999999977 : f32
    %28 = vector.broadcast %cst_18 : f32 to vector<8x256xf32>
    %29 = arith.mulf %28, %25 : vector<8x256xf32>
    %30 = arith.select %27, %25, %29 : vector<8x256xi1>, vector<8x256xf32>
    %31 = arith.truncf %30 : vector<8x256xf32> to vector<8x256xbf16>
    %c0_19 = arith.constant 0 : index
    %c0_20 = arith.constant 0 : index
    %32 = vector.load %arg3[%c0_19, %c0_20] : memref<256x64xbf16, #tpu.memory_space<vmem>>, vector<256x64xbf16>
    %cst_21 = arith.constant dense<0.000000e+00> : vector<8x64xf32>
    %33 = tpu.matmul %31, %32, %cst_21 {dimension_numbers = #tpu.dot_dimension_numbers<[1], [0], [0], [1], [0, 0, 1, 1], [], []>} : vector<8x256xbf16>, vector<256x64xbf16>, vector<8x64xf32> -> vector<8x64xf32>
    %34 = vector.broadcast %2 : vector<1x64xf32> to vector<8x64xf32>
    %35 = arith.addf %33, %34 : vector<8x64xf32>
    %cst_22 = arith.constant 0.000000e+00 : f32
    %36 = vector.broadcast %cst_22 : f32 to vector<8x64xf32>
    %37 = arith.cmpf ogt, %35, %36 : vector<8x64xf32>
    %cst_23 = arith.constant 0.00999999977 : f32
    %38 = vector.broadcast %cst_23 : f32 to vector<8x64xf32>
    %39 = arith.mulf %38, %35 : vector<8x64xf32>
    %40 = arith.select %37, %35, %39 : vector<8x64xi1>, vector<8x64xf32>
    %41 = arith.truncf %40 : vector<8x64xf32> to vector<8x64xbf16>
    %c0_24 = arith.constant 0 : index
    %c0_25 = arith.constant 0 : index
    %42 = vector.load %arg4[%c0_24, %c0_25] : memref<64x64xbf16, #tpu.memory_space<vmem>>, vector<64x64xbf16>
    %cst_26 = arith.constant dense<0.000000e+00> : vector<8x64xf32>
    %43 = tpu.matmul %41, %42, %cst_26 {dimension_numbers = #tpu.dot_dimension_numbers<[1], [0], [0], [1], [0, 0, 1, 1], [], []>} : vector<8x64xbf16>, vector<64x64xbf16>, vector<8x64xf32> -> vector<8x64xf32>
    %44 = vector.broadcast %3 : vector<1x64xf32> to vector<8x64xf32>
    %45 = arith.addf %43, %44 : vector<8x64xf32>
    %cst_27 = arith.constant dense<0.000000e+00> : vector<64xf32>
    %46 = vector.multi_reduction <add>, %45, %cst_27 [0] : vector<8x64xf32> to vector<64xf32>
    %47 = vector.shape_cast %46 : vector<64xf32> to vector<1x64xf32>
    %cst_28 = arith.constant 8.000000e+00 : f32
    %48 = vector.broadcast %cst_28 : f32 to vector<1x64xf32>
    %49 = arith.divf %47, %48 : vector<1x64xf32>
    %50 = vector.broadcast %49 : vector<1x64xf32> to vector<8x64xf32>
    %51 = arith.subf %45, %50 : vector<8x64xf32>
    %52 = arith.mulf %51, %51 : vector<8x64xf32>
    %cst_29 = arith.constant dense<0.000000e+00> : vector<64xf32>
    %53 = vector.multi_reduction <add>, %52, %cst_29 [0] : vector<8x64xf32> to vector<64xf32>
    %54 = vector.shape_cast %53 : vector<64xf32> to vector<1x64xf32>
    %cst_30 = arith.constant 8.000000e+00 : f32
    %55 = vector.broadcast %cst_30 : f32 to vector<1x64xf32>
    %56 = arith.divf %54, %55 : vector<1x64xf32>
    %57 = vector.broadcast %49 : vector<1x64xf32> to vector<8x64xf32>
    %58 = arith.subf %45, %57 : vector<8x64xf32>
    %cst_31 = arith.constant 9.99999974E-6 : f32
    %59 = vector.broadcast %cst_31 : f32 to vector<1x64xf32>
    %60 = arith.addf %56, %59 : vector<1x64xf32>
    %61 = math.rsqrt %60 : vector<1x64xf32>
    %62 = vector.broadcast %61 : vector<1x64xf32> to vector<8x64xf32>
    %63 = arith.mulf %58, %62 : vector<8x64xf32>
    %64 = vector.broadcast %4 : vector<1x64xf32> to vector<8x64xf32>
    %65 = arith.mulf %63, %64 : vector<8x64xf32>
    %66 = vector.broadcast %5 : vector<1x64xf32> to vector<8x64xf32>
    %67 = arith.addf %65, %66 : vector<8x64xf32>
    %cst_32 = arith.constant 0.000000e+00 : f32
    %68 = vector.broadcast %cst_32 : f32 to vector<8x64xf32>
    %69 = arith.cmpf ogt, %67, %68 : vector<8x64xf32>
    %cst_33 = arith.constant 0.00999999977 : f32
    %70 = vector.broadcast %cst_33 : f32 to vector<8x64xf32>
    %71 = arith.mulf %70, %67 : vector<8x64xf32>
    %72 = arith.select %69, %67, %71 : vector<8x64xi1>, vector<8x64xf32>
    %73 = arith.truncf %72 : vector<8x64xf32> to vector<8x64xbf16>
    %c0_34 = arith.constant 0 : index
    %c0_35 = arith.constant 0 : index
    %74 = vector.load %arg5[%c0_34, %c0_35] : memref<64x32xbf16, #tpu.memory_space<vmem>>, vector<64x32xbf16>
    %cst_36 = arith.constant dense<0.000000e+00> : vector<8x32xf32>
    %75 = tpu.matmul %73, %74, %cst_36 {dimension_numbers = #tpu.dot_dimension_numbers<[1], [0], [0], [1], [0, 0, 1, 1], [], []>} : vector<8x64xbf16>, vector<64x32xbf16>, vector<8x32xf32> -> vector<8x32xf32>
    %76 = vector.broadcast %6 : vector<1x32xf32> to vector<8x32xf32>
    %77 = arith.addf %75, %76 : vector<8x32xf32>
    %cst_37 = arith.constant 0.000000e+00 : f32
    %78 = vector.broadcast %cst_37 : f32 to vector<8x32xf32>
    %79 = arith.maximumf %77, %78 : vector<8x32xf32>
    %80 = vector.extract_strided_slice %79 {offsets = [0, 0], sizes = [8, 10], strides = [1, 1]} : vector<8x32xf32> to vector<8x10xf32>
    %81 = vector.extract_strided_slice %79 {offsets = [0, 10], sizes = [8, 10], strides = [1, 1]} : vector<8x32xf32> to vector<8x10xf32>
    %c0_38 = arith.constant 0 : index
    %c0_39 = arith.constant 0 : index
    %82 = vector.load %arg7[%c0_38, %c0_39] : memref<8x10xf32, #tpu.memory_space<vmem>>, vector<8x10xf32>
    %cst_40 = arith.constant 5.000000e-01 : f32
    %83 = vector.broadcast %cst_40 : f32 to vector<8x10xf32>
    %84 = arith.mulf %83, %81 : vector<8x10xf32>
    %85 = math.exp %84 : vector<8x10xf32>
    %86 = arith.mulf %82, %85 : vector<8x10xf32>
    %87 = arith.addf %80, %86 : vector<8x10xf32>
    %cst_41 = arith.constant 0.000000e+00 : f32
    %88 = vector.broadcast %cst_41 : f32 to vector<8x6xf32>
    %89 = tpu.concatenate %87, %88, %79 in 1 : vector<8x10xf32>, vector<8x6xf32>, vector<8x32xf32> -> vector<8x48xf32>
    %c0_42 = arith.constant 0 : index
    %c0_43 = arith.constant 0 : index
    %90 = vector.load %arg8[%c0_42, %c0_43] : memref<8x48xf32, #tpu.memory_space<vmem>>, vector<8x48xf32>
    tpu.vector_store %arg8[%c0_42, %c0_43], %89 {strides = array<i32>} : memref<8x48xf32, #tpu.memory_space<vmem>>, vector<8x48xf32>,
    return
  }
}

</mosaic_0001>

<bundles_post_ra>
// kernel: block_encoder_quad.1
= control target key start
LH: loop header
LB: loop body
LE: loop exit
PB: predicated region body
PF: predicated region fallthrough
CT: control target
= control target key end

     0   :  { %vm4501_vm9 = vcmask 523264   ;;  %s5260_s25 = smov 118   ;;  %s5261_s26 = smov 16   ;;  %vm4633_vm15 = vcmask 80896   ;;  %s7099_s1 = inlined_call_operand.vmem [shape: s8[1280,768], index: 1, kind: input, shape index: {}]   ;;  %s7100_s0 = inlined_call_operand.vmem [shape: bf16[8,1280], index: 0, kind: input, shape index: {}]   ;;  %s7101_s6 = inlined_call_operand.vmem [shape: f32[1,2432], index: 6, kind: input, shape index: {}]   ;;  %s7102_s2 = inlined_call_operand.vmem [shape: bf16[768,256], index: 2, kind: input, shape index: {}]   ;;  %s7103_s3 = inlined_call_operand.vmem [shape: bf16[256,64], index: 3, kind: input, shape index: {}]   ;;  %s7104_s4 = inlined_call_operand.vmem [shape: bf16[64,64], index: 4, kind: input, shape index: {}]   ;;  %s7105_s5 = inlined_call_operand.vmem [shape: bf16[64,32], index: 5, kind: input, shape index: {}]   ;;  %s7106_s7 = inlined_call_operand.vmem [shape: f32[8,10], index: 7, kind: input, shape index: {}]   ;;  %s7107_s8 = inlined_call_operand.vmem [shape: f32[8,48], index: 8, kind: output, shape index: {}]  }
   0x1   :  { %v61_v0 = vld [vmem:[%s7099_s1 + $0x90] sm:$0xff]  ;;  %v55_v28 = vld [vmem:[%s7099_s1 + $0x60] sm:$0xff] }
   0x2   :  { %v85_v1 = vld [vmem:[%s7099_s1 + $0x150] sm:$0xff]  ;;  %v367_v3 = vunpack.c.2.s8 %v61_v0  ;;  %v373_v4 = vunpack.c.3.s8 %v61_v0  ;;  %v355_v22 = vunpack.c.0.s8 %v61_v0  ;;  %v361_v23 = vunpack.c.1.s8 %v61_v0  ;;  %v79_v37 = vld [vmem:[%s7099_s1 + $0x120] sm:$0xff] }
   0x3   :  { %v109_v2 = vld [vmem:[%s7099_s1 + $0x210] sm:$0xff]  ;;  %v463_v5 = vunpack.c.2.s8 %v85_v1  ;;  %v469_v6 = vunpack.c.3.s8 %v85_v1  ;;  %v451_v26 = vunpack.c.0.s8 %v85_v1  ;;  %v457_v27 = vunpack.c.1.s8 %v85_v1  ;;  %v103_v42 = vld [vmem:[%s7099_s1 + $0x1e0] sm:$0xff] }
   0x4   :  { %v133_v7 = vld [vmem:[%s7099_s1 + $0x2d0] sm:$0xff]  ;;  %v559_v8 = vunpack.c.2.s8 %v109_v2  ;;  %v565_v9 = vunpack.c.3.s8 %v109_v2  ;;  %v1327_v12 = vcvt.s32.f32 %v367_v3  ;;  %v1333_v13 = vcvt.s32.f32 %v373_v4  ;;  %v127_v47 = vld [vmem:[%s7099_s1 + $0x2a0] sm:$0xff] }
   0x5   :  { %v655_v10 = vunpack.c.2.s8 %v133_v7  ;;  %v661_v11 = vunpack.c.3.s8 %v133_v7  ;;  %v1423_v14 = vcvt.s32.f32 %v463_v5  ;;  %v1429_v15 = vcvt.s32.f32 %v469_v6 }
   0x6   :  { %v1519_v16 = vcvt.s32.f32 %v559_v8  ;;  %v1525_v17 = vcvt.s32.f32 %v565_v9  ;;  %v2245_v20 = vpack.c.bf16 %v1333_v13, %v1327_v12  ;;  %v1315_v29 = vcvt.s32.f32 %v355_v22  ;;  %v49_v8 = vld [vmem:[%s7099_s1 + $0x30] sm:$0xff] }
   0x7   :  { %v1615_v18 = vcvt.s32.f32 %v655_v10  ;;  %v1621_v19 = vcvt.s32.f32 %v661_v11  ;;  %v2293_v21 = vpack.c.bf16 %v1429_v15, %v1423_v14  ;;  %v1321_v30 = vcvt.s32.f32 %v361_v23  ;;  %v97_v22 = vld [vmem:[%s7099_s1 + $0x1b0] sm:$0xff] }
   0x8   :  { %v2341_v24 = vpack.c.bf16 %v1525_v17, %v1519_v16  ;;  %2718 = vmatpush.bf16.msra.mxu0 %v2245_v20  ;;  %v547_v31 = vunpack.c.0.s8 %v109_v2  ;;  %v553_v32 = vunpack.c.1.s8 %v109_v2  ;;  %v1411_v33 = vcvt.s32.f32 %v451_v26  ;;  %v73_v17 = vld [vmem:[%s7099_s1 + $0xf0] sm:$0xff] }
   0x9   :  { %v2389_v25 = vpack.c.bf16 %v1621_v19, %v1615_v18  ;;  %2731 = vmatpush.bf16.msra.mxu1 %v2293_v21  ;;  %v1417_v34 = vcvt.s32.f32 %v457_v27  ;;  %v643_v35 = vunpack.c.0.s8 %v133_v7  ;;  %v649_v36 = vunpack.c.1.s8 %v133_v7  ;;  %v121_v27 = vld [vmem:[%s7099_s1 + $0x270] sm:$0xff] }
   0xa   :  { %2744 = vmatpush.bf16.msra.mxu2 %v2341_v24  ;;  %v2239_v38 = vpack.c.bf16 %v1321_v30, %v1315_v29  ;;  %v1507_v39 = vcvt.s32.f32 %v547_v31  ;;  %v1513_v40 = vcvt.s32.f32 %v553_v32  ;;  %v343_v41 = vunpack.c.2.s8 %v55_v28 }
   0xb   :  { %2757 = vmatpush.bf16.msra.mxu3 %v2389_v25  ;;  %v2287_v43 = vpack.c.bf16 %v1417_v34, %v1411_v33  ;;  %v1603_v44 = vcvt.s32.f32 %v643_v35  ;;  %v1609_v45 = vcvt.s32.f32 %v649_v36  ;;  %v349_v46 = vunpack.c.3.s8 %v55_v28 }
   0xc   :  { %2719 = vmatpush.bf16.msra.mxu0 %v2239_v38  ;;  %v2335_v48 = vpack.c.bf16 %v1513_v40, %v1507_v39  ;;  %v1303_v49 = vcvt.s32.f32 %v343_v41  ;;  %v439_v50 = vunpack.c.2.s8 %v79_v37  ;;  %v445_v51 = vunpack.c.3.s8 %v79_v37 }
   0xd   :  { %2732 = vmatpush.bf16.msra.mxu1 %v2287_v43  ;;  %v2383_v52 = vpack.c.bf16 %v1609_v45, %v1603_v44  ;;  %v1309_v53 = vcvt.s32.f32 %v349_v46  ;;  %v535_v54 = vunpack.c.2.s8 %v103_v42  ;;  %v541_v55 = vunpack.c.3.s8 %v103_v42 }
   0xe   :  { %2745 = vmatpush.bf16.msra.mxu2 %v2335_v48  ;;  %v1399_v56 = vcvt.s32.f32 %v439_v50  ;;  %v1405_v57 = vcvt.s32.f32 %v445_v51  ;;  %v631_v58 = vunpack.c.2.s8 %v127_v47  ;;  %v637_v59 = vunpack.c.3.s8 %v127_v47 }
   0xf   :  { %2758 = vmatpush.bf16.msra.mxu3 %v2383_v52  ;;  %v2233_v60 = vpack.c.bf16 %v1309_v53, %v1303_v49  ;;  %v1495_v61 = vcvt.s32.f32 %v535_v54  ;;  %v1501_v62 = vcvt.s32.f32 %v541_v55  ;;  %v331_v63 = vunpack.c.0.s8 %v55_v28  ;;  %v43_v52 = vld [vmem:[%s7099_s1] sm:$0xff] }
  0x10   :  { %v2281_v0 = vpack.c.bf16 %v1405_v57, %v1399_v56  ;;  %v1591_v1 = vcvt.s32.f32 %v631_v58  ;;  %v1597_v2 = vcvt.s32.f32 %v637_v59  ;;  %v337_v3 = vunpack.c.1.s8 %v55_v28 }
  0x11   :  { %2720 = vmatpush.bf16.msra.mxu0 %v2233_v60  ;;  %v2329_v4 = vpack.c.bf16 %v1501_v62, %v1495_v61  ;;  %v1291_v5 = vcvt.s32.f32 %v331_v63  ;;  %v427_v6 = vunpack.c.0.s8 %v79_v37  ;;  %v433_v7 = vunpack.c.1.s8 %v79_v37  ;;  %v67_v61 = vld [vmem:[%s7099_s1 + $0xc0] sm:$0xff] }
  0x12   :  { %2733 = vmatpush.bf16.msra.mxu1 %v2281_v0  ;;  %v2377_v9 = vpack.c.bf16 %v1597_v2, %v1591_v1  ;;  %v1297_v10 = vcvt.s32.f32 %v337_v3  ;;  %v523_v11 = vunpack.c.0.s8 %v103_v42  ;;  %v529_v12 = vunpack.c.1.s8 %v103_v42  ;;  %v91_v2 = vld [vmem:[%s7099_s1 + $0x180] sm:$0xff] }
  0x13   :  { %2746 = vmatpush.bf16.msra.mxu2 %v2329_v4  ;;  %v1387_v13 = vcvt.s32.f32 %v427_v6  ;;  %v1393_v14 = vcvt.s32.f32 %v433_v7  ;;  %v619_v15 = vunpack.c.0.s8 %v127_v47  ;;  %v625_v16 = vunpack.c.1.s8 %v127_v47  ;;  %v115_v7 = vld [vmem:[%s7099_s1 + $0x240] sm:$0xff] }
  0x14   :  { %2759 = vmatpush.bf16.msra.mxu3 %v2377_v9  ;;  %v2227_v18 = vpack.c.bf16 %v1297_v10, %v1291_v5  ;;  %v1483_v19 = vcvt.s32.f32 %v523_v11  ;;  %v1489_v20 = vcvt.s32.f32 %v529_v12  ;;  %v319_v21 = vunpack.c.2.s8 %v49_v8 }
  0x15   :  { %v2275_v23 = vpack.c.bf16 %v1393_v14, %v1387_v13  ;;  %v1579_v24 = vcvt.s32.f32 %v619_v15  ;;  %v1585_v25 = vcvt.s32.f32 %v625_v16  ;;  %v325_v26 = vunpack.c.3.s8 %v49_v8 }
  0x16   :  { %2721 = vmatpush.bf16.msra.mxu0 %v2227_v18  ;;  %v2323_v28 = vpack.c.bf16 %v1489_v20, %v1483_v19  ;;  %v1279_v29 = vcvt.s32.f32 %v319_v21  ;;  %v415_v30 = vunpack.c.2.s8 %v73_v17  ;;  %v421_v31 = vunpack.c.3.s8 %v73_v17 }
  0x17   :  { %2734 = vmatpush.bf16.msra.mxu1 %v2275_v23  ;;  %v2371_v32 = vpack.c.bf16 %v1585_v25, %v1579_v24  ;;  %v1285_v33 = vcvt.s32.f32 %v325_v26  ;;  %v511_v34 = vunpack.c.2.s8 %v97_v22  ;;  %v517_v35 = vunpack.c.3.s8 %v97_v22 }
  0x18   :  { %2747 = vmatpush.bf16.msra.mxu2 %v2323_v28  ;;  %v1375_v36 = vcvt.s32.f32 %v415_v30  ;;  %v1381_v37 = vcvt.s32.f32 %v421_v31  ;;  %v607_v38 = vunpack.c.2.s8 %v121_v27  ;;  %v613_v39 = vunpack.c.3.s8 %v121_v27 }
  0x19   :  { %2760 = vmatpush.bf16.msra.mxu3 %v2371_v32  ;;  %v2221_v40 = vpack.c.bf16 %v1285_v33, %v1279_v29  ;;  %v1471_v41 = vcvt.s32.f32 %v511_v34  ;;  %v1477_v42 = vcvt.s32.f32 %v517_v35  ;;  %v307_v43 = vunpack.c.0.s8 %v49_v8  ;;  %v157_v32 = vld [vmem:[%s7099_s1 + $0x390] sm:$0xff] }
  0x1a   :  { %v2269_v44 = vpack.c.bf16 %v1381_v37, %v1375_v36  ;;  %v1567_v45 = vcvt.s32.f32 %v607_v38  ;;  %v1573_v46 = vcvt.s32.f32 %v613_v39  ;;  %v313_v47 = vunpack.c.1.s8 %v49_v8 }
  0x1b   :  { %2722 = vmatpush.bf16.msra.mxu0 %v2221_v40  ;;  %v2317_v48 = vpack.c.bf16 %v1477_v42, %v1471_v41  ;;  %v1267_v49 = vcvt.s32.f32 %v307_v43  ;;  %v403_v50 = vunpack.c.0.s8 %v73_v17  ;;  %v409_v51 = vunpack.c.1.s8 %v73_v17  ;;  %v181_v41 = vld [vmem:[%s7099_s1 + $0x450] sm:$0xff] }
  0x1c   :  { %2735 = vmatpush.bf16.msra.mxu1 %v2269_v44  ;;  %v2365_v53 = vpack.c.bf16 %v1573_v46, %v1567_v45  ;;  %v1273_v54 = vcvt.s32.f32 %v313_v47  ;;  %v499_v55 = vunpack.c.0.s8 %v97_v22  ;;  %v505_v56 = vunpack.c.1.s8 %v97_v22  ;;  %v205_v46 = vld [vmem:[%s7099_s1 + $0x510] sm:$0xff] }
  0x1d   :  { %2748 = vmatpush.bf16.msra.mxu2 %v2317_v48  ;;  %v1363_v57 = vcvt.s32.f32 %v403_v50  ;;  %v1369_v58 = vcvt.s32.f32 %v409_v51  ;;  %v595_v59 = vunpack.c.0.s8 %v121_v27  ;;  %v601_v60 = vunpack.c.1.s8 %v121_v27  ;;  %v229_v51 = vld [vmem:[%s7099_s1 + $0x5d0] sm:$0xff] }
  0x1e   :  { %2761 = vmatpush.bf16.msra.mxu3 %v2365_v53  ;;  %v2215_v62 = vpack.c.bf16 %v1273_v54, %v1267_v49  ;;  %v1459_v63 = vcvt.s32.f32 %v499_v55  ;;  %v1465_v0 = vcvt.s32.f32 %v505_v56  ;;  %v295_v1 = vunpack.c.2.s8 %v43_v52 }
  0x1f   :  { %v2263_v3 = vpack.c.bf16 %v1369_v58, %v1363_v57  ;;  %v1555_v4 = vcvt.s32.f32 %v595_v59  ;;  %v1561_v5 = vcvt.s32.f32 %v601_v60  ;;  %v301_v6 = vunpack.c.3.s8 %v43_v52 }
  0x20   :  { %2723 = vmatpush.bf16.msra.mxu0 %v2215_v62  ;;  %v2311_v8 = vpack.c.bf16 %v1465_v0, %v1459_v63  ;;  %v1255_v9 = vcvt.s32.f32 %v295_v1  ;;  %v391_v10 = vunpack.c.2.s8 %v67_v61  ;;  %v397_v11 = vunpack.c.3.s8 %v67_v61 }
  0x21   :  { %2736 = vmatpush.bf16.msra.mxu1 %v2263_v3  ;;  %v2359_v12 = vpack.c.bf16 %v1561_v5, %v1555_v4  ;;  %v1261_v13 = vcvt.s32.f32 %v301_v6  ;;  %v487_v14 = vunpack.c.2.s8 %v91_v2  ;;  %v493_v15 = vunpack.c.3.s8 %v91_v2 }
  0x22   :  { %2749 = vmatpush.bf16.msra.mxu2 %v2311_v8  ;;  %v1351_v16 = vcvt.s32.f32 %v391_v10  ;;  %v1357_v17 = vcvt.s32.f32 %v397_v11  ;;  %v583_v18 = vunpack.c.2.s8 %v115_v7  ;;  %v589_v19 = vunpack.c.3.s8 %v115_v7 }
  0x23   :  { %2762 = vmatpush.bf16.msra.mxu3 %v2359_v12  ;;  %v2209_v20 = vpack.c.bf16 %v1261_v13, %v1255_v9  ;;  %v1447_v21 = vcvt.s32.f32 %v487_v14  ;;  %v1453_v22 = vcvt.s32.f32 %v493_v15  ;;  %v283_v23 = vunpack.c.0.s8 %v43_v52  ;;  %v151_v12 = vld [vmem:[%s7099_s1 + $0x360] sm:$0xff] }
  0x24   :  { %v2257_v24 = vpack.c.bf16 %v1357_v17, %v1351_v16  ;;  %v1543_v25 = vcvt.s32.f32 %v583_v18  ;;  %v1549_v26 = vcvt.s32.f32 %v589_v19  ;;  %v289_v27 = vunpack.c.1.s8 %v43_v52 }
  0x25   :  { %2724 = vmatpush.bf16.msra.mxu0 %v2209_v20  ;;  %v2305_v28 = vpack.c.bf16 %v1453_v22, %v1447_v21  ;;  %v1243_v29 = vcvt.s32.f32 %v283_v23  ;;  %v379_v30 = vunpack.c.0.s8 %v67_v61  ;;  %v385_v31 = vunpack.c.1.s8 %v67_v61  ;;  %v175_v21 = vld [vmem:[%s7099_s1 + $0x420] sm:$0xff] }
  0x26   :  { %2737 = vmatpush.bf16.msra.mxu1 %v2257_v24  ;;  %v2353_v33 = vpack.c.bf16 %v1549_v26, %v1543_v25  ;;  %v1249_v34 = vcvt.s32.f32 %v289_v27  ;;  %v475_v35 = vunpack.c.0.s8 %v91_v2  ;;  %v481_v36 = vunpack.c.1.s8 %v91_v2  ;;  %v199_v26 = vld [vmem:[%s7099_s1 + $0x4e0] sm:$0xff] }
  0x27   :  { %2750 = vmatpush.bf16.msra.mxu2 %v2305_v28  ;;  %v1339_v37 = vcvt.s32.f32 %v379_v30  ;;  %v1345_v38 = vcvt.s32.f32 %v385_v31  ;;  %v571_v39 = vunpack.c.0.s8 %v115_v7  ;;  %v577_v40 = vunpack.c.1.s8 %v115_v7  ;;  %v223_v31 = vld [vmem:[%s7099_s1 + $0x5a0] sm:$0xff] }
  0x28   :  { %2763 = vmatpush.bf16.msra.mxu3 %v2353_v33  ;;  %v2203_v42 = vpack.c.bf16 %v1249_v34, %v1243_v29  ;;  %v1435_v43 = vcvt.s32.f32 %v475_v35  ;;  %v1441_v44 = vcvt.s32.f32 %v481_v36  ;;  %v751_v45 = vunpack.c.2.s8 %v157_v32 }
  0x29   :  { %v2251_v47 = vpack.c.bf16 %v1345_v38, %v1339_v37  ;;  %v1531_v48 = vcvt.s32.f32 %v571_v39  ;;  %v1537_v49 = vcvt.s32.f32 %v577_v40  ;;  %v757_v50 = vunpack.c.3.s8 %v157_v32 }
  0x2a   :  { %2725 = vmatpush.bf16.msra.mxu0 %v2203_v42  ;;  %v2299_v52 = vpack.c.bf16 %v1441_v44, %v1435_v43  ;;  %v1711_v53 = vcvt.s32.f32 %v751_v45  ;;  %v847_v54 = vunpack.c.2.s8 %v181_v41  ;;  %v853_v55 = vunpack.c.3.s8 %v181_v41 }
  0x2b   :  { %2738 = vmatpush.bf16.msra.mxu1 %v2251_v47  ;;  %v2347_v56 = vpack.c.bf16 %v1537_v49, %v1531_v48  ;;  %v1717_v57 = vcvt.s32.f32 %v757_v50  ;;  %v943_v58 = vunpack.c.2.s8 %v205_v46  ;;  %v949_v59 = vunpack.c.3.s8 %v205_v46 }
  0x2c   :  { %2751 = vmatpush.bf16.msra.mxu2 %v2299_v52  ;;  %v1807_v60 = vcvt.s32.f32 %v847_v54  ;;  %v1813_v61 = vcvt.s32.f32 %v853_v55  ;;  %v1039_v62 = vunpack.c.2.s8 %v229_v51  ;;  %v1045_v63 = vunpack.c.3.s8 %v229_v51 }
  0x2d   :  { %2764 = vmatpush.bf16.msra.mxu3 %v2347_v56  ;;  %v2437_v0 = vpack.c.bf16 %v1717_v57, %v1711_v53  ;;  %v1903_v1 = vcvt.s32.f32 %v943_v58  ;;  %v1909_v2 = vcvt.s32.f32 %v949_v59  ;;  %v739_v3 = vunpack.c.0.s8 %v157_v32  ;;  %v145_v56 = vld [vmem:[%s7099_s1 + $0x330] sm:$0xff] }
  0x2e   :  { %v2485_v4 = vpack.c.bf16 %v1813_v61, %v1807_v60  ;;  %v1999_v5 = vcvt.s32.f32 %v1039_v62  ;;  %v2005_v6 = vcvt.s32.f32 %v1045_v63  ;;  %v745_v7 = vunpack.c.1.s8 %v157_v32 }
  0x2f   :  { %2770 = vmatpush.bf16.msrb.mxu0 %v2437_v0  ;;  %v2533_v8 = vpack.c.bf16 %v1909_v2, %v1903_v1  ;;  %v1699_v9 = vcvt.s32.f32 %v739_v3  ;;  %v835_v10 = vunpack.c.0.s8 %v181_v41  ;;  %v841_v11 = vunpack.c.1.s8 %v181_v41  ;;  %v169_v1 = vld [vmem:[%s7099_s1 + $0x3f0] sm:$0xff] }
  0x30   :  { %2783 = vmatpush.bf16.msrb.mxu1 %v2485_v4  ;;  %v2581_v13 = vpack.c.bf16 %v2005_v6, %v1999_v5  ;;  %v1705_v14 = vcvt.s32.f32 %v745_v7  ;;  %v931_v15 = vunpack.c.0.s8 %v205_v46  ;;  %v937_v16 = vunpack.c.1.s8 %v205_v46  ;;  %v193_v6 = vld [vmem:[%s7099_s1 + $0x4b0] sm:$0xff] }
  0x31   :  { %2796 = vmatpush.bf16.msrb.mxu2 %v2533_v8  ;;  %v1795_v17 = vcvt.s32.f32 %v835_v10  ;;  %v1801_v18 = vcvt.s32.f32 %v841_v11  ;;  %v1027_v19 = vunpack.c.0.s8 %v229_v51  ;;  %v1033_v20 = vunpack.c.1.s8 %v229_v51  ;;  %v217_v11 = vld [vmem:[%s7099_s1 + $0x570] sm:$0xff] }
  0x32   :  { %2809 = vmatpush.bf16.msrb.mxu3 %v2581_v13  ;;  %v2431_v22 = vpack.c.bf16 %v1705_v14, %v1699_v9  ;;  %v1891_v23 = vcvt.s32.f32 %v931_v15  ;;  %v1897_v24 = vcvt.s32.f32 %v937_v16  ;;  %v727_v25 = vunpack.c.2.s8 %v151_v12  ;;  %v39_v16 = vld [vmem:[%s7100_s0 + $0x8] sm:$0xff] }
  0x33   :  { %v2479_v27 = vpack.c.bf16 %v1801_v18, %v1795_v17  ;;  %v1987_v28 = vcvt.s32.f32 %v1027_v19  ;;  %v1993_v29 = vcvt.s32.f32 %v1033_v20  ;;  %v733_v30 = vunpack.c.3.s8 %v151_v12 }
  0x34   :  { %2771 = vmatpush.bf16.msrb.mxu0 %v2431_v22  ;;  %v2527_v32 = vpack.c.bf16 %v1897_v24, %v1891_v23  ;;  %v1687_v33 = vcvt.s32.f32 %v727_v25  ;;  %v823_v34 = vunpack.c.2.s8 %v175_v21  ;;  %v829_v35 = vunpack.c.3.s8 %v175_v21 }
  0x35   :  { %2784 = vmatpush.bf16.msrb.mxu1 %v2479_v27  ;;  %v2575_v36 = vpack.c.bf16 %v1993_v29, %v1987_v28  ;;  %v1693_v37 = vcvt.s32.f32 %v733_v30  ;;  %v919_v38 = vunpack.c.2.s8 %v199_v26  ;;  %v925_v39 = vunpack.c.3.s8 %v199_v26 }
  0x36   :  { %2797 = vmatpush.bf16.msrb.mxu2 %v2527_v32  ;;  %v1783_v40 = vcvt.s32.f32 %v823_v34  ;;  %v1789_v41 = vcvt.s32.f32 %v829_v35  ;;  %v1015_v42 = vunpack.c.2.s8 %v223_v31  ;;  %v1021_v43 = vunpack.c.3.s8 %v223_v31 }
  0x37   :  { %2810 = vmatpush.bf16.msrb.mxu3 %v2575_v36  ;;  %v2425_v44 = vpack.c.bf16 %v1693_v37, %v1687_v33  ;;  %v1879_v45 = vcvt.s32.f32 %v919_v38  ;;  %v1885_v46 = vcvt.s32.f32 %v925_v39  ;;  %v715_v47 = vunpack.c.0.s8 %v151_v12  ;;  %v38_v37 = vld [vmem:[%s7100_s0] sm:$0xff] }
  0x38   :  { %v2473_v48 = vpack.c.bf16 %v1789_v41, %v1783_v40  ;;  %v1975_v49 = vcvt.s32.f32 %v1015_v42  ;;  %v1981_v50 = vcvt.s32.f32 %v1021_v43  ;;  %v721_v51 = vunpack.c.1.s8 %v151_v12 }
  0x39   :  { %2772 = vmatpush.bf16.msrb.mxu0 %v2425_v44  ;;  %v2521_v52 = vpack.c.bf16 %v1885_v46, %v1879_v45  ;;  %v1675_v53 = vcvt.s32.f32 %v715_v47  ;;  %v811_v54 = vunpack.c.0.s8 %v175_v21  ;;  %v817_v55 = vunpack.c.1.s8 %v175_v21 }
  0x3a   :  { %2785 = vmatpush.bf16.msrb.mxu1 %v2473_v48  ;;  %v2569_v57 = vpack.c.bf16 %v1981_v50, %v1975_v49  ;;  %v1681_v58 = vcvt.s32.f32 %v721_v51  ;;  %v907_v59 = vunpack.c.0.s8 %v199_v26  ;;  %v913_v60 = vunpack.c.1.s8 %v199_v26  ;;  %v139_v50 = vld [vmem:[%s7099_s1 + $0x300] sm:$0xff] }
  0x3b   :  { %2798 = vmatpush.bf16.msrb.mxu2 %v2521_v52  ;;  %v1771_v61 = vcvt.s32.f32 %v811_v54  ;;  %v1777_v62 = vcvt.s32.f32 %v817_v55  ;;  %v1003_v63 = vunpack.c.0.s8 %v223_v31  ;;  %v1009_v0 = vunpack.c.1.s8 %v223_v31  ;;  %v163_v55 = vld [vmem:[%s7099_s1 + $0x3c0] sm:$0xff] }
  0x3c   :  { %2811 = vmatpush.bf16.msrb.mxu3 %v2569_v57  ;;  %v2419_v2 = vpack.c.bf16 %v1681_v58, %v1675_v53  ;;  %v1867_v3 = vcvt.s32.f32 %v907_v59  ;;  %v1873_v4 = vcvt.s32.f32 %v913_v60  ;;  %v703_v5 = vunpack.c.2.s8 %v145_v56  ;;  %v187_v60 = vld [vmem:[%s7099_s1 + $0x480] sm:$0xff] }
  0x3d   :  { %v2467_v7 = vpack.c.bf16 %v1777_v62, %v1771_v61  ;;  %v1963_v8 = vcvt.s32.f32 %v1003_v63  ;;  %v1969_v9 = vcvt.s32.f32 %v1009_v0  ;;  %v709_v10 = vunpack.c.3.s8 %v145_v56 }
  0x3e   :  { %2773 = vmatpush.bf16.msrb.mxu0 %v2419_v2  ;;  %v2515_v12 = vpack.c.bf16 %v1873_v4, %v1867_v3  ;;  %v1663_v13 = vcvt.s32.f32 %v703_v5  ;;  %v799_v14 = vunpack.c.2.s8 %v169_v1  ;;  %v805_v15 = vunpack.c.3.s8 %v169_v1 }
  0x3f   :  { %2786 = vmatpush.bf16.msrb.mxu1 %v2467_v7  ;;  %v2563_v17 = vpack.c.bf16 %v1969_v9, %v1963_v8  ;;  %v1669_v18 = vcvt.s32.f32 %v709_v10  ;;  %v895_v19 = vunpack.c.2.s8 %v193_v6  ;;  %v901_v20 = vunpack.c.3.s8 %v193_v6 }
  0x40   :  { %2799 = vmatpush.bf16.msrb.mxu2 %v2515_v12  ;;  %v1759_v21 = vcvt.s32.f32 %v799_v14  ;;  %v1765_v22 = vcvt.s32.f32 %v805_v15  ;;  %v991_v23 = vunpack.c.2.s8 %v217_v11  ;;  %v997_v24 = vunpack.c.3.s8 %v217_v11 }
  0x41   :  { %2812 = vmatpush.bf16.msrb.mxu3 %v2563_v17  ;;  %v2413_v25 = vpack.c.bf16 %v1669_v18, %v1663_v13  ;;  %v1855_v26 = vcvt.s32.f32 %v895_v19  ;;  %v1861_v27 = vcvt.s32.f32 %v901_v20  ;;  %v2690_v28 = vunpack.c.l.b16 %v39_v16 }
  0x42   :  { %v2461_v29 = vpack.c.bf16 %v1765_v22, %v1759_v21  ;;  %v1951_v30 = vcvt.s32.f32 %v991_v23  ;;  %v1957_v31 = vcvt.s32.f32 %v997_v24  ;;  %v691_v32 = vunpack.c.0.s8 %v145_v56 }
  0x43   :  { %2774 = vmatpush.bf16.msrb.mxu0 %v2413_v25  ;;  %v2509_v33 = vpack.c.bf16 %v1861_v27, %v1855_v26  ;;  %v5394_v34 = vpack.c.b16 %v2690_v28, %v2690_v28  ;;  %v697_v35 = vunpack.c.1.s8 %v145_v56  ;;  %v787_v36 = vunpack.c.0.s8 %v169_v1  ;;  %v253_v26 = vld [vmem:[%s7099_s1 + $0x690] sm:$0xff] }
  0x44   :  { %2787 = vmatpush.bf16.msrb.mxu1 %v2461_v29  ;;  %v2557_v38 = vpack.c.bf16 %v1957_v31, %v1951_v30  ;;  %v1651_v39 = vcvt.s32.f32 %v691_v32  ;;  %v793_v40 = vunpack.c.1.s8 %v169_v1  ;;  %v883_v41 = vunpack.c.0.s8 %v193_v6  ;;  %v211_v1 = vld [vmem:[%s7099_s1 + $0x540] sm:$0xff] }
  0x45   :  { %2800 = vmatpush.bf16.msrb.mxu2 %v2509_v33  ;;  %v1657_v42 = vcvt.s32.f32 %v697_v35  ;;  %v1747_v43 = vcvt.s32.f32 %v787_v36  ;;  %v889_v44 = vunpack.c.1.s8 %v193_v6  ;;  %v979_v45 = vunpack.c.0.s8 %v217_v11  ;;  %v277_v36 = vld [vmem:[%s7099_s1 + $0x750] sm:$0xff] }
  0x46   :  { %2813 = vmatpush.bf16.msrb.mxu3 %v2557_v38  ;;  %2752 = vmatmul.bf16.vlgmr.msra.gmra.mxu2 %v5394_v34  ;;  %v1753_v46 = vcvt.s32.f32 %v793_v40  ;;  %v1843_v47 = vcvt.s32.f32 %v883_v41  ;;  %v985_v48 = vunpack.c.1.s8 %v217_v11  ;;  %v2688_v49 = vunpack.c.l.b16 %v38_v37  ;;  %v62_v41 = vld [vmem:[%s7099_s1 + $0x98] sm:$0xff] }
  0x47   :  { %v2407_v51 = vpack.c.bf16 %v1657_v42, %v1651_v39  ;;  %v1849_v52 = vcvt.s32.f32 %v889_v44  ;;  %v1939_v53 = vcvt.s32.f32 %v979_v45  ;;  %v2691_v54 = vunpack.c.h.b16 %v39_v16 }
  0x48   :  { %v2455_v56 = vpack.c.bf16 %v1753_v46, %v1747_v43  ;;  %v1945_v57 = vcvt.s32.f32 %v985_v48  ;;  %v5406_v58 = vpack.c.b16 %v2688_v49, %v2688_v49  ;;  %v2689_v59 = vunpack.c.h.b16 %v38_v37  ;;  %v86_v46 = vld [vmem:[%s7099_s1 + $0x158] sm:$0xff] }
  0x49   :  { %2775 = vmatpush.bf16.msrb.mxu0 %v2407_v51  ;;  %v2503_v61 = vpack.c.bf16 %v1849_v52, %v1843_v47  ;;  %v5411_v62 = vpack.c.b16 %v2691_v54, %v2691_v54  ;;  %v679_v63 = vunpack.c.2.s8 %v139_v50  ;;  %v685_v0 = vunpack.c.3.s8 %v139_v50 }
  0x4a   :  { %2788 = vmatpush.bf16.msrb.mxu1 %v2455_v56  ;;  %v2551_v2 = vpack.c.bf16 %v1945_v57, %v1939_v53  ;;  %2726 = vmatmul.bf16.vlgmr.msra.gmra.mxu0 %v5406_v58  ;;  %v5417_v3 = vpack.c.b16 %v2689_v59, %v2689_v59  ;;  %v775_v4 = vunpack.c.2.s8 %v163_v55  ;;  %v781_v5 = vunpack.c.3.s8 %v163_v55 }
  0x4b   :  { %2801 = vmatpush.bf16.msrb.mxu2 %v2503_v61  ;;  %2765 = vmatmul.bf16.vlgmr.msra.gmra.mxu3 %v5411_v62  ;;  %v1639_v6 = vcvt.s32.f32 %v679_v63  ;;  %v1645_v7 = vcvt.s32.f32 %v685_v0  ;;  %v871_v8 = vunpack.c.2.s8 %v187_v60  ;;  %v877_v9 = vunpack.c.3.s8 %v187_v60 }
  0x4c   :  { %2814 = vmatpush.bf16.msrb.mxu3 %v2551_v2  ;;  %2739 = vmatmul.bf16.vlgmr.msra.gmra.mxu1 %v5417_v3  ;;  %v1735_v10 = vcvt.s32.f32 %v775_v4  ;;  %v1741_v11 = vcvt.s32.f32 %v781_v5  ;;  %v967_v12 = vunpack.c.2.s8 %v211_v1  ;;  %v973_v13 = vunpack.c.3.s8 %v211_v1 }
  0x4d   :  { %v2401_v14 = vpack.c.bf16 %v1645_v7, %v1639_v6  ;;  %v1831_v15 = vcvt.s32.f32 %v871_v8  ;;  %v1837_v16 = vcvt.s32.f32 %v877_v9  ;;  %v667_v17 = vunpack.c.0.s8 %v139_v50 }
  0x4e   :  { %v2449_v18 = vpack.c.bf16 %v1741_v11, %v1735_v10  ;;  %v1927_v19 = vcvt.s32.f32 %v967_v12  ;;  %v1933_v20 = vcvt.s32.f32 %v973_v13  ;;  %v673_v21 = vunpack.c.1.s8 %v139_v50  ;;  %v41_v10 = vld [vmem:[%s7100_s0 + $0x18] sm:$0xff] }
  0x4f   :  { %2776 = vmatpush.bf16.msrb.mxu0 %v2401_v14  ;;  %v2497_v22 = vpack.c.bf16 %v1837_v16, %v1831_v15  ;;  %v1627_v23 = vcvt.s32.f32 %v667_v17  ;;  %v763_v24 = vunpack.c.0.s8 %v163_v55  ;;  %v769_v25 = vunpack.c.1.s8 %v163_v55  ;;  %v40_v15 = vld [vmem:[%s7100_s0 + $0x10] sm:$0xff] }
  0x50   :  { %2789 = vmatpush.bf16.msrb.mxu1 %v2449_v18  ;;  %v2545_v27 = vpack.c.bf16 %v1933_v20, %v1927_v19  ;;  %v1633_v28 = vcvt.s32.f32 %v673_v21  ;;  %v859_v29 = vunpack.c.0.s8 %v187_v60  ;;  %v865_v30 = vunpack.c.1.s8 %v187_v60  ;;  %v247_v20 = vld [vmem:[%s7099_s1 + $0x660] sm:$0xff] }
  0x51   :  { %2802 = vmatpush.bf16.msrb.mxu2 %v2497_v22  ;;  %v1723_v31 = vcvt.s32.f32 %v763_v24  ;;  %v1729_v32 = vcvt.s32.f32 %v769_v25  ;;  %v955_v33 = vunpack.c.0.s8 %v211_v1  ;;  %v961_v35 = vunpack.c.1.s8 %v211_v1  ;;  %v271_v25 = vld [vmem:[%s7099_s1 + $0x720] sm:$0xff] }
  0x52   :  { %2815 = vmatpush.bf16.msrb.mxu3 %v2545_v27  ;;  %v2395_v37 = vpack.c.bf16 %v1633_v28, %v1627_v23  ;;  %v1819_v38 = vcvt.s32.f32 %v859_v29  ;;  %v1825_v39 = vcvt.s32.f32 %v865_v30  ;;  %v1135_v40 = vunpack.c.2.s8 %v253_v26  ;;  %v56_v30 = vld [vmem:[%s7099_s1 + $0x68] sm:$0xff] }
  0x53   :  { %v2443_v42 = vpack.c.bf16 %v1729_v32, %v1723_v31  ;;  %v1915_v43 = vcvt.s32.f32 %v955_v33  ;;  %v1921_v44 = vcvt.s32.f32 %v961_v35  ;;  %v1141_v45 = vunpack.c.3.s8 %v253_v26 }
  0x54   :  { %2777 = vmatpush.bf16.msrb.mxu0 %v2395_v37  ;;  %v2491_v47 = vpack.c.bf16 %v1825_v39, %v1819_v38  ;;  %v2095_v48 = vcvt.s32.f32 %v1135_v40  ;;  %v1231_v49 = vunpack.c.2.s8 %v277_v36  ;;  %v1237_v50 = vunpack.c.3.s8 %v277_v36 }
  0x55   :  { %2790 = vmatpush.bf16.msrb.mxu1 %v2443_v42  ;;  %v2539_v51 = vpack.c.bf16 %v1921_v44, %v1915_v43  ;;  %v2101_v52 = vcvt.s32.f32 %v1141_v45  ;;  %v368_v53 = vunpack.c.2.s8 %v62_v41  ;;  %v374_v54 = vunpack.c.3.s8 %v62_v41 }
  0x56   :  { %2803 = vmatpush.bf16.msrb.mxu2 %v2491_v47  ;;  %v2191_v55 = vcvt.s32.f32 %v1231_v49  ;;  %v2197_v56 = vcvt.s32.f32 %v1237_v50  ;;  %v464_v57 = vunpack.c.2.s8 %v86_v46  ;;  %v470_v59 = vunpack.c.3.s8 %v86_v46 }
  0x57   :  { %2816 = vmatpush.bf16.msrb.mxu3 %v2539_v51  ;;  %v2629_v60 = vpack.c.bf16 %v2101_v52, %v2095_v48  ;;  %v1328_v61 = vcvt.s32.f32 %v368_v53  ;;  %v1334_v63 = vcvt.s32.f32 %v374_v54  ;;  %v1123_v0 = vunpack.c.0.s8 %v253_v26 }
  0x58   :  { %v2677_v1 = vpack.c.bf16 %v2197_v56, %v2191_v55  ;;  %v1424_v2 = vcvt.s32.f32 %v464_v57  ;;  %v1430_v4 = vcvt.s32.f32 %v470_v59  ;;  %v1129_v5 = vunpack.c.1.s8 %v253_v26 }
  0x59   :  { %2822 = vmatpush.bf16.msra.mxu0 %v2629_v60  ;;  %v2246_v6 = vpack.c.bf16 %v1334_v63, %v1328_v61  ;;  %v2083_v7 = vcvt.s32.f32 %v1123_v0  ;;  %v1219_v8 = vunpack.c.0.s8 %v277_v36  ;;  %v1225_v9 = vunpack.c.1.s8 %v277_v36  ;;  %v80_v36 = vld [vmem:[%s7099_s1 + $0x128] sm:$0xff] }
  0x5a   :  { %2835 = vmatpush.bf16.msra.mxu1 %v2677_v1  ;;  %v2294_v11 = vpack.c.bf16 %v1430_v4, %v1424_v2  ;;  %v2089_v12 = vcvt.s32.f32 %v1129_v5  ;;  %v356_v13 = vunpack.c.0.s8 %v62_v41  ;;  %v362_v14 = vunpack.c.1.s8 %v62_v41  ;;  %v241_v4 = vld [vmem:[%s7099_s1 + $0x630] sm:$0xff] }
  0x5b   :  { %2848 = vmatpush.bf16.msra.mxu2 %v2246_v6  ;;  %v2179_v16 = vcvt.s32.f32 %v1219_v8  ;;  %v2185_v17 = vcvt.s32.f32 %v1225_v9  ;;  %v452_v18 = vunpack.c.0.s8 %v86_v46  ;;  %v458_v19 = vunpack.c.1.s8 %v86_v46 }
  0x5c   :  { %2861 = vmatpush.bf16.msra.mxu3 %v2294_v11  ;;  %v2623_v21 = vpack.c.bf16 %v2089_v12, %v2083_v7  ;;  %v1316_v22 = vcvt.s32.f32 %v356_v13  ;;  %v1322_v23 = vcvt.s32.f32 %v362_v14  ;;  %v2694_v24 = vunpack.c.l.b16 %v41_v10  ;;  %v265_v13 = vld [vmem:[%s7099_s1 + $0x6f0] sm:$0xff] }
  0x5d   :  { %v2671_v26 = vpack.c.bf16 %v2185_v17, %v2179_v16  ;;  %v1412_v27 = vcvt.s32.f32 %v452_v18  ;;  %v1418_v28 = vcvt.s32.f32 %v458_v19  ;;  %v2692_v29 = vunpack.c.l.b16 %v40_v15  ;;  %v50_v18 = vld [vmem:[%s7099_s1 + $0x38] sm:$0xff] }
  0x5e   :  { %2823 = vmatpush.bf16.msra.mxu0 %v2623_v21  ;;  %v2240_v31 = vpack.c.bf16 %v1322_v23, %v1316_v22  ;;  %v5448_v32 = vpack.c.b16 %v2694_v24, %v2694_v24  ;;  %v2695_v33 = vunpack.c.h.b16 %v41_v10  ;;  %v1111_v35 = vunpack.c.2.s8 %v247_v20  ;;  %v74_v23 = vld [vmem:[%s7099_s1 + $0xf8] sm:$0xff] }
  0x5f   :  { %2836 = vmatpush.bf16.msra.mxu1 %v2671_v26  ;;  %v2288_v37 = vpack.c.bf16 %v1418_v28, %v1412_v27  ;;  %v5453_v38 = vpack.c.b16 %v2692_v29, %v2692_v29  ;;  %v1117_v39 = vunpack.c.3.s8 %v247_v20  ;;  %v1207_v40 = vunpack.c.2.s8 %v271_v25 }
  0x60   :  { %2849 = vmatpush.bf16.msra.mxu2 %v2240_v31  ;;  %v5455_v41 = vpack.c.b16 %v2695_v33, %v2695_v33  ;;  %v2071_v42 = vcvt.s32.f32 %v1111_v35  ;;  %v1213_v43 = vunpack.c.3.s8 %v271_v25  ;;  %v344_v44 = vunpack.c.2.s8 %v56_v30 }
  0x61   :  { %2862 = vmatpush.bf16.msra.mxu3 %v2288_v37  ;;  %2804 = vmatmul.bf16.vlgmr.msrb.gmra.mxu2 %v5448_v32  ;;  %v2077_v45 = vcvt.s32.f32 %v1117_v39  ;;  %v2167_v46 = vcvt.s32.f32 %v1207_v40  ;;  %v350_v47 = vunpack.c.3.s8 %v56_v30  ;;  %v440_v48 = vunpack.c.2.s8 %v80_v36 }
  0x62   :  { %2778 = vmatmul.bf16.vlgmr.msrb.gmra.mxu0 %v5453_v38  ;;  %2817 = vmatmul.bf16.vlgmr.msrb.gmra.mxu3 %v5455_v41  ;;  %v2173_v49 = vcvt.s32.f32 %v1213_v43  ;;  %v1304_v50 = vcvt.s32.f32 %v344_v44  ;;  %v446_v51 = vunpack.c.3.s8 %v80_v36  ;;  %v2693_v52 = vunpack.c.h.b16 %v40_v15 }
  0x63   :  { %v2617_v53 = vpack.c.bf16 %v2077_v45, %v2071_v42  ;;  %v1310_v54 = vcvt.s32.f32 %v350_v47  ;;  %v1400_v55 = vcvt.s32.f32 %v440_v48  ;;  %v1099_v56 = vunpack.c.0.s8 %v247_v20 }
  0x64   :  { %v2665_v57 = vpack.c.bf16 %v2173_v49, %v2167_v46  ;;  %v1406_v59 = vcvt.s32.f32 %v446_v51  ;;  %v5460_v60 = vpack.c.b16 %v2693_v52, %v2693_v52  ;;  %v1105_v61 = vunpack.c.1.s8 %v247_v20  ;;  %v235_v52 = vld [vmem:[%s7099_s1 + $0x600] sm:$0xff] }
  0x65   :  { %2824 = vmatpush.bf16.msra.mxu0 %v2617_v53  ;;  %v2234_v63 = vpack.c.bf16 %v1310_v54, %v1304_v50  ;;  %v2059_v0 = vcvt.s32.f32 %v1099_v56  ;;  %v1195_v1 = vunpack.c.0.s8 %v271_v25  ;;  %v1201_v2 = vunpack.c.1.s8 %v271_v25 }
  0x66   :  { %2837 = vmatpush.bf16.msra.mxu1 %v2665_v57  ;;  %v2282_v5 = vpack.c.bf16 %v1406_v59, %v1400_v55  ;;  %v2065_v6 = vcvt.s32.f32 %v1105_v61  ;;  %v332_v7 = vunpack.c.0.s8 %v56_v30  ;;  %v338_v8 = vunpack.c.1.s8 %v56_v30 }
  0x67   :  { %2850 = vmatpush.bf16.msra.mxu2 %v2234_v63  ;;  %2791 = vmatmul.bf16.vlgmr.msrb.gmra.mxu1 %v5460_v60  ;;  %v2155_v9 = vcvt.s32.f32 %v1195_v1  ;;  %v2161_v10 = vcvt.s32.f32 %v1201_v2  ;;  %v428_v11 = vunpack.c.0.s8 %v80_v36  ;;  %v434_v12 = vunpack.c.1.s8 %v80_v36 }
  0x68   :  { %2863 = vmatpush.bf16.msra.mxu3 %v2282_v5  ;;  %v2611_v14 = vpack.c.bf16 %v2065_v6, %v2059_v0  ;;  %v1292_v15 = vcvt.s32.f32 %v332_v7  ;;  %v1298_v16 = vcvt.s32.f32 %v338_v8  ;;  %v1087_v17 = vunpack.c.2.s8 %v241_v4  ;;  %v259_v0 = vld [vmem:[%s7099_s1 + $0x6c0] sm:$0xff]  ;;  %v44_v6 = vld [vmem:[%s7099_s1 + $0x8] sm:$0xff] }
  0x69   :  { %v2659_v19 = vpack.c.bf16 %v2161_v10, %v2155_v9  ;;  %v1388_v20 = vcvt.s32.f32 %v428_v11  ;;  %v1394_v21 = vcvt.s32.f32 %v434_v12  ;;  %v1093_v22 = vunpack.c.3.s8 %v241_v4  ;;  %v68_v11 = vld [vmem:[%s7099_s1 + $0xc8] sm:$0xff] }
  0x6a   :  { %2825 = vmatpush.bf16.msra.mxu0 %v2611_v14  ;;  %v2228_v24 = vpack.c.bf16 %v1298_v16, %v1292_v15  ;;  %v2047_v25 = vcvt.s32.f32 %v1087_v17  ;;  %v1183_v26 = vunpack.c.2.s8 %v265_v13  ;;  %v1189_v27 = vunpack.c.3.s8 %v265_v13 }
  0x6b   :  { %2838 = vmatpush.bf16.msra.mxu1 %v2659_v19  ;;  %v2276_v28 = vpack.c.bf16 %v1394_v21, %v1388_v20  ;;  %v2053_v29 = vcvt.s32.f32 %v1093_v22  ;;  %v320_v30 = vunpack.c.2.s8 %v50_v18  ;;  %v326_v31 = vunpack.c.3.s8 %v50_v18 }
  0x6c   :  { %2851 = vmatpush.bf16.msra.mxu2 %v2228_v24  ;;  %v2143_v33 = vcvt.s32.f32 %v1183_v26  ;;  %v2149_v35 = vcvt.s32.f32 %v1189_v27  ;;  %v416_v36 = vunpack.c.2.s8 %v74_v23  ;;  %v422_v37 = vunpack.c.3.s8 %v74_v23 }
  0x6d   :  { %2864 = vmatpush.bf16.msra.mxu3 %v2276_v28  ;;  %v2605_v39 = vpack.c.bf16 %v2053_v29, %v2047_v25  ;;  %v1280_v40 = vcvt.s32.f32 %v320_v30  ;;  %v1286_v42 = vcvt.s32.f32 %v326_v31  ;;  %v1075_v43 = vunpack.c.0.s8 %v241_v4 }
  0x6e   :  { %v2653_v44 = vpack.c.bf16 %v2149_v35, %v2143_v33  ;;  %v1376_v45 = vcvt.s32.f32 %v416_v36  ;;  %v1382_v46 = vcvt.s32.f32 %v422_v37  ;;  %v1081_v47 = vunpack.c.1.s8 %v241_v4 }
  0x6f   :  { %2826 = vmatpush.bf16.msra.mxu0 %v2605_v39  ;;  %v2222_v48 = vpack.c.bf16 %v1286_v42, %v1280_v40  ;;  %v2035_v49 = vcvt.s32.f32 %v1075_v43  ;;  %v1171_v50 = vunpack.c.0.s8 %v265_v13  ;;  %v1177_v51 = vunpack.c.1.s8 %v265_v13  ;;  %v5490_v39 = vld [vmem:[%s7099_s1 + $0x218] sm:$0xff] }
  0x70   :  { %2839 = vmatpush.bf16.msra.mxu1 %v2653_v44  ;;  %v2270_v53 = vpack.c.bf16 %v1382_v46, %v1376_v45  ;;  %v2041_v54 = vcvt.s32.f32 %v1081_v47  ;;  %v308_v55 = vunpack.c.0.s8 %v50_v18  ;;  %v314_v56 = vunpack.c.1.s8 %v50_v18 }
  0x71   :  { %2852 = vmatpush.bf16.msra.mxu2 %v2222_v48  ;;  %v2131_v57 = vcvt.s32.f32 %v1171_v50  ;;  %v2137_v59 = vcvt.s32.f32 %v1177_v51  ;;  %v404_v61 = vunpack.c.0.s8 %v74_v23  ;;  %v410_v63 = vunpack.c.1.s8 %v74_v23 }
  0x72   :  { %2865 = vmatpush.bf16.msra.mxu3 %v2270_v53  ;;  %v2599_v1 = vpack.c.bf16 %v2041_v54, %v2035_v49  ;;  %v1268_v2 = vcvt.s32.f32 %v308_v55  ;;  %v1274_v4 = vcvt.s32.f32 %v314_v56  ;;  %v1063_v5 = vunpack.c.2.s8 %v235_v52  ;;  %v134_v49 = vld [vmem:[%s7099_s1 + $0x2d8] sm:$0xff] }
  0x73   :  { %v2647_v7 = vpack.c.bf16 %v2137_v59, %v2131_v57  ;;  %v1364_v8 = vcvt.s32.f32 %v404_v61  ;;  %v1370_v9 = vcvt.s32.f32 %v410_v63  ;;  %v1069_v10 = vunpack.c.3.s8 %v235_v52  ;;  %v158_v54 = vld [vmem:[%s7099_s1 + $0x398] sm:$0xff] }
  0x74   :  { %2827 = vmatpush.bf16.msra.mxu0 %v2599_v1  ;;  %v2216_v12 = vpack.c.bf16 %v1274_v4, %v1268_v2  ;;  %v2023_v13 = vcvt.s32.f32 %v1063_v5  ;;  %v1159_v14 = vunpack.c.2.s8 %v259_v0  ;;  %v1165_v15 = vunpack.c.3.s8 %v259_v0  ;;  %v182_v61 = vld [vmem:[%s7099_s1 + $0x458] sm:$0xff]  ;;  %v42_v4 = vld [vmem:[%s7100_s0 + $0x20] sm:$0xff] }
  0x75   :  { %2840 = vmatpush.bf16.msra.mxu1 %v2647_v7  ;;  %v2264_v16 = vpack.c.bf16 %v1370_v9, %v1364_v8  ;;  %v2029_v17 = vcvt.s32.f32 %v1069_v10  ;;  %v296_v18 = vunpack.c.2.s8 %v44_v6  ;;  %v302_v19 = vunpack.c.3.s8 %v44_v6 }
  0x76   :  { %2853 = vmatpush.bf16.msra.mxu2 %v2216_v12  ;;  %v2119_v20 = vcvt.s32.f32 %v1159_v14  ;;  %v2125_v21 = vcvt.s32.f32 %v1165_v15  ;;  %v392_v22 = vunpack.c.2.s8 %v68_v11  ;;  %v398_v23 = vunpack.c.3.s8 %v68_v11 }
  0x77   :  { %2866 = vmatpush.bf16.msra.mxu3 %v2264_v16  ;;  %v2593_v24 = vpack.c.bf16 %v2029_v17, %v2023_v13  ;;  %v1256_v25 = vcvt.s32.f32 %v296_v18  ;;  %v1262_v26 = vcvt.s32.f32 %v302_v19  ;;  %v1051_v27 = vunpack.c.0.s8 %v235_v52 }
  0x78   :  { %v2641_v28 = vpack.c.bf16 %v2125_v21, %v2119_v20  ;;  %v1352_v29 = vcvt.s32.f32 %v392_v22  ;;  %v1358_v30 = vcvt.s32.f32 %v398_v23  ;;  %v1057_v31 = vunpack.c.1.s8 %v235_v52 }
  0x79   :  { %2828 = vmatpush.bf16.msra.mxu0 %v2593_v24  ;;  %v2210_v33 = vpack.c.bf16 %v1262_v26, %v1256_v25  ;;  %v2011_v35 = vcvt.s32.f32 %v1051_v27  ;;  %v1147_v36 = vunpack.c.0.s8 %v259_v0  ;;  %v1153_v37 = vunpack.c.1.s8 %v259_v0 }
  0x7a   :  { %2841 = vmatpush.bf16.msra.mxu1 %v2641_v28  ;;  %v2258_v40 = vpack.c.bf16 %v1358_v30, %v1352_v29  ;;  %v2017_v42 = vcvt.s32.f32 %v1057_v31  ;;  %v284_v43 = vunpack.c.0.s8 %v44_v6  ;;  %v290_v44 = vunpack.c.1.s8 %v44_v6  ;;  %v104_v29 = vld [vmem:[%s7099_s1 + $0x1e8] sm:$0xff] }
  0x7b   :  { %2854 = vmatpush.bf16.msra.mxu2 %v2210_v33  ;;  %v2107_v45 = vcvt.s32.f32 %v1147_v36  ;;  %v2113_v46 = vcvt.s32.f32 %v1153_v37  ;;  %v380_v47 = vunpack.c.0.s8 %v68_v11  ;;  %v386_v48 = vunpack.c.1.s8 %v68_v11 }
  0x7c   :  { %2867 = vmatpush.bf16.msra.mxu3 %v2258_v40  ;;  %v2587_v50 = vpack.c.bf16 %v2017_v42, %v2011_v35  ;;  %v1244_v51 = vcvt.s32.f32 %v284_v43  ;;  %v1250_v52 = vcvt.s32.f32 %v290_v44  ;;  %v560_v53 = vunpack.c.2.s8 %v5490_v39  ;;  %v128_v42 = vld [vmem:[%s7099_s1 + $0x2a8] sm:$0xff] }
  0x7d   :  { %v2635_v55 = vpack.c.bf16 %v2113_v46, %v2107_v45  ;;  %v1340_v56 = vcvt.s32.f32 %v380_v47  ;;  %v1346_v57 = vcvt.s32.f32 %v386_v48  ;;  %v566_v59 = vunpack.c.3.s8 %v5490_v39  ;;  %v152_v47 = vld [vmem:[%s7099_s1 + $0x368] sm:$0xff] }
  0x7e   :  { %2829 = vmatpush.bf16.msra.mxu0 %v2587_v50  ;;  %v2204_v63 = vpack.c.bf16 %v1250_v52, %v1244_v51  ;;  %v1520_v0 = vcvt.s32.f32 %v560_v53  ;;  %v656_v1 = vunpack.c.2.s8 %v134_v49  ;;  %v662_v2 = vunpack.c.3.s8 %v134_v49  ;;  %v176_v52 = vld [vmem:[%s7099_s1 + $0x428] sm:$0xff] }
  0x7f   :  { %2842 = vmatpush.bf16.msra.mxu1 %v2635_v55  ;;  %v2252_v5 = vpack.c.bf16 %v1346_v57, %v1340_v56  ;;  %v1526_v6 = vcvt.s32.f32 %v566_v59  ;;  %v752_v7 = vunpack.c.2.s8 %v158_v54  ;;  %v758_v8 = vunpack.c.3.s8 %v158_v54 }
  0x80   :  { %2855 = vmatpush.bf16.msra.mxu2 %v2204_v63  ;;  %v1616_v9 = vcvt.s32.f32 %v656_v1  ;;  %v1622_v10 = vcvt.s32.f32 %v662_v2  ;;  %v848_v11 = vunpack.c.2.s8 %v182_v61  ;;  %v854_v12 = vunpack.c.3.s8 %v182_v61 }
  0x81   :  { %2868 = vmatpush.bf16.msra.mxu3 %v2252_v5  ;;  %v2342_v13 = vpack.c.bf16 %v1526_v6, %v1520_v0  ;;  %v1712_v14 = vcvt.s32.f32 %v752_v7  ;;  %v1718_v15 = vcvt.s32.f32 %v758_v8  ;;  %v2696_v16 = vunpack.c.l.b16 %v42_v4 }
  0x82   :  { %v2390_v17 = vpack.c.bf16 %v1622_v10, %v1616_v9  ;;  %v1808_v18 = vcvt.s32.f32 %v848_v11  ;;  %v1814_v19 = vcvt.s32.f32 %v854_v12  ;;  %v2697_v20 = vunpack.c.h.b16 %v42_v4 }
  0x83   :  { %2874 = vmatpush.bf16.msrb.mxu0 %v2342_v13  ;;  %v2438_v21 = vpack.c.bf16 %v1718_v15, %v1712_v14  ;;  %v5506_v22 = vpack.c.b16 %v2696_v16, %v2696_v16  ;;  %v548_v23 = vunpack.c.0.s8 %v5490_v39  ;;  %v554_v24 = vunpack.c.1.s8 %v5490_v39  ;;  %2856 = vmatmul.bf16.vlgmr.msra.gmra.mxu2 %v5406_v58 }
  0x84   :  { %2887 = vmatpush.bf16.msrb.mxu1 %v2390_v17  ;;  %v2486_v25 = vpack.c.bf16 %v1814_v19, %v1808_v18  ;;  %v5511_v26 = vpack.c.b16 %v2697_v20, %v2697_v20  ;;  %v644_v27 = vunpack.c.0.s8 %v134_v49  ;;  %v650_v28 = vunpack.c.1.s8 %v134_v49  ;;  %2869 = vmatmul.bf16.vlgmr.msra.gmra.mxu3 %v5417_v3  ;;  %v98_v17 = vld [vmem:[%s7099_s1 + $0x1b8] sm:$0xff] }
  0x85   :  { %2900 = vmatpush.bf16.msrb.mxu2 %v2438_v21  ;;  %2830 = vmatmul.bf16.vlgmr.msra.gmra.mxu0 %v5506_v22  ;;  %v1508_v30 = vcvt.s32.f32 %v548_v23  ;;  %v1514_v31 = vcvt.s32.f32 %v554_v24  ;;  %v740_v33 = vunpack.c.0.s8 %v158_v54  ;;  %v746_v35 = vunpack.c.1.s8 %v158_v54 }
  0x86   :  { %2913 = vmatpush.bf16.msrb.mxu3 %v2486_v25  ;;  %2843 = vmatmul.bf16.vlgmr.msra.gmra.mxu1 %v5511_v26  ;;  %v1604_v36 = vcvt.s32.f32 %v644_v27  ;;  %v1610_v37 = vcvt.s32.f32 %v650_v28  ;;  %v836_v39 = vunpack.c.0.s8 %v182_v61  ;;  %v842_v40 = vunpack.c.1.s8 %v182_v61  ;;  %v122_v28 = vld [vmem:[%s7099_s1 + $0x278] sm:$0xff] }
  0x87   :  { %v2336_v43 = vpack.c.bf16 %v1514_v31, %v1508_v30  ;;  %v1700_v44 = vcvt.s32.f32 %v740_v33  ;;  %v1706_v45 = vcvt.s32.f32 %v746_v35  ;;  %v536_v46 = vunpack.c.2.s8 %v104_v29  ;;  %v146_v35 = vld [vmem:[%s7099_s1 + $0x338] sm:$0xff] }
  0x88   :  { %v2384_v48 = vpack.c.bf16 %v1610_v37, %v1604_v36  ;;  %v1796_v49 = vcvt.s32.f32 %v836_v39  ;;  %v1802_v50 = vcvt.s32.f32 %v842_v40  ;;  %v542_v51 = vunpack.c.3.s8 %v104_v29 }
  0x89   :  { %2875 = vmatpush.bf16.msrb.mxu0 %v2336_v43  ;;  %v2432_v53 = vpack.c.bf16 %v1706_v45, %v1700_v44  ;;  %v1496_v54 = vcvt.s32.f32 %v536_v46  ;;  %v632_v55 = vunpack.c.2.s8 %v128_v42  ;;  %v638_v56 = vunpack.c.3.s8 %v128_v42 }
  0x8a   :  { %2888 = vmatpush.bf16.msrb.mxu1 %v2384_v48  ;;  %v2480_v57 = vpack.c.bf16 %v1802_v50, %v1796_v49  ;;  %v1502_v59 = vcvt.s32.f32 %v542_v51  ;;  %v728_v61 = vunpack.c.2.s8 %v152_v47  ;;  %v734_v63 = vunpack.c.3.s8 %v152_v47 }
  0x8b   :  { %2901 = vmatpush.bf16.msrb.mxu2 %v2432_v53  ;;  %v1592_v0 = vcvt.s32.f32 %v632_v55  ;;  %v1598_v1 = vcvt.s32.f32 %v638_v56  ;;  %v824_v2 = vunpack.c.2.s8 %v176_v52  ;;  %v830_v4 = vunpack.c.3.s8 %v176_v52 }
  0x8c   :  { %2914 = vmatpush.bf16.msrb.mxu3 %v2480_v57  ;;  %v2330_v5 = vpack.c.bf16 %v1502_v59, %v1496_v54  ;;  %v1688_v6 = vcvt.s32.f32 %v728_v61  ;;  %v1694_v7 = vcvt.s32.f32 %v734_v63  ;;  %v524_v8 = vunpack.c.0.s8 %v104_v29 }
  0x8d   :  { %v2378_v9 = vpack.c.bf16 %v1598_v1, %v1592_v0  ;;  %v1784_v10 = vcvt.s32.f32 %v824_v2  ;;  %v1790_v11 = vcvt.s32.f32 %v830_v4  ;;  %v530_v12 = vunpack.c.1.s8 %v104_v29 }
  0x8e   :  { %2876 = vmatpush.bf16.msrb.mxu0 %v2330_v5  ;;  %v2426_v13 = vpack.c.bf16 %v1694_v7, %v1688_v6  ;;  %v1484_v14 = vcvt.s32.f32 %v524_v8  ;;  %v620_v15 = vunpack.c.0.s8 %v128_v42  ;;  %v626_v16 = vunpack.c.1.s8 %v128_v42  ;;  %v170_v42 = vld [vmem:[%s7099_s1 + $0x3f8] sm:$0xff]  ;;  %v92_v7 = vld [vmem:[%s7099_s1 + $0x188] sm:$0xff] }
  0x8f   :  { %2889 = vmatpush.bf16.msrb.mxu1 %v2378_v9  ;;  %v2474_v18 = vpack.c.bf16 %v1790_v11, %v1784_v10  ;;  %v1490_v19 = vcvt.s32.f32 %v530_v12  ;;  %v716_v20 = vunpack.c.0.s8 %v152_v47  ;;  %v722_v21 = vunpack.c.1.s8 %v152_v47 }
  0x90   :  { %2902 = vmatpush.bf16.msrb.mxu2 %v2426_v13  ;;  %v1580_v23 = vcvt.s32.f32 %v620_v15  ;;  %v1586_v24 = vcvt.s32.f32 %v626_v16  ;;  %v812_v25 = vunpack.c.0.s8 %v176_v52  ;;  %v818_v27 = vunpack.c.1.s8 %v176_v52  ;;  %v116_v16 = vld [vmem:[%s7099_s1 + $0x248] sm:$0xff] }
  0x91   :  { %2915 = vmatpush.bf16.msrb.mxu3 %v2474_v18  ;;  %v2324_v29 = vpack.c.bf16 %v1490_v19, %v1484_v14  ;;  %v1676_v30 = vcvt.s32.f32 %v716_v20  ;;  %v1682_v31 = vcvt.s32.f32 %v722_v21  ;;  %v512_v33 = vunpack.c.2.s8 %v98_v17  ;;  %v140_v21 = vld [vmem:[%s7099_s1 + $0x308] sm:$0xff] }
  0x92   :  { %v2372_v36 = vpack.c.bf16 %v1586_v24, %v1580_v23  ;;  %v1772_v37 = vcvt.s32.f32 %v812_v25  ;;  %v1778_v39 = vcvt.s32.f32 %v818_v27  ;;  %v518_v40 = vunpack.c.3.s8 %v98_v17 }
  0x93   :  { %2877 = vmatpush.bf16.msrb.mxu0 %v2324_v29  ;;  %v2420_v43 = vpack.c.bf16 %v1682_v31, %v1676_v30  ;;  %v1472_v44 = vcvt.s32.f32 %v512_v33  ;;  %v608_v45 = vunpack.c.2.s8 %v122_v28  ;;  %v614_v46 = vunpack.c.3.s8 %v122_v28 }
  0x94   :  { %2890 = vmatpush.bf16.msrb.mxu1 %v2372_v36  ;;  %v2468_v47 = vpack.c.bf16 %v1778_v39, %v1772_v37  ;;  %v1478_v48 = vcvt.s32.f32 %v518_v40  ;;  %v704_v49 = vunpack.c.2.s8 %v146_v35  ;;  %v710_v50 = vunpack.c.3.s8 %v146_v35 }
  0x95   :  { %2903 = vmatpush.bf16.msrb.mxu2 %v2420_v43  ;;  %v1568_v51 = vcvt.s32.f32 %v608_v45  ;;  %v1574_v52 = vcvt.s32.f32 %v614_v46  ;;  %v800_v53 = vunpack.c.2.s8 %v170_v42  ;;  %v806_v54 = vunpack.c.3.s8 %v170_v42 }
  0x96   :  { %2916 = vmatpush.bf16.msrb.mxu3 %v2468_v47  ;;  %v2318_v55 = vpack.c.bf16 %v1478_v48, %v1472_v44  ;;  %v1664_v56 = vcvt.s32.f32 %v704_v49  ;;  %v1670_v57 = vcvt.s32.f32 %v710_v50  ;;  %v500_v59 = vunpack.c.0.s8 %v98_v17 }
  0x97   :  { %v2366_v61 = vpack.c.bf16 %v1574_v52, %v1568_v51  ;;  %v1760_v63 = vcvt.s32.f32 %v800_v53  ;;  %v1766_v0 = vcvt.s32.f32 %v806_v54  ;;  %v506_v1 = vunpack.c.1.s8 %v98_v17 }
  0x98   :  { %2878 = vmatpush.bf16.msrb.mxu0 %v2318_v55  ;;  %v2414_v2 = vpack.c.bf16 %v1670_v57, %v1664_v56  ;;  %v1460_v4 = vcvt.s32.f32 %v500_v59  ;;  %v596_v5 = vunpack.c.0.s8 %v122_v28  ;;  %v602_v6 = vunpack.c.1.s8 %v122_v28  ;;  %v164_v28 = vld [vmem:[%s7099_s1 + $0x3c8] sm:$0xff]  ;;  %v206_v57 = vld [vmem:[%s7099_s1 + $0x518] sm:$0xff] }
  0x99   :  { %2891 = vmatpush.bf16.msrb.mxu1 %v2366_v61  ;;  %v2462_v8 = vpack.c.bf16 %v1766_v0, %v1760_v63  ;;  %v1466_v9 = vcvt.s32.f32 %v506_v1  ;;  %v692_v10 = vunpack.c.0.s8 %v146_v35  ;;  %v698_v11 = vunpack.c.1.s8 %v146_v35 }
  0x9a   :  { %2904 = vmatpush.bf16.msrb.mxu2 %v2414_v2  ;;  %v1556_v12 = vcvt.s32.f32 %v596_v5  ;;  %v1562_v13 = vcvt.s32.f32 %v602_v6  ;;  %v788_v14 = vunpack.c.0.s8 %v170_v42  ;;  %v794_v15 = vunpack.c.1.s8 %v170_v42  ;;  %v230_v6 = vld [vmem:[%s7099_s1 + $0x5d8] sm:$0xff] }
  0x9b   :  { %2917 = vmatpush.bf16.msrb.mxu3 %v2462_v8  ;;  %v2312_v17 = vpack.c.bf16 %v1466_v9, %v1460_v4  ;;  %v1652_v18 = vcvt.s32.f32 %v692_v10  ;;  %v1658_v19 = vcvt.s32.f32 %v698_v11  ;;  %v488_v20 = vunpack.c.2.s8 %v92_v7  ;;  %v254_v11 = vld [vmem:[%s7099_s1 + $0x698] sm:$0xff] }
  0x9c   :  { %v2360_v23 = vpack.c.bf16 %v1562_v13, %v1556_v12  ;;  %v1748_v24 = vcvt.s32.f32 %v788_v14  ;;  %v1754_v25 = vcvt.s32.f32 %v794_v15  ;;  %v494_v27 = vunpack.c.3.s8 %v92_v7 }
  0x9d   :  { %2879 = vmatpush.bf16.msrb.mxu0 %v2312_v17  ;;  %v2408_v29 = vpack.c.bf16 %v1658_v19, %v1652_v18  ;;  %v1448_v30 = vcvt.s32.f32 %v488_v20  ;;  %v584_v31 = vunpack.c.2.s8 %v116_v16  ;;  %v590_v33 = vunpack.c.3.s8 %v116_v16 }
  0x9e   :  { %2892 = vmatpush.bf16.msrb.mxu1 %v2360_v23  ;;  %v2456_v35 = vpack.c.bf16 %v1754_v25, %v1748_v24  ;;  %v1454_v36 = vcvt.s32.f32 %v494_v27  ;;  %v680_v37 = vunpack.c.2.s8 %v140_v21  ;;  %v686_v39 = vunpack.c.3.s8 %v140_v21 }
  0x9f   :  { %2905 = vmatpush.bf16.msrb.mxu2 %v2408_v29  ;;  %v1544_v40 = vcvt.s32.f32 %v584_v31  ;;  %v1550_v42 = vcvt.s32.f32 %v590_v33  ;;  %v776_v43 = vunpack.c.2.s8 %v164_v28  ;;  %v782_v44 = vunpack.c.3.s8 %v164_v28 }
  0xa0   :  { %2918 = vmatpush.bf16.msrb.mxu3 %v2456_v35  ;;  %v2306_v45 = vpack.c.bf16 %v1454_v36, %v1448_v30  ;;  %v1640_v46 = vcvt.s32.f32 %v680_v37  ;;  %v1646_v47 = vcvt.s32.f32 %v686_v39  ;;  %v476_v48 = vunpack.c.0.s8 %v92_v7 }
  0xa1   :  { %v2354_v49 = vpack.c.bf16 %v1550_v42, %v1544_v40  ;;  %v1736_v50 = vcvt.s32.f32 %v776_v43  ;;  %v1742_v51 = vcvt.s32.f32 %v782_v44  ;;  %v482_v52 = vunpack.c.1.s8 %v92_v7 }
  0xa2   :  { %2880 = vmatpush.bf16.msrb.mxu0 %v2306_v45  ;;  %v2402_v53 = vpack.c.bf16 %v1646_v47, %v1640_v46  ;;  %v1436_v54 = vcvt.s32.f32 %v476_v48  ;;  %v572_v55 = vunpack.c.0.s8 %v116_v16  ;;  %v578_v56 = vunpack.c.1.s8 %v116_v16  ;;  %v278_v16 = vld [vmem:[%s7099_s1 + $0x758] sm:$0xff]  ;;  %v200_v47 = vld [vmem:[%s7099_s1 + $0x4e8] sm:$0xff] }
  0xa3   :  { %2893 = vmatpush.bf16.msrb.mxu1 %v2354_v49  ;;  %v2450_v59 = vpack.c.bf16 %v1742_v51, %v1736_v50  ;;  %v1442_v61 = vcvt.s32.f32 %v482_v52  ;;  %v668_v63 = vunpack.c.0.s8 %v140_v21  ;;  %v674_v0 = vunpack.c.1.s8 %v140_v21 }
  0xa4   :  { %2906 = vmatpush.bf16.msrb.mxu2 %v2402_v53  ;;  %v1532_v1 = vcvt.s32.f32 %v572_v55  ;;  %v1538_v2 = vcvt.s32.f32 %v578_v56  ;;  %v764_v4 = vunpack.c.0.s8 %v164_v28  ;;  %v770_v5 = vunpack.c.1.s8 %v164_v28  ;;  %v224_v56 = vld [vmem:[%s7099_s1 + $0x5a8] sm:$0xff] }
  0xa5   :  { %2919 = vmatpush.bf16.msrb.mxu3 %v2450_v59  ;;  %v2300_v7 = vpack.c.bf16 %v1442_v61, %v1436_v54  ;;  %v1628_v8 = vcvt.s32.f32 %v668_v63  ;;  %v1634_v9 = vcvt.s32.f32 %v674_v0  ;;  %v944_v10 = vunpack.c.2.s8 %v206_v57  ;;  %v248_v0 = vld [vmem:[%s7099_s1 + $0x668] sm:$0xff] }
  0xa6   :  { %v2348_v12 = vpack.c.bf16 %v1538_v2, %v1532_v1  ;;  %v1724_v13 = vcvt.s32.f32 %v764_v4  ;;  %v1730_v14 = vcvt.s32.f32 %v770_v5  ;;  %v950_v15 = vunpack.c.3.s8 %v206_v57 }
  0xa7   :  { %2881 = vmatpush.bf16.msrb.mxu0 %v2300_v7  ;;  %v2396_v17 = vpack.c.bf16 %v1634_v9, %v1628_v8  ;;  %v1904_v18 = vcvt.s32.f32 %v944_v10  ;;  %v1040_v19 = vunpack.c.2.s8 %v230_v6  ;;  %v1046_v20 = vunpack.c.3.s8 %v230_v6 }
  0xa8   :  { %2894 = vmatpush.bf16.msrb.mxu1 %v2348_v12  ;;  %v2444_v21 = vpack.c.bf16 %v1730_v14, %v1724_v13  ;;  %v1910_v23 = vcvt.s32.f32 %v950_v15  ;;  %v1136_v24 = vunpack.c.2.s8 %v254_v11  ;;  %v1142_v25 = vunpack.c.3.s8 %v254_v11 }
  0xa9   :  { %2907 = vmatpush.bf16.msrb.mxu2 %v2396_v17  ;;  %v2000_v27 = vcvt.s32.f32 %v1040_v19  ;;  %v2006_v28 = vcvt.s32.f32 %v1046_v20  ;;  %v1232_v29 = vunpack.c.2.s8 %v278_v16  ;;  %v1238_v30 = vunpack.c.3.s8 %v278_v16 }
  0xaa   :  { %2920 = vmatpush.bf16.msrb.mxu3 %v2444_v21  ;;  %v2534_v31 = vpack.c.bf16 %v1910_v23, %v1904_v18  ;;  %v2096_v33 = vcvt.s32.f32 %v1136_v24  ;;  %v2102_v35 = vcvt.s32.f32 %v1142_v25  ;;  %v932_v36 = vunpack.c.0.s8 %v206_v57  ;;  %2882 = vmatmul.bf16.vlgmr.msrb.gmra.mxu0 %v5394_v34 }
  0xab   :  { %v2582_v37 = vpack.c.bf16 %v2006_v28, %v2000_v27  ;;  %v2192_v39 = vcvt.s32.f32 %v1232_v29  ;;  %v2198_v40 = vcvt.s32.f32 %v1238_v30  ;;  %v938_v42 = vunpack.c.1.s8 %v206_v57  ;;  %2895 = vmatmul.bf16.vlgmr.msrb.gmra.mxu1 %v5411_v62 }
  0xac   :  { %2926 = vmatpush.bf16.msra.mxu0 %v2534_v31  ;;  %v2630_v43 = vpack.c.bf16 %v2102_v35, %v2096_v33  ;;  %v1892_v44 = vcvt.s32.f32 %v932_v36  ;;  %v1028_v45 = vunpack.c.0.s8 %v230_v6  ;;  %v1034_v46 = vunpack.c.1.s8 %v230_v6  ;;  %2908 = vmatmul.bf16.vlgmr.msrb.gmra.mxu2 %v5453_v38  ;;  %v272_v6 = vld [vmem:[%s7099_s1 + $0x728] sm:$0xff]  ;;  %v194_v35 = vld [vmem:[%s7099_s1 + $0x4b8] sm:$0xff] }
  0xad   :  { %2939 = vmatpush.bf16.msra.mxu1 %v2582_v37  ;;  %v2678_v48 = vpack.c.bf16 %v2198_v40, %v2192_v39  ;;  %v1898_v49 = vcvt.s32.f32 %v938_v42  ;;  %v1124_v50 = vunpack.c.0.s8 %v254_v11  ;;  %v1130_v51 = vunpack.c.1.s8 %v254_v11  ;;  %2921 = vmatmul.bf16.vlgmr.msrb.gmra.mxu3 %v5460_v60 }
  0xae   :  { %2952 = vmatpush.bf16.msra.mxu2 %v2630_v43  ;;  %v1988_v52 = vcvt.s32.f32 %v1028_v45  ;;  %v1994_v53 = vcvt.s32.f32 %v1034_v46  ;;  %v1220_v54 = vunpack.c.0.s8 %v278_v16  ;;  %v1226_v55 = vunpack.c.1.s8 %v278_v16  ;;  %v218_v46 = vld [vmem:[%s7099_s1 + $0x578] sm:$0xff] }
  0xaf   :  { %2965 = vmatpush.bf16.msra.mxu3 %v2678_v48  ;;  %v2528_v57 = vpack.c.bf16 %v1898_v49, %v1892_v44  ;;  %v2084_v59 = vcvt.s32.f32 %v1124_v50  ;;  %v2090_v61 = vcvt.s32.f32 %v1130_v51  ;;  %v920_v63 = vunpack.c.2.s8 %v200_v47  ;;  %v242_v51 = vld [vmem:[%s7099_s1 + $0x638] sm:$0xff] }
  0xb0   :  { %v2576_v1 = vpack.c.bf16 %v1994_v53, %v1988_v52  ;;  %v2180_v2 = vcvt.s32.f32 %v1220_v54  ;;  %v2186_v4 = vcvt.s32.f32 %v1226_v55  ;;  %v926_v5 = vunpack.c.3.s8 %v200_v47 }
  0xb1   :  { %2927 = vmatpush.bf16.msra.mxu0 %v2528_v57  ;;  %v2624_v7 = vpack.c.bf16 %v2090_v61, %v2084_v59  ;;  %v1880_v8 = vcvt.s32.f32 %v920_v63  ;;  %v1016_v9 = vunpack.c.2.s8 %v224_v56  ;;  %v1022_v10 = vunpack.c.3.s8 %v224_v56 }
  0xb2   :  { %2940 = vmatpush.bf16.msra.mxu1 %v2576_v1  ;;  %v2672_v11 = vpack.c.bf16 %v2186_v4, %v2180_v2  ;;  %v1886_v12 = vcvt.s32.f32 %v926_v5  ;;  %v1112_v13 = vunpack.c.2.s8 %v248_v0  ;;  %v1118_v14 = vunpack.c.3.s8 %v248_v0 }
  0xb3   :  { %2953 = vmatpush.bf16.msra.mxu2 %v2624_v7  ;;  %v1976_v15 = vcvt.s32.f32 %v1016_v9  ;;  %v1982_v16 = vcvt.s32.f32 %v1022_v10  ;;  %v1208_v17 = vunpack.c.2.s8 %v272_v6  ;;  %v1214_v18 = vunpack.c.3.s8 %v272_v6 }
  0xb4   :  { %2966 = vmatpush.bf16.msra.mxu3 %v2672_v11  ;;  %v2522_v19 = vpack.c.bf16 %v1886_v12, %v1880_v8  ;;  %v2072_v20 = vcvt.s32.f32 %v1112_v13  ;;  %v2078_v21 = vcvt.s32.f32 %v1118_v14  ;;  %v908_v23 = vunpack.c.0.s8 %v200_v47 }
  0xb5   :  { %v2570_v24 = vpack.c.bf16 %v1982_v16, %v1976_v15  ;;  %v2168_v25 = vcvt.s32.f32 %v1208_v17  ;;  %v2174_v27 = vcvt.s32.f32 %v1214_v18  ;;  %v914_v28 = vunpack.c.1.s8 %v200_v47 }
  0xb6   :  { %2928 = vmatpush.bf16.msra.mxu0 %v2522_v19  ;;  %v2618_v29 = vpack.c.bf16 %v2078_v21, %v2072_v20  ;;  %v1868_v30 = vcvt.s32.f32 %v908_v23  ;;  %v1004_v31 = vunpack.c.0.s8 %v224_v56  ;;  %v1010_v33 = vunpack.c.1.s8 %v224_v56  ;;  %v266_v56 = vld [vmem:[%s7099_s1 + $0x6f8] sm:$0xff]  ;;  %v188_v21 = vld [vmem:[%s7099_s1 + $0x488] sm:$0xff] }
  0xb7   :  { %2941 = vmatpush.bf16.msra.mxu1 %v2570_v24  ;;  %v2666_v36 = vpack.c.bf16 %v2174_v27, %v2168_v25  ;;  %v1874_v37 = vcvt.s32.f32 %v914_v28  ;;  %v1100_v39 = vunpack.c.0.s8 %v248_v0  ;;  %v1106_v40 = vunpack.c.1.s8 %v248_v0 }
  0xb8   :  { %2954 = vmatpush.bf16.msra.mxu2 %v2618_v29  ;;  %v1964_v42 = vcvt.s32.f32 %v1004_v31  ;;  %v1970_v43 = vcvt.s32.f32 %v1010_v33  ;;  %v1196_v44 = vunpack.c.0.s8 %v272_v6  ;;  %v1202_v45 = vunpack.c.1.s8 %v272_v6  ;;  %v212_v33 = vld [vmem:[%s7099_s1 + $0x548] sm:$0xff] }
  0xb9   :  { %2967 = vmatpush.bf16.msra.mxu3 %v2666_v36  ;;  %v2516_v47 = vpack.c.bf16 %v1874_v37, %v1868_v30  ;;  %v2060_v48 = vcvt.s32.f32 %v1100_v39  ;;  %v2066_v49 = vcvt.s32.f32 %v1106_v40  ;;  %v896_v50 = vunpack.c.2.s8 %v194_v35  ;;  %v236_v40 = vld [vmem:[%s7099_s1 + $0x608] sm:$0xff] }
  0xba   :  { %v2564_v52 = vpack.c.bf16 %v1970_v43, %v1964_v42  ;;  %v2156_v53 = vcvt.s32.f32 %v1196_v44  ;;  %v2162_v54 = vcvt.s32.f32 %v1202_v45  ;;  %v902_v55 = vunpack.c.3.s8 %v194_v35 }
  0xbb   :  { %2929 = vmatpush.bf16.msra.mxu0 %v2516_v47  ;;  %v2612_v57 = vpack.c.bf16 %v2066_v49, %v2060_v48  ;;  %v1856_v59 = vcvt.s32.f32 %v896_v50  ;;  %v992_v61 = vunpack.c.2.s8 %v218_v46  ;;  %v998_v63 = vunpack.c.3.s8 %v218_v46 }
  0xbc   :  { %2942 = vmatpush.bf16.msra.mxu1 %v2564_v52  ;;  %v2660_v0 = vpack.c.bf16 %v2162_v54, %v2156_v53  ;;  %v1862_v1 = vcvt.s32.f32 %v902_v55  ;;  %v1088_v2 = vunpack.c.2.s8 %v242_v51  ;;  %v1094_v4 = vunpack.c.3.s8 %v242_v51 }
  0xbd   :  { %2955 = vmatpush.bf16.msra.mxu2 %v2612_v57  ;;  %v1952_v5 = vcvt.s32.f32 %v992_v61  ;;  %v1958_v6 = vcvt.s32.f32 %v998_v63  ;;  %v1184_v7 = vunpack.c.2.s8 %v266_v56  ;;  %v1190_v8 = vunpack.c.3.s8 %v266_v56 }
  0xbe   :  { %2968 = vmatpush.bf16.msra.mxu3 %v2660_v0  ;;  %v2510_v9 = vpack.c.bf16 %v1862_v1, %v1856_v59  ;;  %v2048_v10 = vcvt.s32.f32 %v1088_v2  ;;  %v2054_v11 = vcvt.s32.f32 %v1094_v4  ;;  %v884_v12 = vunpack.c.0.s8 %v194_v35 }
  0xbf   :  { %v2558_v13 = vpack.c.bf16 %v1958_v6, %v1952_v5  ;;  %v2144_v14 = vcvt.s32.f32 %v1184_v7  ;;  %v2150_v15 = vcvt.s32.f32 %v1190_v8  ;;  %v890_v16 = vunpack.c.1.s8 %v194_v35 }
  0xc0   :  { %2930 = vmatpush.bf16.msra.mxu0 %v2510_v9  ;;  %v2606_v17 = vpack.c.bf16 %v2054_v11, %v2048_v10  ;;  %v1844_v18 = vcvt.s32.f32 %v884_v12  ;;  %v980_v19 = vunpack.c.0.s8 %v218_v46  ;;  %v986_v20 = vunpack.c.1.s8 %v218_v46  ;;  %v260_v46 = vld [vmem:[%s7099_s1 + $0x6c8] sm:$0xff]  ;;  %v63_v11 = vld [vmem:[%s7099_s1 + $0xa0] sm:$0xff] }
  0xc1   :  { %2943 = vmatpush.bf16.msra.mxu1 %v2558_v13  ;;  %v2654_v23 = vpack.c.bf16 %v2150_v15, %v2144_v14  ;;  %v1850_v24 = vcvt.s32.f32 %v890_v16  ;;  %v1076_v25 = vunpack.c.0.s8 %v242_v51  ;;  %v1082_v27 = vunpack.c.1.s8 %v242_v51 }
  0xc2   :  { %2956 = vmatpush.bf16.msra.mxu2 %v2606_v17  ;;  %v1940_v28 = vcvt.s32.f32 %v980_v19  ;;  %v1946_v29 = vcvt.s32.f32 %v986_v20  ;;  %v1172_v30 = vunpack.c.0.s8 %v266_v56  ;;  %v1178_v31 = vunpack.c.1.s8 %v266_v56  ;;  %v87_v20 = vld [vmem:[%s7099_s1 + $0x160] sm:$0xff] }
  0xc3   :  { %2969 = vmatpush.bf16.msra.mxu3 %v2654_v23  ;;  %v2504_v35 = vpack.c.bf16 %v1850_v24, %v1844_v18  ;;  %v2036_v36 = vcvt.s32.f32 %v1076_v25  ;;  %v2042_v37 = vcvt.s32.f32 %v1082_v27  ;;  %v872_v39 = vunpack.c.2.s8 %v188_v21  ;;  %v111_v27 = vld [vmem:[%s7099_s1 + $0x220] sm:$0xff] }
  0xc4   :  { %v2552_v42 = vpack.c.bf16 %v1946_v29, %v1940_v28  ;;  %v2132_v43 = vcvt.s32.f32 %v1172_v30  ;;  %v2138_v44 = vcvt.s32.f32 %v1178_v31  ;;  %v878_v45 = vunpack.c.3.s8 %v188_v21 }
  0xc5   :  { %2931 = vmatpush.bf16.msra.mxu0 %v2504_v35  ;;  %v2600_v47 = vpack.c.bf16 %v2042_v37, %v2036_v36  ;;  %v1832_v48 = vcvt.s32.f32 %v872_v39  ;;  %v968_v49 = vunpack.c.2.s8 %v212_v33  ;;  %v974_v50 = vunpack.c.3.s8 %v212_v33 }
  0xc6   :  { %2944 = vmatpush.bf16.msra.mxu1 %v2552_v42  ;;  %v2648_v51 = vpack.c.bf16 %v2138_v44, %v2132_v43  ;;  %v1838_v52 = vcvt.s32.f32 %v878_v45  ;;  %v1064_v53 = vunpack.c.2.s8 %v236_v40  ;;  %v1070_v54 = vunpack.c.3.s8 %v236_v40 }
  0xc7   :  { %2957 = vmatpush.bf16.msra.mxu2 %v2600_v47  ;;  %v1928_v55 = vcvt.s32.f32 %v968_v49  ;;  %v1934_v56 = vcvt.s32.f32 %v974_v50  ;;  %v1160_v57 = vunpack.c.2.s8 %v260_v46  ;;  %v1166_v59 = vunpack.c.3.s8 %v260_v46 }
  0xc8   :  { %2970 = vmatpush.bf16.msra.mxu3 %v2648_v51  ;;  %v2498_v61 = vpack.c.bf16 %v1838_v52, %v1832_v48  ;;  %v2024_v63 = vcvt.s32.f32 %v1064_v53  ;;  %v2030_v0 = vcvt.s32.f32 %v1070_v54  ;;  %v860_v1 = vunpack.c.0.s8 %v188_v21 }
  0xc9   :  { %v2546_v2 = vpack.c.bf16 %v1934_v56, %v1928_v55  ;;  %v2120_v4 = vcvt.s32.f32 %v1160_v57  ;;  %v2126_v5 = vcvt.s32.f32 %v1166_v59  ;;  %v866_v6 = vunpack.c.1.s8 %v188_v21 }
  0xca   :  { %2932 = vmatpush.bf16.msra.mxu0 %v2498_v61  ;;  %v2594_v7 = vpack.c.bf16 %v2030_v0, %v2024_v63  ;;  %v1820_v8 = vcvt.s32.f32 %v860_v1  ;;  %v956_v9 = vunpack.c.0.s8 %v212_v33  ;;  %v962_v10 = vunpack.c.1.s8 %v212_v33  ;;  %v135_v33 = vld [vmem:[%s7099_s1 + $0x2e0] sm:$0xff]  ;;  %v57_v0 = vld [vmem:[%s7099_s1 + $0x70] sm:$0xff] }
  0xcb   :  { %2945 = vmatpush.bf16.msra.mxu1 %v2546_v2  ;;  %v2642_v12 = vpack.c.bf16 %v2126_v5, %v2120_v4  ;;  %v1826_v13 = vcvt.s32.f32 %v866_v6  ;;  %v1052_v14 = vunpack.c.0.s8 %v236_v40  ;;  %v1058_v15 = vunpack.c.1.s8 %v236_v40 }
  0xcc   :  { %2958 = vmatpush.bf16.msra.mxu2 %v2594_v7  ;;  %v1916_v16 = vcvt.s32.f32 %v956_v9  ;;  %v1922_v17 = vcvt.s32.f32 %v962_v10  ;;  %v1148_v18 = vunpack.c.0.s8 %v260_v46  ;;  %v1154_v19 = vunpack.c.1.s8 %v260_v46  ;;  %v81_v10 = vld [vmem:[%s7099_s1 + $0x130] sm:$0xff] }
  0xcd   :  { %2971 = vmatpush.bf16.msra.mxu3 %v2642_v12  ;;  %v2492_v21 = vpack.c.bf16 %v1826_v13, %v1820_v8  ;;  %v2012_v23 = vcvt.s32.f32 %v1052_v14  ;;  %v2018_v24 = vcvt.s32.f32 %v1058_v15  ;;  %v369_v25 = vunpack.c.2.s8 %v63_v11  ;;  %v105_v15 = vld [vmem:[%s7099_s1 + $0x1f0] sm:$0xff] }
  0xce   :  { %v2540_v28 = vpack.c.bf16 %v1922_v17, %v1916_v16  ;;  %v2108_v29 = vcvt.s32.f32 %v1148_v18  ;;  %v2114_v30 = vcvt.s32.f32 %v1154_v19  ;;  %v375_v31 = vunpack.c.3.s8 %v63_v11 }
  0xcf   :  { %2933 = vmatpush.bf16.msra.mxu0 %v2492_v21  ;;  %v2588_v35 = vpack.c.bf16 %v2018_v24, %v2012_v23  ;;  %v1329_v36 = vcvt.s32.f32 %v369_v25  ;;  %v465_v37 = vunpack.c.2.s8 %v87_v20  ;;  %v471_v39 = vunpack.c.3.s8 %v87_v20 }
  0xd0   :  { %2946 = vmatpush.bf16.msra.mxu1 %v2540_v28  ;;  %v2636_v40 = vpack.c.bf16 %v2114_v30, %v2108_v29  ;;  %v1335_v42 = vcvt.s32.f32 %v375_v31  ;;  %v561_v43 = vunpack.c.2.s8 %v111_v27  ;;  %v567_v44 = vunpack.c.3.s8 %v111_v27 }
  0xd1   :  { %2959 = vmatpush.bf16.msra.mxu2 %v2588_v35  ;;  %v1425_v45 = vcvt.s32.f32 %v465_v37  ;;  %v1431_v46 = vcvt.s32.f32 %v471_v39  ;;  %v657_v47 = vunpack.c.2.s8 %v135_v33  ;;  %v663_v48 = vunpack.c.3.s8 %v135_v33 }
  0xd2   :  { %2972 = vmatpush.bf16.msra.mxu3 %v2636_v40  ;;  %v2247_v49 = vpack.c.bf16 %v1335_v42, %v1329_v36  ;;  %v1521_v50 = vcvt.s32.f32 %v561_v43  ;;  %v1527_v51 = vcvt.s32.f32 %v567_v44  ;;  %2934 = vmatmul.bf16.vlgmr.msra.gmra.mxu0 %v5448_v32  ;;  %v357_v52 = vunpack.c.0.s8 %v63_v11 }
  0xd3   :  { %v2295_v53 = vpack.c.bf16 %v1431_v46, %v1425_v45  ;;  %v1617_v54 = vcvt.s32.f32 %v657_v47  ;;  %v1623_v55 = vcvt.s32.f32 %v663_v48  ;;  %2947 = vmatmul.bf16.vlgmr.msra.gmra.mxu1 %v5455_v41  ;;  %v363_v56 = vunpack.c.1.s8 %v63_v11 }
  0xd4   :  { %2978 = vmatpush.bf16.msrb.mxu0 %v2247_v49  ;;  %v2343_v57 = vpack.c.bf16 %v1527_v51, %v1521_v50  ;;  %2960 = vmatmul.bf16.vlgmr.msra.gmra.mxu2 %v5506_v22  ;;  %v1317_v59 = vcvt.s32.f32 %v357_v52  ;;  %v453_v61 = vunpack.c.0.s8 %v87_v20  ;;  %v459_v63 = vunpack.c.1.s8 %v87_v20  ;;  %v129_v20 = vld [vmem:[%s7099_s1 + $0x2b0] sm:$0xff]  ;;  %v51_v51 = vld [vmem:[%s7099_s1 + $0x40] sm:$0xff] }
  0xd5   :  { %2991 = vmatpush.bf16.msrb.mxu1 %v2295_v53  ;;  %v2391_v1 = vpack.c.bf16 %v1623_v55, %v1617_v54  ;;  %2973 = vmatmul.bf16.vlgmr.msra.gmra.mxu3 %v5511_v26  ;;  %v1323_v2 = vcvt.s32.f32 %v363_v56  ;;  %v549_v4 = vunpack.c.0.s8 %v111_v27  ;;  %v555_v5 = vunpack.c.1.s8 %v111_v27  ;;  %v5635_v56 = vpop.f32.mrf.mxu0 }
  0xd6   :  { %3004 = vmatpush.bf16.msrb.mxu2 %v2343_v57  ;;  %v1413_v6 = vcvt.s32.f32 %v453_v61  ;;  %v1419_v7 = vcvt.s32.f32 %v459_v63  ;;  %v645_v8 = vunpack.c.0.s8 %v135_v33  ;;  %v651_v9 = vunpack.c.1.s8 %v135_v33  ;;  %v5637_v57 = vpop.f32.mrf.mxu1 }
  0xd7   :  { %3017 = vmatpush.bf16.msrb.mxu3 %v2391_v1  ;;  %v2241_v11 = vpack.c.bf16 %v1323_v2, %v1317_v59  ;;  %v1509_v12 = vcvt.s32.f32 %v549_v4  ;;  %v1515_v13 = vcvt.s32.f32 %v555_v5  ;;  %v345_v14 = vunpack.c.2.s8 %v57_v0  ;;  %v75_v1 = vld [vmem:[%s7099_s1 + $0x100] sm:$0xff] }
  0xd8   :  { %v2289_v16 = vpack.c.bf16 %v1419_v7, %v1413_v6  ;;  %v1605_v17 = vcvt.s32.f32 %v645_v8  ;;  %v1611_v18 = vcvt.s32.f32 %v651_v9  ;;  %v351_v19 = vunpack.c.3.s8 %v57_v0  ;;  %v99_v7 = vld [vmem:[%s7099_s1 + $0x1c0] sm:$0xff] }
  0xd9   :  { %2979 = vmatpush.bf16.msrb.mxu0 %v2241_v11  ;;  %v2337_v21 = vpack.c.bf16 %v1515_v13, %v1509_v12  ;;  %v1305_v23 = vcvt.s32.f32 %v345_v14  ;;  %v441_v24 = vunpack.c.2.s8 %v81_v10  ;;  %v447_v25 = vunpack.c.3.s8 %v81_v10  ;;  %v123_v12 = vld [vmem:[%s7099_s1 + $0x280] sm:$0xff] }
  0xda   :  { %2992 = vmatpush.bf16.msrb.mxu1 %v2289_v16  ;;  %v2385_v27 = vpack.c.bf16 %v1611_v18, %v1605_v17  ;;  %v1311_v28 = vcvt.s32.f32 %v351_v19  ;;  %v537_v29 = vunpack.c.2.s8 %v105_v15  ;;  %v543_v30 = vunpack.c.3.s8 %v105_v15 }
  0xdb   :  { %3005 = vmatpush.bf16.msrb.mxu2 %v2337_v21  ;;  %v1401_v31 = vcvt.s32.f32 %v441_v24  ;;  %v1407_v33 = vcvt.s32.f32 %v447_v25  ;;  %v633_v35 = vunpack.c.2.s8 %v129_v20  ;;  %v639_v36 = vunpack.c.3.s8 %v129_v20 }
  0xdc   :  { %3018 = vmatpush.bf16.msrb.mxu3 %v2385_v27  ;;  %v2235_v37 = vpack.c.bf16 %v1311_v28, %v1305_v23  ;;  %v1497_v39 = vcvt.s32.f32 %v537_v29  ;;  %v1503_v40 = vcvt.s32.f32 %v543_v30  ;;  %v333_v42 = vunpack.c.0.s8 %v57_v0  ;;  %v5648_v27 = vpop.f32.mrf.mxu2  ;;  %v5650_v28 = vpop.f32.mrf.mxu3 }
  0xdd   :  { %v2283_v43 = vpack.c.bf16 %v1407_v33, %v1401_v31  ;;  %v1593_v44 = vcvt.s32.f32 %v633_v35  ;;  %v1599_v45 = vcvt.s32.f32 %v639_v36  ;;  %v339_v46 = vunpack.c.1.s8 %v57_v0 }
  0xde   :  { %2980 = vmatpush.bf16.msrb.mxu0 %v2235_v37  ;;  %v2331_v47 = vpack.c.bf16 %v1503_v40, %v1497_v39  ;;  %v1293_v48 = vcvt.s32.f32 %v333_v42  ;;  %v429_v49 = vunpack.c.0.s8 %v81_v10  ;;  %v435_v50 = vunpack.c.1.s8 %v81_v10  ;;  %v2729_v40 = vpop.f32.mrf.mxu0  ;;  %v2742_v42 = vpop.f32.mrf.mxu1 }
  0xdf   :  { %2993 = vmatpush.bf16.msrb.mxu1 %v2283_v43  ;;  %v2379_v52 = vpack.c.bf16 %v1599_v45, %v1593_v44  ;;  %v1299_v53 = vcvt.s32.f32 %v339_v46  ;;  %v525_v54 = vunpack.c.0.s8 %v105_v15  ;;  %v531_v55 = vunpack.c.1.s8 %v105_v15 }
  0xe0   :  { %3006 = vmatpush.bf16.msrb.mxu2 %v2331_v47  ;;  %v1389_v59 = vcvt.s32.f32 %v429_v49  ;;  %v1395_v61 = vcvt.s32.f32 %v435_v50  ;;  %v621_v63 = vunpack.c.0.s8 %v129_v20  ;;  %v627_v0 = vunpack.c.1.s8 %v129_v20  ;;  %v45_v47 = vld [vmem:[%s7099_s1 + $0x10] sm:$0xff] }
  0xe1   :  { %3019 = vmatpush.bf16.msrb.mxu3 %v2379_v52  ;;  %v2229_v2 = vpack.c.bf16 %v1299_v53, %v1293_v48  ;;  %v1485_v4 = vcvt.s32.f32 %v525_v54  ;;  %v1491_v5 = vcvt.s32.f32 %v531_v55  ;;  %v321_v6 = vunpack.c.2.s8 %v51_v51 }
  0xe2   :  { %v2277_v8 = vpack.c.bf16 %v1395_v61, %v1389_v59  ;;  %v1581_v9 = vcvt.s32.f32 %v621_v63  ;;  %v1587_v10 = vcvt.s32.f32 %v627_v0  ;;  %v327_v11 = vunpack.c.3.s8 %v51_v51  ;;  %v69_v59 = vld [vmem:[%s7099_s1 + $0xd0] sm:$0xff] }
  0xe3   :  { %2981 = vmatpush.bf16.msrb.mxu0 %v2229_v2  ;;  %v2325_v13 = vpack.c.bf16 %v1491_v5, %v1485_v4  ;;  %v1281_v14 = vcvt.s32.f32 %v321_v6  ;;  %v417_v15 = vunpack.c.2.s8 %v75_v1  ;;  %v423_v16 = vunpack.c.3.s8 %v75_v1  ;;  %v93_v2 = vld [vmem:[%s7099_s1 + $0x190] sm:$0xff] }
  0xe4   :  { %2994 = vmatpush.bf16.msrb.mxu1 %v2277_v8  ;;  %v2373_v17 = vpack.c.bf16 %v1587_v10, %v1581_v9  ;;  %v1287_v18 = vcvt.s32.f32 %v327_v11  ;;  %v513_v19 = vunpack.c.2.s8 %v99_v7  ;;  %v519_v20 = vunpack.c.3.s8 %v99_v7  ;;  %v117_v8 = vld [vmem:[%s7099_s1 + $0x250] sm:$0xff] }
  0xe5   :  { %3007 = vmatpush.bf16.msrb.mxu2 %v2325_v13  ;;  %v1377_v21 = vcvt.s32.f32 %v417_v15  ;;  %v1383_v23 = vcvt.s32.f32 %v423_v16  ;;  %v609_v24 = vunpack.c.2.s8 %v123_v12  ;;  %v615_v25 = vunpack.c.3.s8 %v123_v12  ;;  %v2755_v13 = vpop.f32.mrf.mxu2 }
  0xe6   :  { %3020 = vmatpush.bf16.msrb.mxu3 %v2373_v17  ;;  %v2223_v29 = vpack.c.bf16 %v1287_v18, %v1281_v14  ;;  %v1473_v30 = vcvt.s32.f32 %v513_v19  ;;  %v1479_v31 = vcvt.s32.f32 %v519_v20  ;;  %v309_v33 = vunpack.c.0.s8 %v51_v51  ;;  %v2768_v14 = vpop.f32.mrf.mxu3 }
  0xe7   :  { %v2271_v35 = vpack.c.bf16 %v1383_v23, %v1377_v21  ;;  %v1569_v36 = vcvt.s32.f32 %v609_v24  ;;  %v1575_v37 = vcvt.s32.f32 %v615_v25  ;;  %v315_v39 = vunpack.c.1.s8 %v51_v51 }
  0xe8   :  { %2982 = vmatpush.bf16.msrb.mxu0 %v2223_v29  ;;  %v2319_v43 = vpack.c.bf16 %v1479_v31, %v1473_v30  ;;  %v1269_v44 = vcvt.s32.f32 %v309_v33  ;;  %v405_v45 = vunpack.c.0.s8 %v75_v1  ;;  %v411_v46 = vunpack.c.1.s8 %v75_v1 }
  0xe9   :  { %2995 = vmatpush.bf16.msrb.mxu1 %v2271_v35  ;;  %v2367_v48 = vpack.c.bf16 %v1575_v37, %v1569_v36  ;;  %v1275_v49 = vcvt.s32.f32 %v315_v39  ;;  %v501_v50 = vunpack.c.0.s8 %v99_v7  ;;  %v507_v52 = vunpack.c.1.s8 %v99_v7 }
  0xea   :  { %3008 = vmatpush.bf16.msrb.mxu2 %v2319_v43  ;;  %v1365_v53 = vcvt.s32.f32 %v405_v45  ;;  %v1371_v54 = vcvt.s32.f32 %v411_v46  ;;  %v597_v51 = vunpack.c.0.s8 %v123_v12  ;;  %v603_v55 = vunpack.c.1.s8 %v123_v12  ;;  %v5667_v43 = vld [vmem:[%s7099_s1 + $0x3a0] sm:$0xff] }
  0xeb   :  { %3021 = vmatpush.bf16.msrb.mxu3 %v2367_v48  ;;  %v2217_v61 = vpack.c.bf16 %v1275_v49, %v1269_v44  ;;  %v1461_v63 = vcvt.s32.f32 %v501_v50  ;;  %v1467_v0 = vcvt.s32.f32 %v507_v52  ;;  %v297_v1 = vunpack.c.2.s8 %v45_v47 }
  0xec   :  { %v2265_v4 = vpack.c.bf16 %v1371_v54, %v1365_v53  ;;  %v1557_v5 = vcvt.s32.f32 %v597_v51  ;;  %v1563_v6 = vcvt.s32.f32 %v603_v55  ;;  %v303_v7 = vunpack.c.3.s8 %v45_v47  ;;  %v183_v53 = vld [vmem:[%s7099_s1 + $0x460] sm:$0xff]  ;;  %v5672_v54 = vpop.f32.mrf.mxu0  ;;  %v5674_v51 = vpop.f32.mrf.mxu1 }
  0xed   :  { %2983 = vmatpush.bf16.msrb.mxu0 %v2217_v61  ;;  %v2313_v9 = vpack.c.bf16 %v1467_v0, %v1461_v63  ;;  %v1257_v10 = vcvt.s32.f32 %v297_v1  ;;  %v393_v11 = vunpack.c.2.s8 %v69_v59  ;;  %v399_v12 = vunpack.c.3.s8 %v69_v59  ;;  %v207_v0 = vld [vmem:[%s7099_s1 + $0x520] sm:$0xff] }
  0xee   :  { %2996 = vmatpush.bf16.msrb.mxu1 %v2265_v4  ;;  %v2361_v15 = vpack.c.bf16 %v1563_v6, %v1557_v5  ;;  %v1263_v16 = vcvt.s32.f32 %v303_v7  ;;  %v489_v17 = vunpack.c.2.s8 %v93_v2  ;;  %v495_v18 = vunpack.c.3.s8 %v93_v2  ;;  %v231_v6 = vld [vmem:[%s7099_s1 + $0x5e0] sm:$0xff] }
  0xef   :  { %3009 = vmatpush.bf16.msrb.mxu2 %v2313_v9  ;;  %v1353_v19 = vcvt.s32.f32 %v393_v11  ;;  %v1359_v20 = vcvt.s32.f32 %v399_v12  ;;  %v585_v21 = vunpack.c.2.s8 %v117_v8  ;;  %v591_v23 = vunpack.c.3.s8 %v117_v8 }
  0xf0   :  { %3022 = vmatpush.bf16.msrb.mxu3 %v2361_v15  ;;  %v2211_v24 = vpack.c.bf16 %v1263_v16, %v1257_v10  ;;  %v1449_v25 = vcvt.s32.f32 %v489_v17  ;;  %v1455_v29 = vcvt.s32.f32 %v495_v18  ;;  %v285_v30 = vunpack.c.0.s8 %v45_v47 }
  0xf1   :  { %v2259_v31 = vpack.c.bf16 %v1359_v20, %v1353_v19  ;;  %v1545_v33 = vcvt.s32.f32 %v585_v21  ;;  %v1551_v35 = vcvt.s32.f32 %v591_v23  ;;  %v291_v36 = vunpack.c.1.s8 %v45_v47  ;;  %v5684_v19 = vpop.f32.mrf.mxu2  ;;  %v5686_v20 = vpop.f32.mrf.mxu3 }
  0xf2   :  { %2984 = vmatpush.bf16.msrb.mxu0 %v2211_v24  ;;  %v2307_v37 = vpack.c.bf16 %v1455_v29, %v1449_v25  ;;  %v1245_v39 = vcvt.s32.f32 %v285_v30  ;;  %v381_v40 = vunpack.c.0.s8 %v69_v59  ;;  %v387_v42 = vunpack.c.1.s8 %v69_v59 }
  0xf3   :  { %2997 = vmatpush.bf16.msrb.mxu1 %v2259_v31  ;;  %v2355_v44 = vpack.c.bf16 %v1551_v35, %v1545_v33  ;;  %v1251_v45 = vcvt.s32.f32 %v291_v36  ;;  %v477_v46 = vunpack.c.0.s8 %v93_v2  ;;  %v483_v48 = vunpack.c.1.s8 %v93_v2 }
  0xf4   :  { %3010 = vmatpush.bf16.msrb.mxu2 %v2307_v37  ;;  %v1341_v49 = vcvt.s32.f32 %v381_v40  ;;  %v1347_v50 = vcvt.s32.f32 %v387_v42  ;;  %v573_v52 = vunpack.c.0.s8 %v117_v8  ;;  %v579_v47 = vunpack.c.1.s8 %v117_v8  ;;  %v2781_v40 = vpop.f32.mrf.mxu0  ;;  %v2794_v42 = vpop.f32.mrf.mxu1 }
  0xf5   :  { %3023 = vmatpush.bf16.msrb.mxu3 %v2355_v44  ;;  %v2205_v55 = vpack.c.bf16 %v1251_v45, %v1245_v39  ;;  %v1437_v59 = vcvt.s32.f32 %v477_v46  ;;  %v1443_v61 = vcvt.s32.f32 %v483_v48  ;;  %v753_v63 = vunpack.c.2.s8 %v5667_v43  ;;  %v153_v46 = vld [vmem:[%s7099_s1 + $0x370] sm:$0xff] }
  0xf6   :  { %v2253_v1 = vpack.c.bf16 %v1347_v50, %v1341_v49  ;;  %v1533_v2 = vcvt.s32.f32 %v573_v52  ;;  %v1539_v4 = vcvt.s32.f32 %v579_v47  ;;  %v759_v5 = vunpack.c.3.s8 %v5667_v43 }
  0xf7   :  { %2985 = vmatpush.bf16.msrb.mxu0 %v2205_v55  ;;  %v2301_v7 = vpack.c.bf16 %v1443_v61, %v1437_v59  ;;  %v1713_v8 = vcvt.s32.f32 %v753_v63  ;;  %v849_v9 = vunpack.c.2.s8 %v183_v53  ;;  %v855_v10 = vunpack.c.3.s8 %v183_v53  ;;  %v177_v59 = vld [vmem:[%s7099_s1 + $0x430] sm:$0xff] }
  0xf8   :  { %2998 = vmatpush.bf16.msrb.mxu1 %v2253_v1  ;;  %v2349_v11 = vpack.c.bf16 %v1539_v4, %v1533_v2  ;;  %v1719_v12 = vcvt.s32.f32 %v759_v5  ;;  %v945_v13 = vunpack.c.2.s8 %v207_v0  ;;  %v951_v14 = vunpack.c.3.s8 %v207_v0  ;;  %v201_v61 = vld [vmem:[%s7099_s1 + $0x4f0] sm:$0xff] }
  0xf9   :  { %3011 = vmatpush.bf16.msrb.mxu2 %v2301_v7  ;;  %v1809_v15 = vcvt.s32.f32 %v849_v9  ;;  %v1815_v16 = vcvt.s32.f32 %v855_v10  ;;  %v1041_v17 = vunpack.c.2.s8 %v231_v6  ;;  %v1047_v18 = vunpack.c.3.s8 %v231_v6  ;;  %v225_v4 = vld [vmem:[%s7099_s1 + $0x5b0] sm:$0xff]  ;;  %v2820_v9 = vpop.f32.mrf.mxu3 }
  0xfa   :  { %3024 = vmatpush.bf16.msrb.mxu3 %v2349_v11  ;;  %v2439_v21 = vpack.c.bf16 %v1719_v12, %v1713_v8  ;;  %v1905_v23 = vcvt.s32.f32 %v945_v13  ;;  %v1911_v24 = vcvt.s32.f32 %v951_v14  ;;  %v2741_v25 = vadd.f32 %v5637_v57, %v5635_v56  ;;  %2986 = vmatmul.bf16.vlgmr.msrb.gmra.mxu0 %v5406_v58  ;;  %v2807_v8 = vpop.f32.mrf.mxu2 }
  0xfb   :  { %v2487_v29 = vpack.c.bf16 %v1815_v16, %v1809_v15  ;;  %v2001_v30 = vcvt.s32.f32 %v1041_v17  ;;  %v2007_v31 = vcvt.s32.f32 %v1047_v18  ;;  %v741_v33 = vunpack.c.0.s8 %v5667_v43  ;;  %2999 = vmatmul.bf16.vlgmr.msrb.gmra.mxu1 %v5417_v3 }
  0xfc   :  { %3030 = vmatpush.bf16.msra.mxu0 %v2439_v21  ;;  %v2535_v35 = vpack.c.bf16 %v1911_v24, %v1905_v23  ;;  %v747_v36 = vunpack.c.1.s8 %v5667_v43  ;;  %v837_v37 = vunpack.c.0.s8 %v183_v53  ;;  %v843_v39 = vunpack.c.1.s8 %v183_v53  ;;  %3012 = vmatmul.bf16.vlgmr.msrb.gmra.mxu2 %v5394_v34 }
  0xfd   :  { %3043 = vmatpush.bf16.msra.mxu1 %v2487_v29  ;;  %v2583_v56 = vpack.c.bf16 %v2007_v31, %v2001_v30  ;;  %v1701_v57 = vcvt.s32.f32 %v741_v33  ;;  %v933_v44 = vunpack.c.0.s8 %v207_v0  ;;  %v939_v45 = vunpack.c.1.s8 %v207_v0  ;;  %3025 = vmatmul.bf16.vlgmr.msrb.gmra.mxu3 %v5411_v62 }
  0xfe   :  { %3056 = vmatpush.bf16.msra.mxu2 %v2535_v35  ;;  %v1707_v48 = vcvt.s32.f32 %v747_v36  ;;  %v1797_v43 = vcvt.s32.f32 %v837_v37  ;;  %v1803_v49 = vcvt.s32.f32 %v843_v39  ;;  %v1029_v50 = vunpack.c.0.s8 %v231_v6 }
  0xff   :  { %3069 = vmatpush.bf16.msra.mxu3 %v2583_v56  ;;  %v1893_v52 = vcvt.s32.f32 %v933_v44  ;;  %v1899_v47 = vcvt.s32.f32 %v939_v45  ;;  %v1035_v53 = vunpack.c.1.s8 %v231_v6  ;;  %v2754_v55 = vadd.f32 %v5648_v27, %v2741_v25  ;;  %v147_v56 = vld [vmem:[%s7099_s1 + $0x340] sm:$0xff] }
 0x100   :  { %v2433_v63 = vpack.c.bf16 %v1707_v48, %v1701_v57  ;;  %v2481_v0 = vpack.c.bf16 %v1803_v49, %v1797_v43  ;;  %v1989_v1 = vcvt.s32.f32 %v1029_v50  ;;  %v729_v2 = vunpack.c.2.s8 %v153_v46  ;;  %v171_v43 = vld [vmem:[%s7099_s1 + $0x400] sm:$0xff] }
 0x101   :  { %v2529_v5 = vpack.c.bf16 %v1899_v47, %v1893_v52  ;;  %v1995_v6 = vcvt.s32.f32 %v1035_v53  ;;  %v5710_v27 = vadd.f32 %v5650_v28, %v2754_v55  ;;  %v735_v7 = vunpack.c.3.s8 %v153_v46 }
 0x102   :  { %3031 = vmatpush.bf16.msra.mxu0 %v2433_v63  ;;  %3044 = vmatpush.bf16.msra.mxu1 %v2481_v0  ;;  %v1689_v10 = vcvt.s32.f32 %v729_v2  ;;  %v825_v11 = vunpack.c.2.s8 %v177_v59  ;;  %v831_v12 = vunpack.c.3.s8 %v177_v59  ;;  %v921_v13 = vunpack.c.2.s8 %v201_v61  ;;  %v195_v63 = vld [vmem:[%s7099_s1 + $0x4c0] sm:$0xff] }
 0x103   :  { %3057 = vmatpush.bf16.msra.mxu2 %v2529_v5  ;;  %v2577_v14 = vpack.c.bf16 %v1995_v6, %v1989_v1  ;;  %v1695_v15 = vcvt.s32.f32 %v735_v7  ;;  %v927_v16 = vunpack.c.3.s8 %v201_v61  ;;  %v1017_v17 = vunpack.c.2.s8 %v225_v4  ;;  %v219_v5 = vld [vmem:[%s7099_s1 + $0x580] sm:$0xff] }
 0x104   :  { %v1785_v18 = vcvt.s32.f32 %v825_v11  ;;  %v1791_v21 = vcvt.s32.f32 %v831_v12  ;;  %v1881_v23 = vcvt.s32.f32 %v921_v13  ;;  %v1023_v24 = vunpack.c.3.s8 %v225_v4 }
 0x105   :  { %3070 = vmatpush.bf16.msra.mxu3 %v2577_v14  ;;  %v2427_v28 = vpack.c.bf16 %v1695_v15, %v1689_v10  ;;  %v1887_v25 = vcvt.s32.f32 %v927_v16  ;;  %v1977_v29 = vcvt.s32.f32 %v1017_v17  ;;  %v717_v30 = vunpack.c.0.s8 %v153_v46 }
 0x106   :  { %v2475_v31 = vpack.c.bf16 %v1791_v21, %v1785_v18  ;;  %v1983_v33 = vcvt.s32.f32 %v1023_v24  ;;  %v723_v35 = vunpack.c.1.s8 %v153_v46  ;;  %v813_v36 = vunpack.c.0.s8 %v177_v59 }
 0x107   :  { %3032 = vmatpush.bf16.msra.mxu0 %v2427_v28  ;;  %v2523_v37 = vpack.c.bf16 %v1887_v25, %v1881_v23  ;;  %v1677_v39 = vcvt.s32.f32 %v717_v30  ;;  %v819_v40 = vunpack.c.1.s8 %v177_v59  ;;  %v909_v42 = vunpack.c.0.s8 %v201_v61 }
 0x108   :  { %3045 = vmatpush.bf16.msra.mxu1 %v2475_v31  ;;  %v2571_v57 = vpack.c.bf16 %v1983_v33, %v1977_v29  ;;  %v1683_v44 = vcvt.s32.f32 %v723_v35  ;;  %v1773_v45 = vcvt.s32.f32 %v813_v36  ;;  %v915_v48 = vunpack.c.1.s8 %v201_v61 }
 0x109   :  { %3058 = vmatpush.bf16.msra.mxu2 %v2523_v37  ;;  %v1779_v46 = vcvt.s32.f32 %v819_v40  ;;  %v1869_v49 = vcvt.s32.f32 %v909_v42  ;;  %v1005_v50 = vunpack.c.0.s8 %v225_v4  ;;  %v1011_v52 = vunpack.c.1.s8 %v225_v4 }
 0x10a   :  { %3071 = vmatpush.bf16.msra.mxu3 %v2571_v57  ;;  %v2421_v47 = vpack.c.bf16 %v1683_v44, %v1677_v39  ;;  %v1875_v53 = vcvt.s32.f32 %v915_v48  ;;  %v705_v55 = vunpack.c.2.s8 %v147_v56  ;;  %v711_v59 = vunpack.c.3.s8 %v147_v56 }
 0x10b   :  { %v2469_v0 = vpack.c.bf16 %v1779_v46, %v1773_v45  ;;  %v1965_v61 = vcvt.s32.f32 %v1005_v50  ;;  %v1971_v1 = vcvt.s32.f32 %v1011_v52  ;;  %v801_v2 = vunpack.c.2.s8 %v171_v43 }
 0x10c   :  { %3033 = vmatpush.bf16.msra.mxu0 %v2421_v47  ;;  %v2517_v6 = vpack.c.bf16 %v1875_v53, %v1869_v49  ;;  %v1665_v4 = vcvt.s32.f32 %v705_v55  ;;  %v1671_v7 = vcvt.s32.f32 %v711_v59  ;;  %v807_v8 = vunpack.c.3.s8 %v171_v43  ;;  %v189_v53 = vld [vmem:[%s7099_s1 + $0x490] sm:$0xff] }
 0x10d   :  { %3046 = vmatpush.bf16.msra.mxu1 %v2469_v0  ;;  %v2565_v9 = vpack.c.bf16 %v1971_v1, %v1965_v61  ;;  %v1761_v10 = vcvt.s32.f32 %v801_v2  ;;  %v897_v11 = vunpack.c.2.s8 %v195_v63  ;;  %v903_v12 = vunpack.c.3.s8 %v195_v63  ;;  %v213_v61 = vld [vmem:[%s7099_s1 + $0x550] sm:$0xff] }
 0x10e   :  { %3059 = vmatpush.bf16.msra.mxu2 %v2517_v6  ;;  %v2415_v13 = vpack.c.bf16 %v1671_v7, %v1665_v4  ;;  %v1767_v14 = vcvt.s32.f32 %v807_v8  ;;  %v993_v15 = vunpack.c.2.s8 %v219_v5  ;;  %v999_v16 = vunpack.c.3.s8 %v219_v5 }
 0x10f   :  { %3072 = vmatpush.bf16.msra.mxu3 %v2565_v9  ;;  %v1857_v17 = vcvt.s32.f32 %v897_v11  ;;  %v1863_v18 = vcvt.s32.f32 %v903_v12  ;;  %v2780_v21 = vadd.f32 %v5672_v54, %v5710_v27  ;;  %v693_v23 = vunpack.c.0.s8 %v147_v56  ;;  %v141_v54 = vld [vmem:[%s7099_s1 + $0x310] sm:$0xff]  ;;  %v5745_v9 = vpop.f32.mrf.mxu1 }
 0x110   :  { %3034 = vmatpush.bf16.msra.mxu0 %v2415_v13  ;;  %v2463_v24 = vpack.c.bf16 %v1767_v14, %v1761_v10  ;;  %v1953_v28 = vcvt.s32.f32 %v993_v15  ;;  %v1959_v25 = vcvt.s32.f32 %v999_v16  ;;  %v699_v29 = vunpack.c.1.s8 %v147_v56  ;;  %v5733_v56 = vpop.f32.mrf.mxu0 }
 0x111   :  { %v2511_v30 = vpack.c.bf16 %v1863_v18, %v1857_v17  ;;  %v2793_v31 = vadd.f32 %v5674_v51, %v2780_v21  ;;  %v1653_v33 = vcvt.s32.f32 %v693_v23  ;;  %v789_v35 = vunpack.c.0.s8 %v171_v43  ;;  %v165_v51 = vld [vmem:[%s7099_s1 + $0x3d0] sm:$0xff] }
 0x112   :  { %3047 = vmatpush.bf16.msra.mxu1 %v2463_v24  ;;  %v2559_v36 = vpack.c.bf16 %v1959_v25, %v1953_v28  ;;  %v1659_v37 = vcvt.s32.f32 %v699_v29  ;;  %v795_v39 = vunpack.c.1.s8 %v171_v43  ;;  %v885_v40 = vunpack.c.0.s8 %v195_v63 }
 0x113   :  { %3060 = vmatpush.bf16.msra.mxu2 %v2511_v30  ;;  %v1749_v27 = vcvt.s32.f32 %v789_v35  ;;  %v891_v42 = vunpack.c.1.s8 %v195_v63  ;;  %v981_v57 = vunpack.c.0.s8 %v219_v5  ;;  %v987_v44 = vunpack.c.1.s8 %v219_v5 }
 0x114   :  { %3073 = vmatpush.bf16.msra.mxu3 %v2559_v36  ;;  %v2409_v45 = vpack.c.bf16 %v1659_v37, %v1653_v33  ;;  %v1755_v48 = vcvt.s32.f32 %v795_v39  ;;  %v1845_v43 = vcvt.s32.f32 %v885_v40  ;;  %v2806_v46 = vadd.f32 %v5684_v19, %v2793_v31  ;;  %v255_v31 = vld [vmem:[%s7099_s1 + $0x6a0] sm:$0xff] }
 0x115   :  { %v1851_v49 = vcvt.s32.f32 %v891_v42  ;;  %v1941_v50 = vcvt.s32.f32 %v981_v57  ;;  %v1947_v52 = vcvt.s32.f32 %v987_v44  ;;  %v681_v47 = vunpack.c.2.s8 %v141_v54  ;;  %v279_v39 = vld [vmem:[%s7099_s1 + $0x760] sm:$0xff]  ;;  %v64_v57 = vld [vmem:[%s7099_s1 + $0xa8] sm:$0xff] }
 0x116   :  { %3035 = vmatpush.bf16.msra.mxu0 %v2409_v45  ;;  %v2457_v55 = vpack.c.bf16 %v1755_v48, %v1749_v27  ;;  %v5740_v59 = vadd.f32 %v5686_v20, %v2806_v46  ;;  %v687_v63 = vunpack.c.3.s8 %v141_v54  ;;  %v777_v0 = vunpack.c.2.s8 %v165_v51 }
 0x117   :  { %v2505_v19 = vpack.c.bf16 %v1851_v49, %v1845_v43  ;;  %v2553_v1 = vpack.c.bf16 %v1947_v52, %v1941_v50  ;;  %v1641_v2 = vcvt.s32.f32 %v681_v47  ;;  %v783_v5 = vunpack.c.3.s8 %v165_v51  ;;  %v88_v52 = vld [vmem:[%s7099_s1 + $0x168] sm:$0xff]  ;;  %v2846_v47 = vpop.f32.mrf.mxu1 }
 0x118   :  { %3048 = vmatpush.bf16.msra.mxu1 %v2457_v55  ;;  %v1647_v6 = vcvt.s32.f32 %v687_v63  ;;  %v1737_v4 = vcvt.s32.f32 %v777_v0  ;;  %v873_v7 = vunpack.c.2.s8 %v189_v53  ;;  %v879_v8 = vunpack.c.3.s8 %v189_v53  ;;  %v2833_v24 = vpop.f32.mrf.mxu0 }
 0x119   :  { %3061 = vmatpush.bf16.msra.mxu2 %v2505_v19  ;;  %3074 = vmatpush.bf16.msra.mxu3 %v2553_v1  ;;  %v1743_v20 = vcvt.s32.f32 %v783_v5  ;;  %v969_v10 = vunpack.c.2.s8 %v213_v61  ;;  %v975_v11 = vunpack.c.3.s8 %v213_v61  ;;  %v669_v12 = vunpack.c.0.s8 %v141_v54 }
 0x11a   :  { %v2403_v13 = vpack.c.bf16 %v1647_v6, %v1641_v2  ;;  %v1833_v14 = vcvt.s32.f32 %v873_v7  ;;  %v1839_v15 = vcvt.s32.f32 %v879_v8  ;;  %v675_v16 = vunpack.c.1.s8 %v141_v54 }
 0x11b   :  { %v2451_v17 = vpack.c.bf16 %v1743_v20, %v1737_v4  ;;  %v1929_v18 = vcvt.s32.f32 %v969_v10  ;;  %v1935_v21 = vcvt.s32.f32 %v975_v11  ;;  %v1629_v23 = vcvt.s32.f32 %v669_v12 }
 0x11c   :  { %3036 = vmatpush.bf16.msra.mxu0 %v2403_v13  ;;  %v2499_v28 = vpack.c.bf16 %v1839_v15, %v1833_v14  ;;  %v1635_v25 = vcvt.s32.f32 %v675_v16  ;;  %v765_v29 = vunpack.c.0.s8 %v165_v51  ;;  %v771_v30 = vunpack.c.1.s8 %v165_v51 }
 0x11d   :  { %3049 = vmatpush.bf16.msra.mxu1 %v2451_v17  ;;  %v2547_v33 = vpack.c.bf16 %v1935_v21, %v1929_v18  ;;  %v861_v35 = vunpack.c.0.s8 %v189_v53  ;;  %v867_v36 = vunpack.c.1.s8 %v189_v53  ;;  %v957_v37 = vunpack.c.0.s8 %v213_v61 }
 0x11e   :  { %3062 = vmatpush.bf16.msra.mxu2 %v2499_v28  ;;  %v2397_v40 = vpack.c.bf16 %v1635_v25, %v1629_v23  ;;  %v1725_v54 = vcvt.s32.f32 %v765_v29  ;;  %v1731_v27 = vcvt.s32.f32 %v771_v30  ;;  %v963_v42 = vunpack.c.1.s8 %v213_v61  ;;  %v249_v23 = vld [vmem:[%s7099_s1 + $0x670] sm:$0xff] }
 0x11f   :  { %3075 = vmatpush.bf16.msra.mxu3 %v2547_v33  ;;  %v1821_v44 = vcvt.s32.f32 %v861_v35  ;;  %v1827_v51 = vcvt.s32.f32 %v867_v36  ;;  %v1917_v45 = vcvt.s32.f32 %v957_v37  ;;  %v1137_v48 = vunpack.c.2.s8 %v255_v31  ;;  %v273_v30 = vld [vmem:[%s7099_s1 + $0x730] sm:$0xff] }
 0x120   :  { %3037 = vmatpush.bf16.msra.mxu0 %v2397_v40  ;;  %v2445_v43 = vpack.c.bf16 %v1731_v27, %v1725_v54  ;;  %v1923_v46 = vcvt.s32.f32 %v963_v42  ;;  %v1143_v49 = vunpack.c.3.s8 %v255_v31  ;;  %v1233_v50 = vunpack.c.2.s8 %v279_v39  ;;  %v58_v27 = vld [vmem:[%s7099_s1 + $0x78] sm:$0xff] }
 0x121   :  { %v2493_v53 = vpack.c.bf16 %v1827_v51, %v1821_v44  ;;  %v2097_v55 = vcvt.s32.f32 %v1137_v48  ;;  %v1239_v63 = vunpack.c.3.s8 %v279_v39  ;;  %v370_v0 = vunpack.c.2.s8 %v64_v57 }
 0x122   :  { %3050 = vmatpush.bf16.msra.mxu1 %v2445_v43  ;;  %v2541_v61 = vpack.c.bf16 %v1923_v46, %v1917_v45  ;;  %v2103_v19 = vcvt.s32.f32 %v1143_v49  ;;  %v2193_v1 = vcvt.s32.f32 %v1233_v50  ;;  %v376_v2 = vunpack.c.3.s8 %v64_v57  ;;  %v82_v45 = vld [vmem:[%s7099_s1 + $0x138] sm:$0xff] }
 0x123   :  { %3063 = vmatpush.bf16.msra.mxu2 %v2493_v53  ;;  %v2199_v5 = vcvt.s32.f32 %v1239_v63  ;;  %v1330_v6 = vcvt.s32.f32 %v370_v0  ;;  %v466_v4 = vunpack.c.2.s8 %v88_v52  ;;  %v472_v7 = vunpack.c.3.s8 %v88_v52  ;;  %3038 = vmatmul.bf16.vlgmr.msra.gmra.mxu0 %v5453_v38 }
 0x124   :  { %3076 = vmatpush.bf16.msra.mxu3 %v2541_v61  ;;  %v2631_v8 = vpack.c.bf16 %v2103_v19, %v2097_v55  ;;  %v1336_v20 = vcvt.s32.f32 %v376_v2  ;;  %v1125_v10 = vunpack.c.0.s8 %v255_v31  ;;  %v1131_v11 = vunpack.c.1.s8 %v255_v31 }
 0x125   :  { %v2679_v12 = vpack.c.bf16 %v2199_v5, %v2193_v1  ;;  %v1426_v13 = vcvt.s32.f32 %v466_v4  ;;  %v1432_v14 = vcvt.s32.f32 %v472_v7  ;;  %v1221_v15 = vunpack.c.0.s8 %v279_v39  ;;  %3051 = vmatmul.bf16.vlgmr.msra.gmra.mxu1 %v5460_v60 }
 0x126   :  { %3082 = vmatpush.bf16.msrb.mxu0 %v2631_v8  ;;  %v2248_v16 = vpack.c.bf16 %v1336_v20, %v1330_v6  ;;  %v2085_v17 = vcvt.s32.f32 %v1125_v10  ;;  %v2091_v18 = vcvt.s32.f32 %v1131_v11  ;;  %v1227_v21 = vunpack.c.1.s8 %v279_v39  ;;  %3064 = vmatmul.bf16.vlgmr.msra.gmra.mxu2 %v5448_v32 }
 0x127   :  { %3095 = vmatpush.bf16.msrb.mxu1 %v2679_v12  ;;  %v2296_v24 = vpack.c.bf16 %v1432_v14, %v1426_v13  ;;  %v2181_v28 = vcvt.s32.f32 %v1221_v15  ;;  %v358_v25 = vunpack.c.0.s8 %v64_v57  ;;  %v364_v29 = vunpack.c.1.s8 %v64_v57  ;;  %3077 = vmatmul.bf16.vlgmr.msra.gmra.mxu3 %v5455_v41 }
 0x128   :  { %3108 = vmatpush.bf16.msrb.mxu2 %v2248_v16  ;;  %v2625_v31 = vpack.c.bf16 %v2091_v18, %v2085_v17  ;;  %v2187_v33 = vcvt.s32.f32 %v1227_v21  ;;  %v454_v35 = vunpack.c.0.s8 %v88_v52  ;;  %v460_v36 = vunpack.c.1.s8 %v88_v52 }
 0x129   :  { %3121 = vmatpush.bf16.msrb.mxu3 %v2296_v24  ;;  %v1318_v37 = vcvt.s32.f32 %v358_v25  ;;  %v1324_v39 = vcvt.s32.f32 %v364_v29  ;;  %v1113_v40 = vunpack.c.2.s8 %v249_v23  ;;  %v1119_v54 = vunpack.c.3.s8 %v249_v23  ;;  %v267_v29 = vld [vmem:[%s7099_s1 + $0x700] sm:$0xff] }
 0x12a   :  { %3083 = vmatpush.bf16.msrb.mxu0 %v2625_v31  ;;  %v2673_v42 = vpack.c.bf16 %v2187_v33, %v2181_v28  ;;  %v1414_v57 = vcvt.s32.f32 %v454_v35  ;;  %v1420_v44 = vcvt.s32.f32 %v460_v36  ;;  %v1209_v51 = vunpack.c.2.s8 %v273_v30  ;;  %v52_v35 = vld [vmem:[%s7099_s1 + $0x48] sm:$0xff] }
 0x12b   :  { %v2242_v48 = vpack.c.bf16 %v1324_v39, %v1318_v37  ;;  %v2073_v43 = vcvt.s32.f32 %v1113_v40  ;;  %v2079_v46 = vcvt.s32.f32 %v1119_v54  ;;  %v1215_v49 = vunpack.c.3.s8 %v273_v30 }
 0x12c   :  { %3096 = vmatpush.bf16.msrb.mxu1 %v2673_v42  ;;  %v2290_v50 = vpack.c.bf16 %v1420_v44, %v1414_v57  ;;  %v2169_v52 = vcvt.s32.f32 %v1209_v51  ;;  %v346_v47 = vunpack.c.2.s8 %v58_v27  ;;  %v352_v53 = vunpack.c.3.s8 %v58_v27 }
 0x12d   :  { %3109 = vmatpush.bf16.msrb.mxu2 %v2242_v48  ;;  %v2619_v55 = vpack.c.bf16 %v2079_v46, %v2073_v43  ;;  %v2175_v63 = vcvt.s32.f32 %v1215_v49  ;;  %v442_v0 = vunpack.c.2.s8 %v82_v45  ;;  %v448_v61 = vunpack.c.3.s8 %v82_v45 }
 0x12e   :  { %3122 = vmatpush.bf16.msrb.mxu3 %v2290_v50  ;;  %v1306_v19 = vcvt.s32.f32 %v346_v47  ;;  %v1312_v1 = vcvt.s32.f32 %v352_v53  ;;  %v2832_v2 = vadd.f32 %v5733_v56, %v5740_v59  ;;  %v1101_v5 = vunpack.c.0.s8 %v249_v23  ;;  %v243_v59 = vld [vmem:[%s7099_s1 + $0x640] sm:$0xff]  ;;  %v5792_v47 = vpop.f32.mrf.mxu2  ;;  %v5794_v53 = vpop.f32.mrf.mxu3 }
 0x12f   :  { %3084 = vmatpush.bf16.msrb.mxu0 %v2619_v55  ;;  %v2667_v6 = vpack.c.bf16 %v2175_v63, %v2169_v52  ;;  %v1402_v4 = vcvt.s32.f32 %v442_v0  ;;  %v1408_v7 = vcvt.s32.f32 %v448_v61  ;;  %v1107_v8 = vunpack.c.1.s8 %v249_v23 }
 0x130   :  { %v2236_v20 = vpack.c.bf16 %v1312_v1, %v1306_v19  ;;  %v2061_v10 = vcvt.s32.f32 %v1101_v5  ;;  %v1197_v11 = vunpack.c.0.s8 %v273_v30  ;;  %v1203_v12 = vunpack.c.1.s8 %v273_v30 }
 0x131   :  { %3097 = vmatpush.bf16.msrb.mxu1 %v2667_v6  ;;  %v2284_v13 = vpack.c.bf16 %v1408_v7, %v1402_v4  ;;  %v2067_v14 = vcvt.s32.f32 %v1107_v8  ;;  %v334_v15 = vunpack.c.0.s8 %v58_v27  ;;  %v340_v16 = vunpack.c.1.s8 %v58_v27  ;;  %v237_v4 = vld [vmem:[%s7099_s1 + $0x610] sm:$0xff] }
 0x132   :  { %3110 = vmatpush.bf16.msrb.mxu2 %v2236_v20  ;;  %v2157_v17 = vcvt.s32.f32 %v1197_v11  ;;  %v2163_v18 = vcvt.s32.f32 %v1203_v12  ;;  %v430_v21 = vunpack.c.0.s8 %v82_v45  ;;  %v436_v56 = vunpack.c.1.s8 %v82_v45 }
 0x133   :  { %3123 = vmatpush.bf16.msrb.mxu3 %v2284_v13  ;;  %v2613_v23 = vpack.c.bf16 %v2067_v14, %v2061_v10  ;;  %v1294_v24 = vcvt.s32.f32 %v334_v15  ;;  %v1300_v28 = vcvt.s32.f32 %v340_v16  ;;  %v5781_v25 = vadd.f32 %v5745_v9, %v2832_v2  ;;  %v76_v9 = vld [vmem:[%s7099_s1 + $0x108] sm:$0xff]  ;;  %v261_v10 = vld [vmem:[%s7099_s1 + $0x6d0] sm:$0xff] }
 0x134   :  { %v2661_v30 = vpack.c.bf16 %v2163_v18, %v2157_v17  ;;  %v1390_v31 = vcvt.s32.f32 %v430_v21  ;;  %v1396_v33 = vcvt.s32.f32 %v436_v56  ;;  %v1089_v37 = vunpack.c.2.s8 %v243_v59  ;;  %v46_v21 = vld [vmem:[%s7099_s1 + $0x18] sm:$0xff] }
 0x135   :  { %3085 = vmatpush.bf16.msrb.mxu0 %v2613_v23  ;;  %v2230_v36 = vpack.c.bf16 %v1300_v28, %v1294_v24  ;;  %v1095_v39 = vunpack.c.3.s8 %v243_v59  ;;  %v1185_v54 = vunpack.c.2.s8 %v267_v29  ;;  %v1191_v27 = vunpack.c.3.s8 %v267_v29  ;;  %v70_v28 = vld [vmem:[%s7099_s1 + $0xd8] sm:$0xff] }
 0x136   :  { %3098 = vmatpush.bf16.msrb.mxu1 %v2661_v30  ;;  %v2278_v40 = vpack.c.bf16 %v1396_v33, %v1390_v31  ;;  %v2049_v42 = vcvt.s32.f32 %v1089_v37  ;;  %v322_v44 = vunpack.c.2.s8 %v52_v35  ;;  %v328_v51 = vunpack.c.3.s8 %v52_v35 }
 0x137   :  { %3111 = vmatpush.bf16.msrb.mxu2 %v2230_v36  ;;  %v2055_v57 = vcvt.s32.f32 %v1095_v39  ;;  %v2145_v45 = vcvt.s32.f32 %v1185_v54  ;;  %v2151_v48 = vcvt.s32.f32 %v1191_v27  ;;  %v418_v43 = vunpack.c.2.s8 %v76_v9  ;;  %v2872_v36 = vpop.f32.mrf.mxu3 }
 0x138   :  { %3124 = vmatpush.bf16.msrb.mxu3 %v2278_v40  ;;  %v1282_v49 = vcvt.s32.f32 %v322_v44  ;;  %v1288_v50 = vcvt.s32.f32 %v328_v51  ;;  %v424_v52 = vunpack.c.3.s8 %v76_v9  ;;  %v1077_v19 = vunpack.c.0.s8 %v243_v59 }
 0x139   :  { %v2607_v46 = vpack.c.bf16 %v2055_v57, %v2049_v42  ;;  %v2655_v55 = vpack.c.bf16 %v2151_v48, %v2145_v45  ;;  %v1378_v63 = vcvt.s32.f32 %v418_v43  ;;  %v1083_v1 = vunpack.c.1.s8 %v243_v59 }
 0x13a   :  { %v2224_v0 = vpack.c.bf16 %v1288_v50, %v1282_v49  ;;  %v1384_v61 = vcvt.s32.f32 %v424_v52  ;;  %v1173_v2 = vunpack.c.0.s8 %v267_v29  ;;  %v1179_v5 = vunpack.c.1.s8 %v267_v29 }
 0x13b   :  { %3086 = vmatpush.bf16.msrb.mxu0 %v2607_v46  ;;  %3099 = vmatpush.bf16.msrb.mxu1 %v2655_v55  ;;  %v310_v6 = vunpack.c.0.s8 %v52_v35  ;;  %v2037_v8 = vcvt.s32.f32 %v1077_v19  ;;  %v2043_v20 = vcvt.s32.f32 %v1083_v1  ;;  %v316_v13 = vunpack.c.1.s8 %v52_v35  ;;  %v2859_v35 = vpop.f32.mrf.mxu2 }
 0x13c   :  { %3112 = vmatpush.bf16.msrb.mxu2 %v2224_v0  ;;  %v2272_v7 = vpack.c.bf16 %v1384_v61, %v1378_v63  ;;  %v2133_v11 = vcvt.s32.f32 %v1173_v2  ;;  %v2139_v12 = vcvt.s32.f32 %v1179_v5  ;;  %v406_v16 = vunpack.c.0.s8 %v76_v9  ;;  %v112_v5 = vld [vmem:[%s7099_s1 + $0x228] sm:$0xff] }
 0x13d   :  { %v1270_v14 = vcvt.s32.f32 %v310_v6  ;;  %v2601_v15 = vpack.c.bf16 %v2043_v20, %v2037_v8  ;;  %v412_v17 = vunpack.c.1.s8 %v76_v9  ;;  %v1065_v18 = vunpack.c.2.s8 %v237_v4 }
 0x13e   :  { %3125 = vmatpush.bf16.msrb.mxu3 %v2272_v7  ;;  %v2649_v56 = vpack.c.bf16 %v2139_v12, %v2133_v11  ;;  %v1276_v59 = vcvt.s32.f32 %v316_v13  ;;  %v1071_v23 = vunpack.c.3.s8 %v237_v4  ;;  %v1161_v24 = vunpack.c.2.s8 %v261_v10  ;;  %v5814_v11 = vpop.f32.mrf.mxu0 }
 0x13f   :  { %3087 = vmatpush.bf16.msrb.mxu0 %v2601_v15  ;;  %v1366_v29 = vcvt.s32.f32 %v406_v16  ;;  %v1372_v30 = vcvt.s32.f32 %v412_v17  ;;  %v2025_v31 = vcvt.s32.f32 %v1065_v18  ;;  %v1167_v33 = vunpack.c.3.s8 %v261_v10  ;;  %v160_v16 = vld [vmem:[%s7099_s1 + $0x3a8] sm:$0xff] }
 0x140   :  { %3100 = vmatpush.bf16.msrb.mxu1 %v2649_v56  ;;  %v2218_v37 = vpack.c.bf16 %v1276_v59, %v1270_v14  ;;  %v2031_v39 = vcvt.s32.f32 %v1071_v23  ;;  %v2121_v9 = vcvt.s32.f32 %v1161_v24  ;;  %v298_v40 = vunpack.c.2.s8 %v46_v21  ;;  %v5824_v59 = vld [vmem:[%s7099_s1 + $0x468] sm:$0xff] }
 0x141   :  { %v2266_v54 = vpack.c.bf16 %v1372_v30, %v1366_v29  ;;  %v2127_v27 = vcvt.s32.f32 %v1167_v33  ;;  %v304_v42 = vunpack.c.3.s8 %v46_v21  ;;  %v394_v57 = vunpack.c.2.s8 %v70_v28 }
 0x142   :  { %3113 = vmatpush.bf16.msrb.mxu2 %v2218_v37  ;;  %v2595_v44 = vpack.c.bf16 %v2031_v39, %v2025_v31  ;;  %v1258_v51 = vcvt.s32.f32 %v298_v40  ;;  %v400_v45 = vunpack.c.3.s8 %v70_v28  ;;  %v1053_v48 = vunpack.c.0.s8 %v237_v4 }
 0x143   :  { %3126 = vmatpush.bf16.msrb.mxu3 %v2266_v54  ;;  %v2643_v43 = vpack.c.bf16 %v2127_v27, %v2121_v9  ;;  %v1264_v46 = vcvt.s32.f32 %v304_v42  ;;  %v1354_v49 = vcvt.s32.f32 %v394_v57  ;;  %v1059_v50 = vunpack.c.1.s8 %v237_v4  ;;  %v136_v4 = vld [vmem:[%s7099_s1 + $0x2e8] sm:$0xff]  ;;  %v5827_v40 = vpop.f32.mrf.mxu2  ;;  %v5829_v54 = vpop.f32.mrf.mxu3 }
 0x144   :  { %3088 = vmatpush.bf16.msrb.mxu0 %v2595_v44  ;;  %v1360_v52 = vcvt.s32.f32 %v400_v45  ;;  %v2013_v55 = vcvt.s32.f32 %v1053_v48  ;;  %v1149_v63 = vunpack.c.0.s8 %v261_v10  ;;  %v1155_v0 = vunpack.c.1.s8 %v261_v10  ;;  %v5816_v10 = vpop.f32.mrf.mxu1 }
 0x145   :  { %3101 = vmatpush.bf16.msrb.mxu1 %v2643_v43  ;;  %v2212_v61 = vpack.c.bf16 %v1264_v46, %v1258_v51  ;;  %v2019_v19 = vcvt.s32.f32 %v1059_v50  ;;  %v286_v1 = vunpack.c.0.s8 %v46_v21  ;;  %v292_v2 = vunpack.c.1.s8 %v46_v21 }
 0x146   :  { %v2260_v6 = vpack.c.bf16 %v1360_v52, %v1354_v49  ;;  %v2109_v7 = vcvt.s32.f32 %v1149_v63  ;;  %v2115_v8 = vcvt.s32.f32 %v1155_v0  ;;  %v382_v20 = vunpack.c.0.s8 %v70_v28 }
 0x147   :  { %3114 = vmatpush.bf16.msrb.mxu2 %v2212_v61  ;;  %v2589_v12 = vpack.c.bf16 %v2019_v19, %v2013_v55  ;;  %v1246_v13 = vcvt.s32.f32 %v286_v1  ;;  %v1252_v14 = vcvt.s32.f32 %v292_v2  ;;  %v388_v15 = vunpack.c.1.s8 %v70_v28  ;;  %v2885_v55 = vpop.f32.mrf.mxu0  ;;  %v106_v2 = vld [vmem:[%s7099_s1 + $0x1f8] sm:$0xff] }
 0x148   :  { %3127 = vmatpush.bf16.msrb.mxu3 %v2260_v6  ;;  %v2637_v17 = vpack.c.bf16 %v2115_v8, %v2109_v7  ;;  %v1342_v18 = vcvt.s32.f32 %v382_v20  ;;  %v562_v21 = vunpack.c.2.s8 %v112_v5  ;;  %v568_v56 = vunpack.c.3.s8 %v112_v5  ;;  %v130_v20 = vld [vmem:[%s7099_s1 + $0x2b8] sm:$0xff] }
 0x149   :  { %3089 = vmatpush.bf16.msrb.mxu0 %v2589_v12  ;;  %v2206_v23 = vpack.c.bf16 %v1252_v14, %v1246_v13  ;;  %v1348_v24 = vcvt.s32.f32 %v388_v15  ;;  %v658_v29 = vunpack.c.2.s8 %v136_v4  ;;  %v664_v30 = vunpack.c.3.s8 %v136_v4  ;;  %v154_v15 = vld [vmem:[%s7099_s1 + $0x378] sm:$0xff] }
 0x14a   :  { %3102 = vmatpush.bf16.msrb.mxu1 %v2637_v17  ;;  %v1522_v28 = vcvt.s32.f32 %v562_v21  ;;  %v1528_v31 = vcvt.s32.f32 %v568_v56  ;;  %v754_v33 = vunpack.c.2.s8 %v160_v16  ;;  %v760_v35 = vunpack.c.3.s8 %v160_v16  ;;  %v178_v56 = vld [vmem:[%s7099_s1 + $0x438] sm:$0xff] }
 0x14b   :  { %3115 = vmatpush.bf16.msrb.mxu2 %v2206_v23  ;;  %v2254_v36 = vpack.c.bf16 %v1348_v24, %v1342_v18  ;;  %v1618_v37 = vcvt.s32.f32 %v658_v29  ;;  %v1624_v39 = vcvt.s32.f32 %v664_v30  ;;  %v850_v9 = vunpack.c.2.s8 %v5824_v59  ;;  %v2911_v30 = vpop.f32.mrf.mxu2 }
 0x14c   :  { %v2344_v27 = vpack.c.bf16 %v1528_v31, %v1522_v28  ;;  %v1714_v42 = vcvt.s32.f32 %v754_v33  ;;  %v1720_v57 = vcvt.s32.f32 %v760_v35  ;;  %v856_v44 = vunpack.c.3.s8 %v5824_v59  ;;  %3090 = vmatmul.bf16.vlgmr.msrb.gmra.mxu0 %v5506_v22  ;;  %v2898_v63 = vpop.f32.mrf.mxu1  ;;  %v2924_v28 = vpop.f32.mrf.mxu3 }
 0x14d   :  { %3128 = vmatpush.bf16.msrb.mxu3 %v2254_v36  ;;  %v2392_v51 = vpack.c.bf16 %v1624_v39, %v1618_v37  ;;  %v1810_v45 = vcvt.s32.f32 %v850_v9  ;;  %3103 = vmatmul.bf16.vlgmr.msrb.gmra.mxu1 %v5511_v26  ;;  %v550_v48 = vunpack.c.0.s8 %v112_v5  ;;  %v556_v43 = vunpack.c.1.s8 %v112_v5 }
 0x14e   :  { %3134 = vmatpush.bf16.msra.mxu0 %v2344_v27  ;;  %v2440_v46 = vpack.c.bf16 %v1720_v57, %v1714_v42  ;;  %v1816_v49 = vcvt.s32.f32 %v856_v44  ;;  %v646_v50 = vunpack.c.0.s8 %v136_v4  ;;  %v652_v52 = vunpack.c.1.s8 %v136_v4  ;;  %3116 = vmatmul.bf16.vlgmr.msrb.gmra.mxu2 %v5406_v58 }
 0x14f   :  { %3147 = vmatpush.bf16.msra.mxu1 %v2392_v51  ;;  %v1510_v0 = vcvt.s32.f32 %v550_v48  ;;  %v1516_v61 = vcvt.s32.f32 %v556_v43  ;;  %v742_v19 = vunpack.c.0.s8 %v160_v16  ;;  %v748_v1 = vunpack.c.1.s8 %v160_v16 }
 0x150   :  { %3160 = vmatpush.bf16.msra.mxu2 %v2440_v46  ;;  %v2488_v5 = vpack.c.bf16 %v1816_v49, %v1810_v45  ;;  %v1606_v6 = vcvt.s32.f32 %v646_v50  ;;  %v1612_v7 = vcvt.s32.f32 %v652_v52  ;;  %v838_v8 = vunpack.c.0.s8 %v5824_v59  ;;  %3129 = vmatmul.bf16.vlgmr.msrb.gmra.mxu3 %v5417_v3 }
 0x151   :  { %v2338_v4 = vpack.c.bf16 %v1516_v61, %v1510_v0  ;;  %v1702_v12 = vcvt.s32.f32 %v742_v19  ;;  %v1708_v13 = vcvt.s32.f32 %v748_v1  ;;  %v844_v14 = vunpack.c.1.s8 %v5824_v59  ;;  %v100_v61 = vld [vmem:[%s7099_s1 + $0x1c8] sm:$0xff] }
 0x152   :  { %3173 = vmatpush.bf16.msra.mxu3 %v2488_v5  ;;  %v2386_v16 = vpack.c.bf16 %v1612_v7, %v1606_v6  ;;  %v1798_v17 = vcvt.s32.f32 %v838_v8  ;;  %v5849_v18 = vadd.f32 %v5794_v53, %v5792_v47  ;;  %v538_v21 = vunpack.c.2.s8 %v106_v2 }
 0x153   :  { %3135 = vmatpush.bf16.msra.mxu0 %v2338_v4  ;;  %v2434_v23 = vpack.c.bf16 %v1708_v13, %v1702_v12  ;;  %v1804_v24 = vcvt.s32.f32 %v844_v14  ;;  %v544_v59 = vunpack.c.3.s8 %v106_v2  ;;  %v634_v29 = vunpack.c.2.s8 %v130_v20 }
 0x154   :  { %3148 = vmatpush.bf16.msra.mxu1 %v2386_v16  ;;  %v1498_v31 = vcvt.s32.f32 %v538_v21  ;;  %v640_v33 = vunpack.c.3.s8 %v130_v20  ;;  %v730_v35 = vunpack.c.2.s8 %v154_v15  ;;  %v736_v36 = vunpack.c.3.s8 %v154_v15 }
 0x155   :  { %3161 = vmatpush.bf16.msra.mxu2 %v2434_v23  ;;  %v2482_v47 = vpack.c.bf16 %v1804_v24, %v1798_v17  ;;  %v1504_v53 = vcvt.s32.f32 %v544_v59  ;;  %v1594_v37 = vcvt.s32.f32 %v634_v29  ;;  %v826_v39 = vunpack.c.2.s8 %v178_v56  ;;  %v172_v59 = vld [vmem:[%s7099_s1 + $0x408] sm:$0xff] }
 0x156   :  { %v1600_v9 = vcvt.s32.f32 %v640_v33  ;;  %v1690_v27 = vcvt.s32.f32 %v730_v35  ;;  %v1696_v42 = vcvt.s32.f32 %v736_v36  ;;  %v832_v57 = vunpack.c.3.s8 %v178_v56 }
 0x157   :  { %3174 = vmatpush.bf16.msra.mxu3 %v2482_v47  ;;  %v2332_v44 = vpack.c.bf16 %v1504_v53, %v1498_v31  ;;  %v1786_v51 = vcvt.s32.f32 %v826_v39  ;;  %v526_v45 = vunpack.c.0.s8 %v106_v2  ;;  %v532_v48 = vunpack.c.1.s8 %v106_v2  ;;  %v124_v2 = vld [vmem:[%s7099_s1 + $0x288] sm:$0xff] }
 0x158   :  { %v2380_v43 = vpack.c.bf16 %v1600_v9, %v1594_v37  ;;  %v2428_v46 = vpack.c.bf16 %v1696_v42, %v1690_v27  ;;  %v1792_v49 = vcvt.s32.f32 %v832_v57  ;;  %v622_v50 = vunpack.c.0.s8 %v130_v20 }
 0x159   :  { %3136 = vmatpush.bf16.msra.mxu0 %v2332_v44  ;;  %v1486_v52 = vcvt.s32.f32 %v526_v45  ;;  %v1492_v55 = vcvt.s32.f32 %v532_v48  ;;  %v628_v63 = vunpack.c.1.s8 %v130_v20  ;;  %v718_v0 = vunpack.c.0.s8 %v154_v15  ;;  %v148_v20 = vld [vmem:[%s7099_s1 + $0x348] sm:$0xff] }
 0x15a   :  { %3149 = vmatpush.bf16.msra.mxu1 %v2380_v43  ;;  %3162 = vmatpush.bf16.msra.mxu2 %v2428_v46  ;;  %v2476_v19 = vpack.c.bf16 %v1792_v49, %v1786_v51  ;;  %v1582_v1 = vcvt.s32.f32 %v622_v50  ;;  %v724_v5 = vunpack.c.1.s8 %v154_v15  ;;  %v814_v6 = vunpack.c.0.s8 %v178_v56 }
 0x15b   :  { %v2326_v7 = vpack.c.bf16 %v1492_v55, %v1486_v52  ;;  %v1588_v8 = vcvt.s32.f32 %v628_v63  ;;  %v1678_v4 = vcvt.s32.f32 %v718_v0  ;;  %v820_v12 = vunpack.c.1.s8 %v178_v56  ;;  %v94_v52 = vld [vmem:[%s7099_s1 + $0x198] sm:$0xff] }
 0x15c   :  { %3175 = vmatpush.bf16.msra.mxu3 %v2476_v19  ;;  %v1684_v13 = vcvt.s32.f32 %v724_v5  ;;  %v1774_v14 = vcvt.s32.f32 %v814_v6  ;;  %v514_v16 = vunpack.c.2.s8 %v100_v61  ;;  %v520_v17 = vunpack.c.3.s8 %v100_v61  ;;  %v118_v5 = vld [vmem:[%s7099_s1 + $0x258] sm:$0xff] }
 0x15d   :  { %3137 = vmatpush.bf16.msra.mxu0 %v2326_v7  ;;  %v2374_v15 = vpack.c.bf16 %v1588_v8, %v1582_v1  ;;  %v1780_v21 = vcvt.s32.f32 %v820_v12  ;;  %v610_v23 = vunpack.c.2.s8 %v124_v2  ;;  %v616_v24 = vunpack.c.3.s8 %v124_v2 }
 0x15e   :  { %v2422_v29 = vpack.c.bf16 %v1684_v13, %v1678_v4  ;;  %v1474_v56 = vcvt.s32.f32 %v514_v16  ;;  %v1480_v30 = vcvt.s32.f32 %v520_v17  ;;  %v706_v28 = vunpack.c.2.s8 %v148_v20  ;;  %v142_v4 = vld [vmem:[%s7099_s1 + $0x318] sm:$0xff] }
 0x15f   :  { %3150 = vmatpush.bf16.msra.mxu1 %v2374_v15  ;;  %v2470_v31 = vpack.c.bf16 %v1780_v21, %v1774_v14  ;;  %v1570_v33 = vcvt.s32.f32 %v610_v23  ;;  %v1576_v35 = vcvt.s32.f32 %v616_v24  ;;  %v712_v36 = vunpack.c.3.s8 %v148_v20  ;;  %v166_v16 = vld [vmem:[%s7099_s1 + $0x3d8] sm:$0xff] }
 0x160   :  { %3163 = vmatpush.bf16.msra.mxu2 %v2422_v29  ;;  %v2320_v47 = vpack.c.bf16 %v1480_v30, %v1474_v56  ;;  %v1666_v53 = vcvt.s32.f32 %v706_v28  ;;  %v802_v37 = vunpack.c.2.s8 %v172_v59  ;;  %v808_v39 = vunpack.c.3.s8 %v172_v59 }
 0x161   :  { %3176 = vmatpush.bf16.msra.mxu3 %v2470_v31  ;;  %v2368_v9 = vpack.c.bf16 %v1576_v35, %v1570_v33  ;;  %v1672_v27 = vcvt.s32.f32 %v712_v36  ;;  %v2884_v42 = vadd.f32 %v5814_v11, %v5849_v18  ;;  %v502_v57 = vunpack.c.0.s8 %v100_v61  ;;  %v5887_v33 = vpop.f32.mrf.mxu1 }
 0x162   :  { %3138 = vmatpush.bf16.msra.mxu0 %v2320_v47  ;;  %v1762_v44 = vcvt.s32.f32 %v802_v37  ;;  %v1768_v51 = vcvt.s32.f32 %v808_v39  ;;  %v508_v45 = vunpack.c.1.s8 %v100_v61  ;;  %v598_v48 = vunpack.c.0.s8 %v124_v2 }
 0x163   :  { %3151 = vmatpush.bf16.msra.mxu1 %v2368_v9  ;;  %v2416_v43 = vpack.c.bf16 %v1672_v27, %v1666_v53  ;;  %v2897_v46 = vadd.f32 %v5816_v10, %v2884_v42  ;;  %v1462_v49 = vcvt.s32.f32 %v502_v57  ;;  %v604_v50 = vunpack.c.1.s8 %v124_v2  ;;  %v5875_v10 = vpop.f32.mrf.mxu0 }
 0x164   :  { %v2464_v55 = vpack.c.bf16 %v1768_v51, %v1762_v44  ;;  %v1468_v63 = vcvt.s32.f32 %v508_v45  ;;  %v1558_v0 = vcvt.s32.f32 %v598_v48  ;;  %v694_v11 = vunpack.c.0.s8 %v148_v20 }
 0x165   :  { %3164 = vmatpush.bf16.msra.mxu2 %v2416_v43  ;;  %v1564_v18 = vcvt.s32.f32 %v604_v50  ;;  %v700_v19 = vunpack.c.1.s8 %v148_v20  ;;  %v790_v1 = vunpack.c.0.s8 %v172_v59  ;;  %v796_v61 = vunpack.c.1.s8 %v172_v59 }
 0x166   :  { %3177 = vmatpush.bf16.msra.mxu3 %v2464_v55  ;;  %v2314_v6 = vpack.c.bf16 %v1468_v63, %v1462_v49  ;;  %v1654_v2 = vcvt.s32.f32 %v694_v11  ;;  %v2910_v7 = vadd.f32 %v5827_v40, %v2897_v46  ;;  %v490_v8 = vunpack.c.2.s8 %v94_v52  ;;  %v208_v49 = vld [vmem:[%s7099_s1 + $0x528] sm:$0xff]  ;;  %v5895_v11 = vpop.f32.mrf.mxu2 }
 0x167   :  { %v2362_v12 = vpack.c.bf16 %v1564_v18, %v1558_v0  ;;  %v1660_v20 = vcvt.s32.f32 %v700_v19  ;;  %v1750_v13 = vcvt.s32.f32 %v790_v1  ;;  %v1756_v14 = vcvt.s32.f32 %v796_v61  ;;  %v5897_v18 = vpop.f32.mrf.mxu3 }
 0x168   :  { %3139 = vmatpush.bf16.msra.mxu0 %v2314_v6  ;;  %v5885_v17 = vadd.f32 %v5829_v54, %v2910_v7  ;;  %v496_v15 = vunpack.c.3.s8 %v94_v52  ;;  %v1450_v21 = vcvt.s32.f32 %v490_v8  ;;  %v586_v40 = vunpack.c.2.s8 %v118_v5  ;;  %v256_v6 = vld [vmem:[%s7099_s1 + $0x6a8] sm:$0xff] }
 0x169   :  { %3152 = vmatpush.bf16.msra.mxu1 %v2362_v12  ;;  %v2410_v23 = vpack.c.bf16 %v1660_v20, %v1654_v2  ;;  %v2458_v24 = vpack.c.bf16 %v1756_v14, %v1750_v13  ;;  %v592_v59 = vunpack.c.3.s8 %v118_v5  ;;  %v682_v29 = vunpack.c.2.s8 %v142_v4 }
 0x16a   :  { %v1456_v56 = vcvt.s32.f32 %v496_v15  ;;  %v1546_v30 = vcvt.s32.f32 %v586_v40  ;;  %v688_v28 = vunpack.c.3.s8 %v142_v4  ;;  %v778_v31 = vunpack.c.2.s8 %v166_v16  ;;  %v280_v15 = vld [vmem:[%s7099_s1 + $0x768] sm:$0xff] }
 0x16b   :  { %3165 = vmatpush.bf16.msra.mxu2 %v2410_v23  ;;  %3178 = vmatpush.bf16.msra.mxu3 %v2458_v24  ;;  %v1552_v35 = vcvt.s32.f32 %v592_v59  ;;  %v1642_v36 = vcvt.s32.f32 %v682_v29  ;;  %v784_v54 = vunpack.c.3.s8 %v166_v16  ;;  %v478_v47 = vunpack.c.0.s8 %v94_v52  ;;  %v2937_v51 = vpop.f32.mrf.mxu0 }
 0x16c   :  { %v2308_v53 = vpack.c.bf16 %v1456_v56, %v1450_v21  ;;  %v1648_v37 = vcvt.s32.f32 %v688_v28  ;;  %v1738_v39 = vcvt.s32.f32 %v778_v31  ;;  %v484_v9 = vunpack.c.1.s8 %v94_v52  ;;  %v232_v52 = vld [vmem:[%s7099_s1 + $0x5e8] sm:$0xff]  ;;  %v2950_v21 = vpop.f32.mrf.mxu1 }
 0x16d   :  { %v2356_v27 = vpack.c.bf16 %v1552_v35, %v1546_v30  ;;  %v1744_v42 = vcvt.s32.f32 %v784_v54  ;;  %v1438_v57 = vcvt.s32.f32 %v478_v47  ;;  %v574_v44 = vunpack.c.0.s8 %v118_v5 }
 0x16e   :  { %3140 = vmatpush.bf16.msra.mxu0 %v2308_v53  ;;  %v2404_v45 = vpack.c.bf16 %v1648_v37, %v1642_v36  ;;  %v1444_v48 = vcvt.s32.f32 %v484_v9  ;;  %v580_v43 = vunpack.c.1.s8 %v118_v5  ;;  %v670_v46 = vunpack.c.0.s8 %v142_v4 }
 0x16f   :  { %3153 = vmatpush.bf16.msra.mxu1 %v2356_v27  ;;  %v2452_v50 = vpack.c.bf16 %v1744_v42, %v1738_v39  ;;  %v1534_v55 = vcvt.s32.f32 %v574_v44  ;;  %v676_v63 = vunpack.c.1.s8 %v142_v4  ;;  %v766_v0 = vunpack.c.0.s8 %v166_v16  ;;  %v2976_v44 = vpop.f32.mrf.mxu3 }
 0x170   :  { %3166 = vmatpush.bf16.msra.mxu2 %v2404_v45  ;;  %v2302_v19 = vpack.c.bf16 %v1444_v48, %v1438_v57  ;;  %v1540_v1 = vcvt.s32.f32 %v580_v43  ;;  %v1630_v61 = vcvt.s32.f32 %v670_v46  ;;  %v772_v5 = vunpack.c.1.s8 %v166_v16  ;;  %v2963_v57 = vpop.f32.mrf.mxu2  ;;  %v202_v46 = vld [vmem:[%s7099_s1 + $0x4f8] sm:$0xff] }
 0x171   :  { %3179 = vmatpush.bf16.msra.mxu3 %v2452_v50  ;;  %v1636_v2 = vcvt.s32.f32 %v676_v63  ;;  %v1726_v7 = vcvt.s32.f32 %v766_v0  ;;  %v946_v8 = vunpack.c.2.s8 %v208_v49  ;;  %v952_v4 = vunpack.c.3.s8 %v208_v49  ;;  %v226_v0 = vld [vmem:[%s7099_s1 + $0x5b8] sm:$0xff] }
 0x172   :  { %3141 = vmatpush.bf16.msra.mxu0 %v2302_v19  ;;  %v2350_v12 = vpack.c.bf16 %v1540_v1, %v1534_v55  ;;  %v1732_v20 = vcvt.s32.f32 %v772_v5  ;;  %v1042_v13 = vunpack.c.2.s8 %v232_v52  ;;  %v1048_v14 = vunpack.c.3.s8 %v232_v52  ;;  %v250_v5 = vld [vmem:[%s7099_s1 + $0x678] sm:$0xff] }
 0x173   :  { %v2398_v16 = vpack.c.bf16 %v1636_v2, %v1630_v61  ;;  %v1906_v40 = vcvt.s32.f32 %v946_v8  ;;  %v1912_v23 = vcvt.s32.f32 %v952_v4  ;;  %v1138_v24 = vunpack.c.2.s8 %v256_v6 }
 0x174   :  { %3154 = vmatpush.bf16.msra.mxu1 %v2350_v12  ;;  %v2446_v59 = vpack.c.bf16 %v1732_v20, %v1726_v7  ;;  %v2002_v29 = vcvt.s32.f32 %v1042_v13  ;;  %v2008_v56 = vcvt.s32.f32 %v1048_v14  ;;  %v1144_v30 = vunpack.c.3.s8 %v256_v6  ;;  %v274_v14 = vld [vmem:[%s7099_s1 + $0x738] sm:$0xff] }
 0x175   :  { %3167 = vmatpush.bf16.msra.mxu2 %v2398_v16  ;;  %v2536_v28 = vpack.c.bf16 %v1912_v23, %v1906_v40  ;;  %v2098_v31 = vcvt.s32.f32 %v1138_v24  ;;  %v1234_v35 = vunpack.c.2.s8 %v280_v15  ;;  %v1240_v36 = vunpack.c.3.s8 %v280_v15  ;;  %3142 = vmatmul.bf16.vlgmr.msra.gmra.mxu0 %v5394_v34 }
 0x176   :  { %3180 = vmatpush.bf16.msra.mxu3 %v2446_v59  ;;  %v2584_v54 = vpack.c.bf16 %v2008_v56, %v2002_v29  ;;  %v2104_v47 = vcvt.s32.f32 %v1144_v30  ;;  %v934_v53 = vunpack.c.0.s8 %v208_v49  ;;  %v940_v37 = vunpack.c.1.s8 %v208_v49 }
 0x177   :  { %3186 = vmatpush.bf16.msrb.mxu0 %v2536_v28  ;;  %v2194_v39 = vcvt.s32.f32 %v1234_v35  ;;  %v2200_v9 = vcvt.s32.f32 %v1240_v36  ;;  %v1030_v27 = vunpack.c.0.s8 %v232_v52  ;;  %v1036_v42 = vunpack.c.1.s8 %v232_v52  ;;  %3155 = vmatmul.bf16.vlgmr.msra.gmra.mxu1 %v5411_v62 }
 0x178   :  { %3199 = vmatpush.bf16.msrb.mxu1 %v2584_v54  ;;  %v2632_v51 = vpack.c.bf16 %v2104_v47, %v2098_v31  ;;  %v1894_v45 = vcvt.s32.f32 %v934_v53  ;;  %v1900_v48 = vcvt.s32.f32 %v940_v37  ;;  %v1126_v43 = vunpack.c.0.s8 %v256_v6  ;;  %3168 = vmatmul.bf16.vlgmr.msra.gmra.mxu2 %v5453_v38 }
 0x179   :  { %v2680_v49 = vpack.c.bf16 %v2200_v9, %v2194_v39  ;;  %v1990_v50 = vcvt.s32.f32 %v1030_v27  ;;  %v1996_v55 = vcvt.s32.f32 %v1036_v42  ;;  %v1132_v63 = vunpack.c.1.s8 %v256_v6  ;;  %3181 = vmatmul.bf16.vlgmr.msra.gmra.mxu3 %v5460_v60 }
 0x17a   :  { %3212 = vmatpush.bf16.msrb.mxu2 %v2632_v51  ;;  %v2530_v52 = vpack.c.bf16 %v1900_v48, %v1894_v45  ;;  %v2086_v19 = vcvt.s32.f32 %v1126_v43  ;;  %v1222_v1 = vunpack.c.0.s8 %v280_v15  ;;  %v1228_v61 = vunpack.c.1.s8 %v280_v15  ;;  %v196_v51 = vld [vmem:[%s7099_s1 + $0x4c8] sm:$0xff] }
 0x17b   :  { %3225 = vmatpush.bf16.msrb.mxu3 %v2680_v49  ;;  %v2578_v2 = vpack.c.bf16 %v1996_v55, %v1990_v50  ;;  %v2092_v7 = vcvt.s32.f32 %v1132_v63  ;;  %v922_v8 = vunpack.c.2.s8 %v202_v46  ;;  %v928_v6 = vunpack.c.3.s8 %v202_v46 }
 0x17c   :  { %3187 = vmatpush.bf16.msrb.mxu0 %v2530_v52  ;;  %v2182_v4 = vcvt.s32.f32 %v1222_v1  ;;  %v2188_v12 = vcvt.s32.f32 %v1228_v61  ;;  %v1018_v20 = vunpack.c.2.s8 %v226_v0  ;;  %v1024_v13 = vunpack.c.3.s8 %v226_v0  ;;  %v244_v1 = vld [vmem:[%s7099_s1 + $0x648] sm:$0xff] }
 0x17d   :  { %3200 = vmatpush.bf16.msrb.mxu1 %v2578_v2  ;;  %v2626_v15 = vpack.c.bf16 %v2092_v7, %v2086_v19  ;;  %v1882_v21 = vcvt.s32.f32 %v922_v8  ;;  %v1888_v16 = vcvt.s32.f32 %v928_v6  ;;  %v1114_v40 = vunpack.c.2.s8 %v250_v5  ;;  %v268_v8 = vld [vmem:[%s7099_s1 + $0x708] sm:$0xff] }
 0x17e   :  { %v2674_v23 = vpack.c.bf16 %v2188_v12, %v2182_v4  ;;  %v1978_v24 = vcvt.s32.f32 %v1018_v20  ;;  %v1984_v59 = vcvt.s32.f32 %v1024_v13  ;;  %v1120_v29 = vunpack.c.3.s8 %v250_v5 }
 0x17f   :  { %3213 = vmatpush.bf16.msrb.mxu2 %v2626_v15  ;;  %v2524_v56 = vpack.c.bf16 %v1888_v16, %v1882_v21  ;;  %v2074_v30 = vcvt.s32.f32 %v1114_v40  ;;  %v1210_v28 = vunpack.c.2.s8 %v274_v14  ;;  %v1216_v31 = vunpack.c.3.s8 %v274_v14 }
 0x180   :  { %3226 = vmatpush.bf16.msrb.mxu3 %v2674_v23  ;;  %v2572_v35 = vpack.c.bf16 %v1984_v59, %v1978_v24  ;;  %v2080_v36 = vcvt.s32.f32 %v1120_v29  ;;  %v2936_v54 = vadd.f32 %v5875_v10, %v5885_v17  ;;  %v910_v47 = vunpack.c.0.s8 %v202_v46 }
 0x181   :  { %3188 = vmatpush.bf16.msrb.mxu0 %v2524_v56  ;;  %v2170_v53 = vcvt.s32.f32 %v1210_v28  ;;  %v2176_v37 = vcvt.s32.f32 %v1216_v31  ;;  %v916_v39 = vunpack.c.1.s8 %v202_v46  ;;  %v1006_v9 = vunpack.c.0.s8 %v226_v0  ;;  %v220_v46 = vld [vmem:[%s7099_s1 + $0x588] sm:$0xff] }
 0x182   :  { %3201 = vmatpush.bf16.msrb.mxu1 %v2572_v35  ;;  %v2620_v27 = vpack.c.bf16 %v2080_v36, %v2074_v30  ;;  %v1870_v42 = vcvt.s32.f32 %v910_v47  ;;  %v1012_v57 = vunpack.c.1.s8 %v226_v0  ;;  %v1102_v44 = vunpack.c.0.s8 %v250_v5 }
 0x183   :  { %v2668_v45 = vpack.c.bf16 %v2176_v37, %v2170_v53  ;;  %v1876_v48 = vcvt.s32.f32 %v916_v39  ;;  %v1966_v43 = vcvt.s32.f32 %v1006_v9  ;;  %v1108_v49 = vunpack.c.1.s8 %v250_v5 }
 0x184   :  { %3214 = vmatpush.bf16.msrb.mxu2 %v2620_v27  ;;  %v1972_v10 = vcvt.s32.f32 %v1012_v57  ;;  %v2062_v17 = vcvt.s32.f32 %v1102_v44  ;;  %v1198_v50 = vunpack.c.0.s8 %v274_v14  ;;  %v1204_v55 = vunpack.c.1.s8 %v274_v14 }
 0x185   :  { %3227 = vmatpush.bf16.msrb.mxu3 %v2668_v45  ;;  %v2518_v63 = vpack.c.bf16 %v1876_v48, %v1870_v42  ;;  %v2068_v0 = vcvt.s32.f32 %v1108_v49  ;;  %v2949_v52 = vadd.f32 %v5887_v33, %v2936_v54  ;;  %v898_v19 = vunpack.c.2.s8 %v196_v51 }
 0x186   :  { %v2566_v61 = vpack.c.bf16 %v1972_v10, %v1966_v43  ;;  %v2158_v5 = vcvt.s32.f32 %v1198_v50  ;;  %v2164_v2 = vcvt.s32.f32 %v1204_v55  ;;  %v904_v7 = vunpack.c.3.s8 %v196_v51 }
 0x187   :  { %3189 = vmatpush.bf16.msrb.mxu0 %v2518_v63  ;;  %v2614_v6 = vpack.c.bf16 %v2068_v0, %v2062_v17  ;;  %v1858_v4 = vcvt.s32.f32 %v898_v19  ;;  %v994_v12 = vunpack.c.2.s8 %v220_v46  ;;  %v1000_v20 = vunpack.c.3.s8 %v220_v46 }
 0x188   :  { %3202 = vmatpush.bf16.msrb.mxu1 %v2566_v61  ;;  %v2662_v33 = vpack.c.bf16 %v2164_v2, %v2158_v5  ;;  %v1864_v13 = vcvt.s32.f32 %v904_v7  ;;  %v1090_v14 = vunpack.c.2.s8 %v244_v1  ;;  %v1096_v15 = vunpack.c.3.s8 %v244_v1  ;;  %v262_v5 = vld [vmem:[%s7099_s1 + $0x6d8] sm:$0xff] }
 0x189   :  { %3215 = vmatpush.bf16.msrb.mxu2 %v2614_v6  ;;  %v1954_v21 = vcvt.s32.f32 %v994_v12  ;;  %v1960_v16 = vcvt.s32.f32 %v1000_v20  ;;  %v1186_v40 = vunpack.c.2.s8 %v268_v8  ;;  %v1192_v23 = vunpack.c.3.s8 %v268_v8 }
 0x18a   :  { %3228 = vmatpush.bf16.msrb.mxu3 %v2662_v33  ;;  %v2512_v24 = vpack.c.bf16 %v1864_v13, %v1858_v4  ;;  %v2050_v59 = vcvt.s32.f32 %v1090_v14  ;;  %v2056_v29 = vcvt.s32.f32 %v1096_v15  ;;  %v2962_v56 = vadd.f32 %v5895_v11, %v2949_v52  ;;  %v190_v11 = vld [vmem:[%s7099_s1 + $0x498] sm:$0xff] }
 0x18b   :  { %v2560_v30 = vpack.c.bf16 %v1960_v16, %v1954_v21  ;;  %v2146_v28 = vcvt.s32.f32 %v1186_v40  ;;  %v2152_v31 = vcvt.s32.f32 %v1192_v23  ;;  %v886_v54 = vunpack.c.0.s8 %v196_v51 }
 0x18c   :  { %3190 = vmatpush.bf16.msrb.mxu0 %v2512_v24  ;;  %v2608_v35 = vpack.c.bf16 %v2056_v29, %v2050_v59  ;;  %v5938_v36 = vadd.f32 %v5897_v18, %v2962_v56  ;;  %v892_v53 = vunpack.c.1.s8 %v196_v51  ;;  %v982_v37 = vunpack.c.0.s8 %v220_v46  ;;  %v214_v51 = vld [vmem:[%s7099_s1 + $0x558] sm:$0xff] }
 0x18d   :  { %3203 = vmatpush.bf16.msrb.mxu1 %v2560_v30  ;;  %v2656_v47 = vpack.c.bf16 %v2152_v31, %v2146_v28  ;;  %v988_v39 = vunpack.c.1.s8 %v220_v46  ;;  %v1846_v9 = vcvt.s32.f32 %v886_v54  ;;  %v1078_v27 = vunpack.c.0.s8 %v244_v1  ;;  %v238_v46 = vld [vmem:[%s7099_s1 + $0x618] sm:$0xff] }
 0x18e   :  { %3216 = vmatpush.bf16.msrb.mxu2 %v2608_v35  ;;  %v1084_v42 = vunpack.c.1.s8 %v244_v1  ;;  %v1852_v57 = vcvt.s32.f32 %v892_v53  ;;  %v1942_v44 = vcvt.s32.f32 %v982_v37  ;;  %v1174_v18 = vunpack.c.0.s8 %v268_v8  ;;  %v65_v35 = vld [vmem:[%s7099_s1 + $0xb0] sm:$0xff] }
 0x18f   :  { %3229 = vmatpush.bf16.msrb.mxu3 %v2656_v47  ;;  %v1948_v45 = vcvt.s32.f32 %v988_v39  ;;  %v2038_v48 = vcvt.s32.f32 %v1078_v27  ;;  %v1180_v49 = vunpack.c.1.s8 %v268_v8  ;;  %v874_v55 = vunpack.c.2.s8 %v190_v11  ;;  %v89_v39 = vld [vmem:[%s7099_s1 + $0x170] sm:$0xff] }
 0x190   :  { %v2044_v43 = vcvt.s32.f32 %v1084_v42  ;;  %v2506_v10 = vpack.c.bf16 %v1852_v57, %v1846_v9  ;;  %v2134_v50 = vcvt.s32.f32 %v1174_v18  ;;  %v880_v52 = vunpack.c.3.s8 %v190_v11  ;;  %v113_v57 = vld [vmem:[%s7099_s1 + $0x230] sm:$0xff] }
 0x191   :  { %v2554_v17 = vpack.c.bf16 %v1948_v45, %v1942_v44  ;;  %v2140_v0 = vcvt.s32.f32 %v1180_v49  ;;  %v1834_v19 = vcvt.s32.f32 %v874_v55  ;;  %v970_v1 = vunpack.c.2.s8 %v214_v51 }
 0x192   :  { %v2602_v63 = vpack.c.bf16 %v2044_v43, %v2038_v48  ;;  %3191 = vmatpush.bf16.msrb.mxu0 %v2506_v10  ;;  %v976_v61 = vunpack.c.3.s8 %v214_v51  ;;  %v1066_v7 = vunpack.c.2.s8 %v238_v46  ;;  %v1072_v8 = vunpack.c.3.s8 %v238_v46 }
 0x193   :  { %3204 = vmatpush.bf16.msrb.mxu1 %v2554_v17  ;;  %v2650_v2 = vpack.c.bf16 %v2140_v0, %v2134_v50  ;;  %v1840_v6 = vcvt.s32.f32 %v880_v52  ;;  %v1930_v4 = vcvt.s32.f32 %v970_v1  ;;  %v1162_v13 = vunpack.c.2.s8 %v262_v5  ;;  %v137_v17 = vld [vmem:[%s7099_s1 + $0x2f0] sm:$0xff] }
 0x194   :  { %3217 = vmatpush.bf16.msrb.mxu2 %v2602_v63  ;;  %v1936_v12 = vcvt.s32.f32 %v976_v61  ;;  %v2026_v20 = vcvt.s32.f32 %v1066_v7  ;;  %v2032_v33 = vcvt.s32.f32 %v1072_v8  ;;  %v1168_v14 = vunpack.c.3.s8 %v262_v5 }
 0x195   :  { %3230 = vmatpush.bf16.msrb.mxu3 %v2650_v2  ;;  %v2500_v15 = vpack.c.bf16 %v1840_v6, %v1834_v19  ;;  %v862_v16 = vunpack.c.0.s8 %v190_v11  ;;  %v868_v40 = vunpack.c.1.s8 %v190_v11  ;;  %v2122_v24 = vcvt.s32.f32 %v1162_v13 }
 0x196   :  { %v2548_v21 = vpack.c.bf16 %v1936_v12, %v1930_v4  ;;  %v2596_v23 = vpack.c.bf16 %v2032_v33, %v2026_v20  ;;  %v2128_v59 = vcvt.s32.f32 %v1168_v14  ;;  %v958_v29 = vunpack.c.0.s8 %v214_v51 }
 0x197   :  { %3192 = vmatpush.bf16.msrb.mxu0 %v2500_v15  ;;  %v1822_v56 = vcvt.s32.f32 %v862_v16  ;;  %v1828_v30 = vcvt.s32.f32 %v868_v40  ;;  %v964_v28 = vunpack.c.1.s8 %v214_v51  ;;  %v1054_v31 = vunpack.c.0.s8 %v238_v46 }
 0x198   :  { %3205 = vmatpush.bf16.msrb.mxu1 %v2548_v21  ;;  %3218 = vmatpush.bf16.msrb.mxu2 %v2596_v23  ;;  %v2644_v54 = vpack.c.bf16 %v2128_v59, %v2122_v24  ;;  %v1918_v47 = vcvt.s32.f32 %v958_v29  ;;  %v1060_v53 = vunpack.c.1.s8 %v238_v46  ;;  %v1150_v37 = vunpack.c.0.s8 %v262_v5  ;;  %v59_v23 = vld [vmem:[%s7099_s1 + $0x80] sm:$0xff] }
 0x199   :  { %v2494_v9 = vpack.c.bf16 %v1828_v30, %v1822_v56  ;;  %v1924_v27 = vcvt.s32.f32 %v964_v28  ;;  %v2014_v42 = vcvt.s32.f32 %v1054_v31  ;;  %v1156_v11 = vunpack.c.1.s8 %v262_v5  ;;  %v83_v30 = vld [vmem:[%s7099_s1 + $0x140] sm:$0xff] }
 0x19a   :  { %3231 = vmatpush.bf16.msrb.mxu3 %v2644_v54  ;;  %v2020_v44 = vcvt.s32.f32 %v1060_v53  ;;  %v2110_v45 = vcvt.s32.f32 %v1150_v37  ;;  %v371_v18 = vunpack.c.2.s8 %v65_v35  ;;  %v377_v48 = vunpack.c.3.s8 %v65_v35 }
 0x19b   :  { %3193 = vmatpush.bf16.msrb.mxu0 %v2494_v9  ;;  %v2542_v43 = vpack.c.bf16 %v1924_v27, %v1918_v47  ;;  %v2116_v49 = vcvt.s32.f32 %v1156_v11  ;;  %v467_v51 = vunpack.c.2.s8 %v89_v39  ;;  %v473_v10 = vunpack.c.3.s8 %v89_v39  ;;  %v107_v47 = vld [vmem:[%s7099_s1 + $0x200] sm:$0xff] }
 0x19c   :  { %v2590_v50 = vpack.c.bf16 %v2020_v44, %v2014_v42  ;;  %v1331_v55 = vcvt.s32.f32 %v371_v18  ;;  %v1337_v46 = vcvt.s32.f32 %v377_v48  ;;  %v563_v63 = vunpack.c.2.s8 %v113_v57  ;;  %v131_v44 = vld [vmem:[%s7099_s1 + $0x2c0] sm:$0xff] }
 0x19d   :  { %3206 = vmatpush.bf16.msrb.mxu1 %v2542_v43  ;;  %v2638_v0 = vpack.c.bf16 %v2116_v49, %v2110_v45  ;;  %v1427_v52 = vcvt.s32.f32 %v467_v51  ;;  %v1433_v19 = vcvt.s32.f32 %v473_v10  ;;  %v569_v1 = vunpack.c.3.s8 %v113_v57 }
 0x19e   :  { %3219 = vmatpush.bf16.msrb.mxu2 %v2590_v50  ;;  %v2249_v61 = vpack.c.bf16 %v1337_v46, %v1331_v55  ;;  %v1523_v5 = vcvt.s32.f32 %v563_v63  ;;  %v659_v2 = vunpack.c.2.s8 %v137_v17  ;;  %v665_v7 = vunpack.c.3.s8 %v137_v17  ;;  %3194 = vmatmul.bf16.vlgmr.msrb.gmra.mxu0 %v5448_v32 }
 0x19f   :  { %3232 = vmatpush.bf16.msrb.mxu3 %v2638_v0  ;;  %v2297_v8 = vpack.c.bf16 %v1433_v19, %v1427_v52  ;;  %v1529_v6 = vcvt.s32.f32 %v569_v1  ;;  %v359_v4 = vunpack.c.0.s8 %v65_v35  ;;  %v365_v12 = vunpack.c.1.s8 %v65_v35 }
 0x1a0   :  { %3238 = vmatpush.bf16.msra.mxu0 %v2249_v61  ;;  %v1619_v20 = vcvt.s32.f32 %v659_v2  ;;  %v1625_v33 = vcvt.s32.f32 %v665_v7  ;;  %3207 = vmatmul.bf16.vlgmr.msrb.gmra.mxu1 %v5455_v41  ;;  %v455_v13 = vunpack.c.0.s8 %v89_v39  ;;  %v461_v14 = vunpack.c.1.s8 %v89_v39 }
 0x1a1   :  { %3251 = vmatpush.bf16.msra.mxu1 %v2297_v8  ;;  %v2345_v15 = vpack.c.bf16 %v1529_v6, %v1523_v5  ;;  %3220 = vmatmul.bf16.vlgmr.msrb.gmra.mxu2 %v5506_v22  ;;  %v1319_v21 = vcvt.s32.f32 %v359_v4  ;;  %v1325_v16 = vcvt.s32.f32 %v365_v12  ;;  %v551_v40 = vunpack.c.0.s8 %v113_v57 }
 0x1a2   :  { %v2393_v24 = vpack.c.bf16 %v1625_v33, %v1619_v20  ;;  %3233 = vmatmul.bf16.vlgmr.msrb.gmra.mxu3 %v5511_v26  ;;  %v1415_v59 = vcvt.s32.f32 %v455_v13  ;;  %v1421_v29 = vcvt.s32.f32 %v461_v14  ;;  %v557_v56 = vunpack.c.1.s8 %v113_v57  ;;  %v53_v20 = vld [vmem:[%s7099_s1 + $0x50] sm:$0xff] }
 0x1a3   :  { %3264 = vmatpush.bf16.msra.mxu2 %v2345_v15  ;;  %v2243_v28 = vpack.c.bf16 %v1325_v16, %v1319_v21  ;;  %v1511_v31 = vcvt.s32.f32 %v551_v40  ;;  %v647_v35 = vunpack.c.0.s8 %v137_v17  ;;  %v653_v54 = vunpack.c.1.s8 %v137_v17  ;;  %v77_v21 = vld [vmem:[%s7099_s1 + $0x110] sm:$0xff]  ;;  %v5986_v16 = vpop.f32.mrf.mxu0  ;;  %v5988_v40 = vpop.f32.mrf.mxu1 }
 0x1a4   :  { %3277 = vmatpush.bf16.msra.mxu3 %v2393_v24  ;;  %v2291_v53 = vpack.c.bf16 %v1421_v29, %v1415_v59  ;;  %v1517_v37 = vcvt.s32.f32 %v557_v56  ;;  %v347_v39 = vunpack.c.2.s8 %v59_v23  ;;  %v353_v9 = vunpack.c.3.s8 %v59_v23  ;;  %v101_v56 = vld [vmem:[%s7099_s1 + $0x1d0] sm:$0xff] }
 0x1a5   :  { %3239 = vmatpush.bf16.msra.mxu0 %v2243_v28  ;;  %v1607_v27 = vcvt.s32.f32 %v647_v35  ;;  %v1613_v42 = vcvt.s32.f32 %v653_v54  ;;  %v443_v11 = vunpack.c.2.s8 %v83_v30  ;;  %v449_v57 = vunpack.c.3.s8 %v83_v30 }
 0x1a6   :  { %3252 = vmatpush.bf16.msra.mxu1 %v2291_v53  ;;  %v2339_v45 = vpack.c.bf16 %v1517_v37, %v1511_v31  ;;  %v1307_v18 = vcvt.s32.f32 %v347_v39  ;;  %v1313_v48 = vcvt.s32.f32 %v353_v9  ;;  %v539_v43 = vunpack.c.2.s8 %v107_v47  ;;  %v125_v39 = vld [vmem:[%s7099_s1 + $0x290] sm:$0xff] }
 0x1a7   :  { %v2387_v49 = vpack.c.bf16 %v1613_v42, %v1607_v27  ;;  %v1403_v51 = vcvt.s32.f32 %v443_v11  ;;  %v1409_v10 = vcvt.s32.f32 %v449_v57  ;;  %v545_v17 = vunpack.c.3.s8 %v107_v47 }
 0x1a8   :  { %3265 = vmatpush.bf16.msra.mxu2 %v2339_v45  ;;  %v2237_v50 = vpack.c.bf16 %v1313_v48, %v1307_v18  ;;  %v1499_v55 = vcvt.s32.f32 %v539_v43  ;;  %v635_v46 = vunpack.c.2.s8 %v131_v44  ;;  %v641_v63 = vunpack.c.3.s8 %v131_v44  ;;  %v5996_v48 = vpop.f32.mrf.mxu2  ;;  %v5998_v43 = vpop.f32.mrf.mxu3 }
 0x1a9   :  { %3278 = vmatpush.bf16.msra.mxu3 %v2387_v49  ;;  %v2285_v0 = vpack.c.bf16 %v1409_v10, %v1403_v51  ;;  %v1505_v52 = vcvt.s32.f32 %v545_v17  ;;  %v335_v19 = vunpack.c.0.s8 %v59_v23  ;;  %v341_v1 = vunpack.c.1.s8 %v59_v23 }
 0x1aa   :  { %3240 = vmatpush.bf16.msra.mxu0 %v2237_v50  ;;  %v1595_v61 = vcvt.s32.f32 %v635_v46  ;;  %v1601_v5 = vcvt.s32.f32 %v641_v63  ;;  %v431_v2 = vunpack.c.0.s8 %v83_v30  ;;  %v437_v7 = vunpack.c.1.s8 %v83_v30 }
 0x1ab   :  { %3253 = vmatpush.bf16.msra.mxu1 %v2285_v0  ;;  %v2333_v8 = vpack.c.bf16 %v1505_v52, %v1499_v55  ;;  %v1295_v6 = vcvt.s32.f32 %v335_v19  ;;  %v1301_v4 = vcvt.s32.f32 %v341_v1  ;;  %v527_v12 = vunpack.c.0.s8 %v107_v47 }
 0x1ac   :  { %v2381_v33 = vpack.c.bf16 %v1601_v5, %v1595_v61  ;;  %v1391_v13 = vcvt.s32.f32 %v431_v2  ;;  %v1397_v14 = vcvt.s32.f32 %v437_v7  ;;  %v533_v15 = vunpack.c.1.s8 %v107_v47  ;;  %v2989_v61 = vpop.f32.mrf.mxu0  ;;  %v3002_v5 = vpop.f32.mrf.mxu1 }
 0x1ad   :  { %3266 = vmatpush.bf16.msra.mxu2 %v2333_v8  ;;  %v2231_v23 = vpack.c.bf16 %v1301_v4, %v1295_v6  ;;  %v1487_v24 = vcvt.s32.f32 %v527_v12  ;;  %v623_v59 = vunpack.c.0.s8 %v131_v44  ;;  %v629_v29 = vunpack.c.1.s8 %v131_v44  ;;  %v47_v4 = vld [vmem:[%s7099_s1 + $0x20] sm:$0xff] }
 0x1ae   :  { %3279 = vmatpush.bf16.msra.mxu3 %v2381_v33  ;;  %v2279_v30 = vpack.c.bf16 %v1397_v14, %v1391_v13  ;;  %v1493_v28 = vcvt.s32.f32 %v533_v15  ;;  %v323_v31 = vunpack.c.2.s8 %v53_v20  ;;  %v329_v35 = vunpack.c.3.s8 %v53_v20  ;;  %v71_v14 = vld [vmem:[%s7099_s1 + $0xe0] sm:$0xff] }
 0x1af   :  { %3241 = vmatpush.bf16.msra.mxu0 %v2231_v23  ;;  %v1583_v54 = vcvt.s32.f32 %v623_v59  ;;  %v1589_v47 = vcvt.s32.f32 %v629_v29  ;;  %v419_v53 = vunpack.c.2.s8 %v77_v21  ;;  %v425_v37 = vunpack.c.3.s8 %v77_v21  ;;  %v95_v59 = vld [vmem:[%s7099_s1 + $0x1a0] sm:$0xff] }
 0x1b0   :  { %3254 = vmatpush.bf16.msra.mxu1 %v2279_v30  ;;  %v2327_v9 = vpack.c.bf16 %v1493_v28, %v1487_v24  ;;  %v1283_v27 = vcvt.s32.f32 %v323_v31  ;;  %v1289_v42 = vcvt.s32.f32 %v329_v35  ;;  %v515_v11 = vunpack.c.2.s8 %v101_v56 }
 0x1b1   :  { %v2375_v57 = vpack.c.bf16 %v1589_v47, %v1583_v54  ;;  %v1379_v44 = vcvt.s32.f32 %v419_v53  ;;  %v1385_v45 = vcvt.s32.f32 %v425_v37  ;;  %v521_v18 = vunpack.c.3.s8 %v101_v56  ;;  %v119_v53 = vld [vmem:[%s7099_s1 + $0x260] sm:$0xff]  ;;  %v3015_v37 = vpop.f32.mrf.mxu2 }
 0x1b2   :  { %3267 = vmatpush.bf16.msra.mxu2 %v2327_v9  ;;  %v2225_v49 = vpack.c.bf16 %v1289_v42, %v1283_v27  ;;  %v1475_v51 = vcvt.s32.f32 %v515_v11  ;;  %v611_v10 = vunpack.c.2.s8 %v125_v39  ;;  %v617_v17 = vunpack.c.3.s8 %v125_v39 }
 0x1b3   :  { %3280 = vmatpush.bf16.msra.mxu3 %v2375_v57  ;;  %v2273_v50 = vpack.c.bf16 %v1385_v45, %v1379_v44  ;;  %v1481_v55 = vcvt.s32.f32 %v521_v18  ;;  %v311_v46 = vunpack.c.0.s8 %v53_v20  ;;  %v317_v63 = vunpack.c.1.s8 %v53_v20 }
 0x1b4   :  { %3242 = vmatpush.bf16.msra.mxu0 %v2225_v49  ;;  %v1571_v0 = vcvt.s32.f32 %v611_v10  ;;  %v1577_v52 = vcvt.s32.f32 %v617_v17  ;;  %v407_v19 = vunpack.c.0.s8 %v77_v21  ;;  %v413_v1 = vunpack.c.1.s8 %v77_v21 }
 0x1b5   :  { %3255 = vmatpush.bf16.msra.mxu1 %v2273_v50  ;;  %v2321_v2 = vpack.c.bf16 %v1481_v55, %v1475_v51  ;;  %v1271_v7 = vcvt.s32.f32 %v311_v46  ;;  %v1277_v8 = vcvt.s32.f32 %v317_v63  ;;  %v503_v6 = vunpack.c.0.s8 %v101_v56 }
 0x1b6   :  { %v2369_v12 = vpack.c.bf16 %v1577_v52, %v1571_v0  ;;  %v1367_v33 = vcvt.s32.f32 %v407_v19  ;;  %v1373_v13 = vcvt.s32.f32 %v413_v1  ;;  %v509_v20 = vunpack.c.1.s8 %v101_v56 }
 0x1b7   :  { %3268 = vmatpush.bf16.msra.mxu2 %v2321_v2  ;;  %v2219_v15 = vpack.c.bf16 %v1277_v8, %v1271_v7  ;;  %v1463_v21 = vcvt.s32.f32 %v503_v6  ;;  %v599_v23 = vunpack.c.0.s8 %v125_v39  ;;  %v605_v24 = vunpack.c.1.s8 %v125_v39  ;;  %v3028_v39 = vpop.f32.mrf.mxu3  ;;  %v6015_v8 = vld [vmem:[%s7099_s1 + $0x3b0] sm:$0xff] }
 0x1b8   :  { %3281 = vmatpush.bf16.msra.mxu3 %v2369_v12  ;;  %v2267_v29 = vpack.c.bf16 %v1373_v13, %v1367_v33  ;;  %v1469_v30 = vcvt.s32.f32 %v509_v20  ;;  %v299_v28 = vunpack.c.2.s8 %v47_v4  ;;  %v305_v31 = vunpack.c.3.s8 %v47_v4 }
 0x1b9   :  { %3243 = vmatpush.bf16.msra.mxu0 %v2219_v15  ;;  %v1559_v56 = vcvt.s32.f32 %v599_v23  ;;  %v1565_v35 = vcvt.s32.f32 %v605_v24  ;;  %v395_v54 = vunpack.c.2.s8 %v71_v14  ;;  %v401_v47 = vunpack.c.3.s8 %v71_v14  ;;  %v6025_v23 = vld [vmem:[%s7099_s1 + $0x530] sm:$0xff]  ;;  %v6027_v24 = vpop.f32.mrf.mxu0 }
 0x1ba   :  { %3256 = vmatpush.bf16.msra.mxu1 %v2267_v29  ;;  %v2315_v9 = vpack.c.bf16 %v1469_v30, %v1463_v21  ;;  %v1259_v27 = vcvt.s32.f32 %v299_v28  ;;  %v1265_v42 = vcvt.s32.f32 %v305_v31  ;;  %v491_v11 = vunpack.c.2.s8 %v95_v59  ;;  %v6029_v29 = vpop.f32.mrf.mxu1 }
 0x1bb   :  { %v2363_v57 = vpack.c.bf16 %v1565_v35, %v1559_v56  ;;  %v1355_v44 = vcvt.s32.f32 %v395_v54  ;;  %v1361_v45 = vcvt.s32.f32 %v401_v47  ;;  %v497_v18 = vunpack.c.3.s8 %v95_v59 }
 0x1bc   :  { %3269 = vmatpush.bf16.msra.mxu2 %v2315_v9  ;;  %v2213_v49 = vpack.c.bf16 %v1265_v42, %v1259_v27  ;;  %v1451_v51 = vcvt.s32.f32 %v491_v11  ;;  %v587_v10 = vunpack.c.2.s8 %v119_v53  ;;  %v593_v17 = vunpack.c.3.s8 %v119_v53 }
 0x1bd   :  { %3282 = vmatpush.bf16.msra.mxu3 %v2363_v57  ;;  %v2261_v50 = vpack.c.bf16 %v1361_v45, %v1355_v44  ;;  %v1457_v55 = vcvt.s32.f32 %v497_v18  ;;  %v287_v46 = vunpack.c.0.s8 %v47_v4  ;;  %v293_v63 = vunpack.c.1.s8 %v47_v4  ;;  %v6020_v4 = vld [vmem:[%s7099_s1 + $0x470] sm:$0xff] }
 0x1be   :  { %3244 = vmatpush.bf16.msra.mxu0 %v2213_v49  ;;  %v1547_v0 = vcvt.s32.f32 %v587_v10  ;;  %v1553_v52 = vcvt.s32.f32 %v593_v17  ;;  %v383_v19 = vunpack.c.0.s8 %v71_v14  ;;  %v389_v1 = vunpack.c.1.s8 %v71_v14  ;;  %v6040_v10 = vpop.f32.mrf.mxu2 }
 0x1bf   :  { %3257 = vmatpush.bf16.msra.mxu1 %v2261_v50  ;;  %v2309_v61 = vpack.c.bf16 %v1457_v55, %v1451_v51  ;;  %v1247_v5 = vcvt.s32.f32 %v287_v46  ;;  %v1253_v2 = vcvt.s32.f32 %v293_v63  ;;  %v479_v7 = vunpack.c.0.s8 %v95_v59  ;;  %v6043_v17 = vpop.f32.mrf.mxu3 }
 0x1c0   :  { %v2357_v6 = vpack.c.bf16 %v1553_v52, %v1547_v0  ;;  %v1343_v12 = vcvt.s32.f32 %v383_v19  ;;  %v1349_v33 = vcvt.s32.f32 %v389_v1  ;;  %v485_v13 = vunpack.c.1.s8 %v95_v59 }
 0x1c1   :  { %3270 = vmatpush.bf16.msra.mxu2 %v2309_v61  ;;  %v2207_v20 = vpack.c.bf16 %v1253_v2, %v1247_v5  ;;  %v1439_v14 = vcvt.s32.f32 %v479_v7  ;;  %v575_v15 = vunpack.c.0.s8 %v119_v53  ;;  %v581_v21 = vunpack.c.1.s8 %v119_v53  ;;  %v233_v53 = vld [vmem:[%s7099_s1 + $0x5f0] sm:$0xff] }
 0x1c2   :  { %3283 = vmatpush.bf16.msra.mxu3 %v2357_v6  ;;  %v2255_v59 = vpack.c.bf16 %v1349_v33, %v1343_v12  ;;  %v1445_v30 = vcvt.s32.f32 %v485_v13  ;;  %v755_v28 = vunpack.c.2.s8 %v6015_v8  ;;  %v761_v31 = vunpack.c.3.s8 %v6015_v8  ;;  %v3054_v6 = vpop.f32.mrf.mxu1 }
 0x1c3   :  { %3245 = vmatpush.bf16.msra.mxu0 %v2207_v20  ;;  %v1535_v56 = vcvt.s32.f32 %v575_v15  ;;  %v1541_v35 = vcvt.s32.f32 %v581_v21  ;;  %v851_v54 = vunpack.c.2.s8 %v6020_v4  ;;  %v857_v47 = vunpack.c.3.s8 %v6020_v4  ;;  %v179_v21 = vld [vmem:[%s7099_s1 + $0x440] sm:$0xff] }
 0x1c4   :  { %3258 = vmatpush.bf16.msra.mxu1 %v2255_v59  ;;  %v2303_v37 = vpack.c.bf16 %v1445_v30, %v1439_v14  ;;  %v1715_v39 = vcvt.s32.f32 %v755_v28  ;;  %v1721_v9 = vcvt.s32.f32 %v761_v31  ;;  %v947_v27 = vunpack.c.2.s8 %v6025_v23 }
 0x1c5   :  { %v2351_v42 = vpack.c.bf16 %v1541_v35, %v1535_v56  ;;  %v1811_v11 = vcvt.s32.f32 %v851_v54  ;;  %v1817_v57 = vcvt.s32.f32 %v857_v47  ;;  %v953_v44 = vunpack.c.3.s8 %v6025_v23 }
 0x1c6   :  { %3271 = vmatpush.bf16.msra.mxu2 %v2303_v37  ;;  %v2441_v45 = vpack.c.bf16 %v1721_v9, %v1715_v39  ;;  %v1907_v18 = vcvt.s32.f32 %v947_v27  ;;  %v1043_v49 = vunpack.c.2.s8 %v233_v53  ;;  %v1049_v51 = vunpack.c.3.s8 %v233_v53  ;;  %3246 = vmatmul.bf16.vlgmr.msra.gmra.mxu0 %v5406_v58  ;;  %v3067_v27 = vpop.f32.mrf.mxu2 }
 0x1c7   :  { %3284 = vmatpush.bf16.msra.mxu3 %v2351_v42  ;;  %v2489_v50 = vpack.c.bf16 %v1817_v57, %v1811_v11  ;;  %v1913_v55 = vcvt.s32.f32 %v953_v44  ;;  %v3001_v46 = vadd.f32 %v5988_v40, %v5986_v16  ;;  %v743_v63 = vunpack.c.0.s8 %v6015_v8  ;;  %3259 = vmatmul.bf16.vlgmr.msra.gmra.mxu1 %v5417_v3  ;;  %v155_v16 = vld [vmem:[%s7099_s1 + $0x380] sm:$0xff]  ;;  %v3041_v40 = vpop.f32.mrf.mxu0  ;;  %v3080_v42 = vpop.f32.mrf.mxu3 }
 0x1c8   :  { %3290 = vmatpush.bf16.msrb.mxu0 %v2441_v45  ;;  %v2003_v0 = vcvt.s32.f32 %v1043_v49  ;;  %v2009_v52 = vcvt.s32.f32 %v1049_v51  ;;  %v749_v19 = vunpack.c.1.s8 %v6015_v8  ;;  %v839_v1 = vunpack.c.0.s8 %v6020_v4  ;;  %v149_v40 = vld [vmem:[%s7099_s1 + $0x350] sm:$0xff] }
 0x1c9   :  { %3303 = vmatpush.bf16.msrb.mxu1 %v2489_v50  ;;  %v2537_v61 = vpack.c.bf16 %v1913_v55, %v1907_v18  ;;  %v1703_v5 = vcvt.s32.f32 %v743_v63  ;;  %v845_v2 = vunpack.c.1.s8 %v6020_v4  ;;  %v935_v7 = vunpack.c.0.s8 %v6025_v23  ;;  %3272 = vmatmul.bf16.vlgmr.msra.gmra.mxu2 %v5394_v34 }
 0x1ca   :  { %v2585_v12 = vpack.c.bf16 %v2009_v52, %v2003_v0  ;;  %v1709_v33 = vcvt.s32.f32 %v749_v19  ;;  %v1799_v8 = vcvt.s32.f32 %v839_v1  ;;  %v941_v13 = vunpack.c.1.s8 %v6025_v23  ;;  %3285 = vmatmul.bf16.vlgmr.msra.gmra.mxu3 %v5411_v62  ;;  %v203_v23 = vld [vmem:[%s7099_s1 + $0x500] sm:$0xff] }
 0x1cb   :  { %3316 = vmatpush.bf16.msrb.mxu2 %v2537_v61  ;;  %v1805_v20 = vcvt.s32.f32 %v845_v2  ;;  %v1895_v4 = vcvt.s32.f32 %v935_v7  ;;  %v1031_v14 = vunpack.c.0.s8 %v233_v53  ;;  %v1037_v15 = vunpack.c.1.s8 %v233_v53  ;;  %v227_v53 = vld [vmem:[%s7099_s1 + $0x5c0] sm:$0xff] }
 0x1cc   :  { %3329 = vmatpush.bf16.msrb.mxu3 %v2585_v12  ;;  %v2435_v59 = vpack.c.bf16 %v1709_v33, %v1703_v5  ;;  %v1901_v30 = vcvt.s32.f32 %v941_v13  ;;  %v3014_v28 = vadd.f32 %v5996_v48, %v3001_v46  ;;  %v731_v31 = vunpack.c.2.s8 %v155_v16 }
 0x1cd   :  { %v2483_v56 = vpack.c.bf16 %v1805_v20, %v1799_v8  ;;  %v1991_v35 = vcvt.s32.f32 %v1031_v14  ;;  %v1997_v54 = vcvt.s32.f32 %v1037_v15  ;;  %v737_v47 = vunpack.c.3.s8 %v155_v16 }
 0x1ce   :  { %3291 = vmatpush.bf16.msrb.mxu0 %v2435_v59  ;;  %v2531_v37 = vpack.c.bf16 %v1901_v30, %v1895_v4  ;;  %v6070_v39 = vadd.f32 %v5998_v43, %v3014_v28  ;;  %v1691_v9 = vcvt.s32.f32 %v731_v31  ;;  %v827_v48 = vunpack.c.2.s8 %v179_v21  ;;  %v197_v28 = vld [vmem:[%s7099_s1 + $0x4d0] sm:$0xff] }
 0x1cf   :  { %3304 = vmatpush.bf16.msrb.mxu1 %v2483_v56  ;;  %v2579_v11 = vpack.c.bf16 %v1997_v54, %v1991_v35  ;;  %v1697_v57 = vcvt.s32.f32 %v737_v47  ;;  %v833_v44 = vunpack.c.3.s8 %v179_v21  ;;  %v923_v45 = vunpack.c.2.s8 %v203_v23 }
 0x1d0   :  { %3317 = vmatpush.bf16.msrb.mxu2 %v2531_v37  ;;  %v1787_v18 = vcvt.s32.f32 %v827_v48  ;;  %v929_v49 = vunpack.c.3.s8 %v203_v23  ;;  %v1019_v51 = vunpack.c.2.s8 %v227_v53  ;;  %v1025_v50 = vunpack.c.3.s8 %v227_v53 }
 0x1d1   :  { %3330 = vmatpush.bf16.msrb.mxu3 %v2579_v11  ;;  %v2429_v55 = vpack.c.bf16 %v1697_v57, %v1691_v9  ;;  %v1793_v46 = vcvt.s32.f32 %v833_v44  ;;  %v1883_v63 = vcvt.s32.f32 %v923_v45  ;;  %v719_v43 = vunpack.c.0.s8 %v155_v16 }
 0x1d2   :  { %v1889_v0 = vcvt.s32.f32 %v929_v49  ;;  %v1979_v52 = vcvt.s32.f32 %v1019_v51  ;;  %v1985_v19 = vcvt.s32.f32 %v1025_v50  ;;  %v725_v1 = vunpack.c.1.s8 %v155_v16  ;;  %v173_v16 = vld [vmem:[%s7099_s1 + $0x410] sm:$0xff] }
 0x1d3   :  { %3292 = vmatpush.bf16.msrb.mxu0 %v2429_v55  ;;  %v2477_v61 = vpack.c.bf16 %v1793_v46, %v1787_v18  ;;  %v1679_v5 = vcvt.s32.f32 %v719_v43  ;;  %v815_v2 = vunpack.c.0.s8 %v179_v21  ;;  %v821_v7 = vunpack.c.1.s8 %v179_v21 }
 0x1d4   :  { %v2525_v6 = vpack.c.bf16 %v1889_v0, %v1883_v63  ;;  %v2573_v12 = vpack.c.bf16 %v1985_v19, %v1979_v52  ;;  %v1685_v33 = vcvt.s32.f32 %v725_v1  ;;  %v911_v8 = vunpack.c.0.s8 %v203_v23 }
 0x1d5   :  { %3305 = vmatpush.bf16.msrb.mxu1 %v2477_v61  ;;  %v1775_v13 = vcvt.s32.f32 %v815_v2  ;;  %v1781_v20 = vcvt.s32.f32 %v821_v7  ;;  %v917_v4 = vunpack.c.1.s8 %v203_v23  ;;  %v1007_v14 = vunpack.c.0.s8 %v227_v53  ;;  %v221_v23 = vld [vmem:[%s7099_s1 + $0x590] sm:$0xff] }
 0x1d6   :  { %3318 = vmatpush.bf16.msrb.mxu2 %v2525_v6  ;;  %3331 = vmatpush.bf16.msrb.mxu3 %v2573_v12  ;;  %v2423_v15 = vpack.c.bf16 %v1685_v33, %v1679_v5  ;;  %v1871_v21 = vcvt.s32.f32 %v911_v8  ;;  %v1013_v59 = vunpack.c.1.s8 %v227_v53  ;;  %v707_v30 = vunpack.c.2.s8 %v149_v40  ;;  %v143_v12 = vld [vmem:[%s7099_s1 + $0x320] sm:$0xff] }
 0x1d7   :  { %v2471_v31 = vpack.c.bf16 %v1781_v20, %v1775_v13  ;;  %v1877_v56 = vcvt.s32.f32 %v917_v4  ;;  %v1967_v35 = vcvt.s32.f32 %v1007_v14  ;;  %v713_v54 = vunpack.c.3.s8 %v149_v40  ;;  %v6093_v14 = vpop.f32.mrf.mxu0 }
 0x1d8   :  { %3293 = vmatpush.bf16.msrb.mxu0 %v2423_v15  ;;  %v1973_v47 = vcvt.s32.f32 %v1013_v59  ;;  %v1667_v37 = vcvt.s32.f32 %v707_v30  ;;  %v803_v9 = vunpack.c.2.s8 %v173_v16  ;;  %v809_v48 = vunpack.c.3.s8 %v173_v16  ;;  %v191_v30 = vld [vmem:[%s7099_s1 + $0x4a0] sm:$0xff] }
 0x1d9   :  { %3306 = vmatpush.bf16.msrb.mxu1 %v2471_v31  ;;  %v2519_v53 = vpack.c.bf16 %v1877_v56, %v1871_v21  ;;  %v1673_v27 = vcvt.s32.f32 %v713_v54  ;;  %v899_v42 = vunpack.c.2.s8 %v197_v28  ;;  %v905_v11 = vunpack.c.3.s8 %v197_v28  ;;  %v215_v54 = vld [vmem:[%s7099_s1 + $0x560] sm:$0xff] }
 0x1da   :  { %v2567_v57 = vpack.c.bf16 %v1973_v47, %v1967_v35  ;;  %v1763_v44 = vcvt.s32.f32 %v803_v9  ;;  %v1769_v45 = vcvt.s32.f32 %v809_v48  ;;  %v995_v18 = vunpack.c.2.s8 %v221_v23 }
 0x1db   :  { %3319 = vmatpush.bf16.msrb.mxu2 %v2519_v53  ;;  %v2417_v49 = vpack.c.bf16 %v1673_v27, %v1667_v37  ;;  %v1859_v51 = vcvt.s32.f32 %v899_v42  ;;  %v1865_v50 = vcvt.s32.f32 %v905_v11  ;;  %v1001_v55 = vunpack.c.3.s8 %v221_v23 }
 0x1dc   :  { %3332 = vmatpush.bf16.msrb.mxu3 %v2567_v57  ;;  %v2465_v46 = vpack.c.bf16 %v1769_v45, %v1763_v44  ;;  %v1955_v63 = vcvt.s32.f32 %v995_v18  ;;  %v3040_v43 = vadd.f32 %v6027_v24, %v6070_v39  ;;  %v695_v0 = vunpack.c.0.s8 %v149_v40  ;;  %v6105_v45 = vpop.f32.mrf.mxu1 }
 0x1dd   :  { %3294 = vmatpush.bf16.msrb.mxu0 %v2417_v49  ;;  %v2513_v52 = vpack.c.bf16 %v1865_v50, %v1859_v51  ;;  %v1961_v19 = vcvt.s32.f32 %v1001_v55  ;;  %v701_v1 = vunpack.c.1.s8 %v149_v40  ;;  %v791_v61 = vunpack.c.0.s8 %v173_v16 }
 0x1de   :  { %3307 = vmatpush.bf16.msrb.mxu1 %v2465_v46  ;;  %v3053_v5 = vadd.f32 %v6029_v29, %v3040_v43  ;;  %v1655_v2 = vcvt.s32.f32 %v695_v0  ;;  %v797_v7 = vunpack.c.1.s8 %v173_v16  ;;  %v887_v6 = vunpack.c.0.s8 %v197_v28  ;;  %v167_v29 = vld [vmem:[%s7099_s1 + $0x3e0] sm:$0xff] }
 0x1df   :  { %3320 = vmatpush.bf16.msrb.mxu2 %v2513_v52  ;;  %v2561_v33 = vpack.c.bf16 %v1961_v19, %v1955_v63  ;;  %v1661_v8 = vcvt.s32.f32 %v701_v1  ;;  %v1751_v24 = vcvt.s32.f32 %v791_v61  ;;  %v893_v39 = vunpack.c.1.s8 %v197_v28  ;;  %v257_v1 = vld [vmem:[%s7099_s1 + $0x6b0] sm:$0xff]  ;;  %v3093_v61 = vpop.f32.mrf.mxu0 }
 0x1e0   :  { %v1757_v13 = vcvt.s32.f32 %v797_v7  ;;  %v1847_v20 = vcvt.s32.f32 %v887_v6  ;;  %v983_v4 = vunpack.c.0.s8 %v221_v23  ;;  %v989_v40 = vunpack.c.1.s8 %v221_v23 }
 0x1e1   :  { %3333 = vmatpush.bf16.msrb.mxu3 %v2561_v33  ;;  %v2411_v16 = vpack.c.bf16 %v1661_v8, %v1655_v2  ;;  %v1853_v15 = vcvt.s32.f32 %v893_v39  ;;  %v3066_v21 = vadd.f32 %v6040_v10, %v3053_v5  ;;  %v683_v59 = vunpack.c.2.s8 %v143_v12 }
 0x1e2   :  { %v2459_v28 = vpack.c.bf16 %v1757_v13, %v1751_v24  ;;  %v1943_v31 = vcvt.s32.f32 %v983_v4  ;;  %v1949_v56 = vcvt.s32.f32 %v989_v40  ;;  %v689_v35 = vunpack.c.3.s8 %v143_v12 }
 0x1e3   :  { %3295 = vmatpush.bf16.msrb.mxu0 %v2411_v16  ;;  %v2507_v23 = vpack.c.bf16 %v1853_v15, %v1847_v20  ;;  %v6103_v47 = vadd.f32 %v6043_v17, %v3066_v21  ;;  %v1643_v37 = vcvt.s32.f32 %v683_v59  ;;  %v779_v10 = vunpack.c.2.s8 %v167_v29 }
 0x1e4   :  { %3308 = vmatpush.bf16.msrb.mxu1 %v2459_v28  ;;  %v2555_v9 = vpack.c.bf16 %v1949_v56, %v1943_v31  ;;  %v1649_v48 = vcvt.s32.f32 %v689_v35  ;;  %v785_v53 = vunpack.c.3.s8 %v167_v29  ;;  %v875_v27 = vunpack.c.2.s8 %v191_v30 }
 0x1e5   :  { %3321 = vmatpush.bf16.msrb.mxu2 %v2507_v23  ;;  %v1739_v42 = vcvt.s32.f32 %v779_v10  ;;  %v881_v11 = vunpack.c.3.s8 %v191_v30  ;;  %v971_v57 = vunpack.c.2.s8 %v215_v54  ;;  %v977_v44 = vunpack.c.3.s8 %v215_v54  ;;  %v3106_v23 = vpop.f32.mrf.mxu1 }
 0x1e6   :  { %3334 = vmatpush.bf16.msrb.mxu3 %v2555_v9  ;;  %v2405_v18 = vpack.c.bf16 %v1649_v48, %v1643_v37  ;;  %v1745_v49 = vcvt.s32.f32 %v785_v53  ;;  %v1835_v51 = vcvt.s32.f32 %v875_v27  ;;  %v671_v17 = vunpack.c.0.s8 %v143_v12 }
 0x1e7   :  { %v1841_v50 = vcvt.s32.f32 %v881_v11  ;;  %v1931_v55 = vcvt.s32.f32 %v971_v57  ;;  %v1937_v46 = vcvt.s32.f32 %v977_v44  ;;  %v677_v63 = vunpack.c.1.s8 %v143_v12  ;;  %v281_v12 = vld [vmem:[%s7099_s1 + $0x770] sm:$0xff] }
 0x1e8   :  { %3296 = vmatpush.bf16.msrb.mxu0 %v2405_v18  ;;  %v2453_v43 = vpack.c.bf16 %v1745_v49, %v1739_v42  ;;  %v1631_v0 = vcvt.s32.f32 %v671_v17  ;;  %v767_v52 = vunpack.c.0.s8 %v167_v29  ;;  %v773_v19 = vunpack.c.1.s8 %v167_v29  ;;  %v66_v29 = vld [vmem:[%s7099_s1 + $0xb8] sm:$0xff] }
 0x1e9   :  { %v2501_v5 = vpack.c.bf16 %v1841_v50, %v1835_v51  ;;  %v2549_v2 = vpack.c.bf16 %v1937_v46, %v1931_v55  ;;  %v1637_v7 = vcvt.s32.f32 %v677_v63  ;;  %v863_v6 = vunpack.c.0.s8 %v191_v30 }
 0x1ea   :  { %3309 = vmatpush.bf16.msrb.mxu1 %v2453_v43  ;;  %v1727_v33 = vcvt.s32.f32 %v767_v52  ;;  %v1733_v8 = vcvt.s32.f32 %v773_v19  ;;  %v869_v24 = vunpack.c.1.s8 %v191_v30  ;;  %v959_v39 = vunpack.c.0.s8 %v215_v54  ;;  %v90_v30 = vld [vmem:[%s7099_s1 + $0x178] sm:$0xff] }
 0x1eb   :  { %3322 = vmatpush.bf16.msrb.mxu2 %v2501_v5  ;;  %3335 = vmatpush.bf16.msrb.mxu3 %v2549_v2  ;;  %v2399_v13 = vpack.c.bf16 %v1637_v7, %v1631_v0  ;;  %v1823_v20 = vcvt.s32.f32 %v863_v6  ;;  %v965_v4 = vunpack.c.1.s8 %v215_v54  ;;  %v1139_v40 = vunpack.c.2.s8 %v257_v1  ;;  %v251_v5 = vld [vmem:[%s7099_s1 + $0x680] sm:$0xff] }
 0x1ec   :  { %v2447_v16 = vpack.c.bf16 %v1733_v8, %v1727_v33  ;;  %v1829_v15 = vcvt.s32.f32 %v869_v24  ;;  %v1919_v21 = vcvt.s32.f32 %v959_v39  ;;  %v1145_v59 = vunpack.c.3.s8 %v257_v1  ;;  %v275_v33 = vld [vmem:[%s7099_s1 + $0x740] sm:$0xff] }
 0x1ed   :  { %3297 = vmatpush.bf16.msrb.mxu0 %v2399_v13  ;;  %v1925_v28 = vcvt.s32.f32 %v965_v4  ;;  %v2099_v31 = vcvt.s32.f32 %v1139_v40  ;;  %v1235_v56 = vunpack.c.2.s8 %v281_v12  ;;  %v1241_v35 = vunpack.c.3.s8 %v281_v12  ;;  %v60_v13 = vld [vmem:[%s7099_s1 + $0x88] sm:$0xff] }
 0x1ee   :  { %3310 = vmatpush.bf16.msrb.mxu1 %v2447_v16  ;;  %v2495_v54 = vpack.c.bf16 %v1829_v15, %v1823_v20  ;;  %v2105_v37 = vcvt.s32.f32 %v1145_v59  ;;  %v372_v10 = vunpack.c.2.s8 %v66_v29  ;;  %v378_v9 = vunpack.c.3.s8 %v66_v29  ;;  %v84_v16 = vld [vmem:[%s7099_s1 + $0x148] sm:$0xff] }
 0x1ef   :  { %v2543_v48 = vpack.c.bf16 %v1925_v28, %v1919_v21  ;;  %v2195_v53 = vcvt.s32.f32 %v1235_v56  ;;  %v2201_v27 = vcvt.s32.f32 %v1241_v35  ;;  %v468_v42 = vunpack.c.2.s8 %v90_v30 }
 0x1f0   :  { %3323 = vmatpush.bf16.msrb.mxu2 %v2495_v54  ;;  %v2633_v11 = vpack.c.bf16 %v2105_v37, %v2099_v31  ;;  %v1332_v57 = vcvt.s32.f32 %v372_v10  ;;  %v1338_v44 = vcvt.s32.f32 %v378_v9  ;;  %v474_v18 = vunpack.c.3.s8 %v90_v30  ;;  %3298 = vmatmul.bf16.vlgmr.msrb.gmra.mxu0 %v5453_v38 }
 0x1f1   :  { %3336 = vmatpush.bf16.msrb.mxu3 %v2543_v48  ;;  %v2681_v49 = vpack.c.bf16 %v2201_v27, %v2195_v53  ;;  %v1428_v51 = vcvt.s32.f32 %v468_v42  ;;  %v1127_v17 = vunpack.c.0.s8 %v257_v1  ;;  %v1133_v50 = vunpack.c.1.s8 %v257_v1  ;;  %3311 = vmatmul.bf16.vlgmr.msrb.gmra.mxu1 %v5460_v60 }
 0x1f2   :  { %3342 = vmatpush.bf16.msra.mxu0 %v2633_v11  ;;  %v2250_v55 = vpack.c.bf16 %v1338_v44, %v1332_v57  ;;  %v1434_v46 = vcvt.s32.f32 %v474_v18  ;;  %v1223_v63 = vunpack.c.0.s8 %v281_v12  ;;  %v1229_v43 = vunpack.c.1.s8 %v281_v12 }
 0x1f3   :  { %3355 = vmatpush.bf16.msra.mxu1 %v2681_v49  ;;  %v2087_v0 = vcvt.s32.f32 %v1127_v17  ;;  %v2093_v52 = vcvt.s32.f32 %v1133_v50  ;;  %v360_v19 = vunpack.c.0.s8 %v66_v29  ;;  %v366_v61 = vunpack.c.1.s8 %v66_v29  ;;  %3324 = vmatmul.bf16.vlgmr.msrb.gmra.mxu2 %v5448_v32 }
 0x1f4   :  { %3368 = vmatpush.bf16.msra.mxu2 %v2250_v55  ;;  %v2298_v1 = vpack.c.bf16 %v1434_v46, %v1428_v51  ;;  %v2183_v2 = vcvt.s32.f32 %v1223_v63  ;;  %v2189_v7 = vcvt.s32.f32 %v1229_v43  ;;  %v456_v6 = vunpack.c.0.s8 %v90_v30  ;;  %3337 = vmatmul.bf16.vlgmr.msrb.gmra.mxu3 %v5455_v41 }
 0x1f5   :  { %v2627_v8 = vpack.c.bf16 %v2093_v52, %v2087_v0  ;;  %v1320_v24 = vcvt.s32.f32 %v360_v19  ;;  %v1326_v39 = vcvt.s32.f32 %v366_v61  ;;  %v462_v12 = vunpack.c.1.s8 %v90_v30 }
 0x1f6   :  { %3381 = vmatpush.bf16.msra.mxu3 %v2298_v1  ;;  %v2675_v20 = vpack.c.bf16 %v2189_v7, %v2183_v2  ;;  %v1416_v4 = vcvt.s32.f32 %v456_v6  ;;  %v1115_v40 = vunpack.c.2.s8 %v251_v5  ;;  %v1121_v29 = vunpack.c.3.s8 %v251_v5 }
 0x1f7   :  { %3343 = vmatpush.bf16.msra.mxu0 %v2627_v8  ;;  %v2244_v15 = vpack.c.bf16 %v1326_v39, %v1320_v24  ;;  %v1422_v21 = vcvt.s32.f32 %v462_v12  ;;  %v1211_v59 = vunpack.c.2.s8 %v275_v33  ;;  %v1217_v28 = vunpack.c.3.s8 %v275_v33  ;;  %v54_v8 = vld [vmem:[%s7099_s1 + $0x58] sm:$0xff] }
 0x1f8   :  { %3356 = vmatpush.bf16.msra.mxu1 %v2675_v20  ;;  %v2075_v30 = vcvt.s32.f32 %v1115_v40  ;;  %v2081_v31 = vcvt.s32.f32 %v1121_v29  ;;  %v348_v56 = vunpack.c.2.s8 %v60_v13  ;;  %v354_v35 = vunpack.c.3.s8 %v60_v13  ;;  %v78_v40 = vld [vmem:[%s7099_s1 + $0x118] sm:$0xff] }
 0x1f9   :  { %3369 = vmatpush.bf16.msra.mxu2 %v2244_v15  ;;  %v2292_v23 = vpack.c.bf16 %v1422_v21, %v1416_v4  ;;  %v2171_v54 = vcvt.s32.f32 %v1211_v59  ;;  %v2177_v37 = vcvt.s32.f32 %v1217_v28  ;;  %v444_v10 = vunpack.c.2.s8 %v84_v16 }
 0x1fa   :  { %v2621_v9 = vpack.c.bf16 %v2081_v31, %v2075_v30  ;;  %v1308_v48 = vcvt.s32.f32 %v348_v56  ;;  %v1314_v53 = vcvt.s32.f32 %v354_v35  ;;  %v450_v27 = vunpack.c.3.s8 %v84_v16 }
 0x1fb   :  { %3382 = vmatpush.bf16.msra.mxu3 %v2292_v23  ;;  %v2669_v42 = vpack.c.bf16 %v2177_v37, %v2171_v54  ;;  %v1404_v11 = vcvt.s32.f32 %v444_v10  ;;  %v3092_v57 = vadd.f32 %v6093_v14, %v6103_v47  ;;  %v1103_v44 = vunpack.c.0.s8 %v251_v5  ;;  %v245_v47 = vld [vmem:[%s7099_s1 + $0x650] sm:$0xff]  ;;  %v6152_v23 = vpop.f32.mrf.mxu2  ;;  %v6154_v54 = vpop.f32.mrf.mxu3 }
 0x1fc   :  { %3344 = vmatpush.bf16.msra.mxu0 %v2621_v9  ;;  %v2238_v18 = vpack.c.bf16 %v1314_v53, %v1308_v48  ;;  %v1410_v49 = vcvt.s32.f32 %v450_v27  ;;  %v1109_v51 = vunpack.c.1.s8 %v251_v5  ;;  %v1199_v17 = vunpack.c.0.s8 %v275_v33  ;;  %v269_v5 = vld [vmem:[%s7099_s1 + $0x710] sm:$0xff] }
 0x1fd   :  { %3357 = vmatpush.bf16.msra.mxu1 %v2669_v42  ;;  %v2063_v50 = vcvt.s32.f32 %v1103_v44  ;;  %v1205_v55 = vunpack.c.1.s8 %v275_v33  ;;  %v336_v46 = vunpack.c.0.s8 %v60_v13  ;;  %v342_v63 = vunpack.c.1.s8 %v60_v13 }
 0x1fe   :  { %3370 = vmatpush.bf16.msra.mxu2 %v2238_v18  ;;  %v2286_v43 = vpack.c.bf16 %v1410_v49, %v1404_v11  ;;  %v2069_v0 = vcvt.s32.f32 %v1109_v51  ;;  %v2159_v52 = vcvt.s32.f32 %v1199_v17  ;;  %v432_v19 = vunpack.c.0.s8 %v84_v16  ;;  %v239_v51 = vld [vmem:[%s7099_s1 + $0x620] sm:$0xff] }
 0x1ff   :  { %v2165_v61 = vcvt.s32.f32 %v1205_v55  ;;  %v1296_v1 = vcvt.s32.f32 %v336_v46  ;;  %v1302_v2 = vcvt.s32.f32 %v342_v63  ;;  %v438_v14 = vunpack.c.1.s8 %v84_v16  ;;  %v263_v63 = vld [vmem:[%s7099_s1 + $0x6e0] sm:$0xff] }
 0x200   :  { %3383 = vmatpush.bf16.msra.mxu3 %v2286_v43  ;;  %v2615_v7 = vpack.c.bf16 %v2069_v0, %v2063_v50  ;;  %v1392_v6 = vcvt.s32.f32 %v432_v19  ;;  %v6144_v33 = vadd.f32 %v6105_v45, %v3092_v57  ;;  %v1091_v13 = vunpack.c.2.s8 %v245_v47 }
 0x201   :  { %v2663_v24 = vpack.c.bf16 %v2165_v61, %v2159_v52  ;;  %v2232_v39 = vpack.c.bf16 %v1302_v2, %v1296_v1  ;;  %v1398_v12 = vcvt.s32.f32 %v438_v14  ;;  %v1097_v20 = vunpack.c.3.s8 %v245_v47 }
 0x202   :  { %3345 = vmatpush.bf16.msra.mxu0 %v2615_v7  ;;  %v1187_v4 = vunpack.c.2.s8 %v269_v5  ;;  %v1193_v45 = vunpack.c.3.s8 %v269_v5  ;;  %v324_v16 = vunpack.c.2.s8 %v54_v8  ;;  %v330_v15 = vunpack.c.3.s8 %v54_v8 }
 0x203   :  { %3358 = vmatpush.bf16.msra.mxu1 %v2663_v24  ;;  %3371 = vmatpush.bf16.msra.mxu2 %v2232_v39  ;;  %v2280_v29 = vpack.c.bf16 %v1398_v12, %v1392_v6  ;;  %v2051_v21 = vcvt.s32.f32 %v1091_v13  ;;  %v2057_v59 = vcvt.s32.f32 %v1097_v20  ;;  %v420_v35 = vunpack.c.2.s8 %v78_v40  ;;  %v72_v24 = vld [vmem:[%s7099_s1 + $0xe8] sm:$0xff]  ;;  %v3119_v39 = vpop.f32.mrf.mxu2  ;;  %v3132_v12 = vpop.f32.mrf.mxu3 }
 0x204   :  { %v2147_v28 = vcvt.s32.f32 %v1187_v4  ;;  %v2153_v30 = vcvt.s32.f32 %v1193_v45  ;;  %v1284_v31 = vcvt.s32.f32 %v324_v16  ;;  %v1290_v56 = vcvt.s32.f32 %v330_v15 }
 0x205   :  { %3384 = vmatpush.bf16.msra.mxu3 %v2280_v29  ;;  %v2609_v37 = vpack.c.bf16 %v2057_v59, %v2051_v21  ;;  %v426_v10 = vunpack.c.3.s8 %v78_v40  ;;  %v1380_v53 = vcvt.s32.f32 %v420_v35  ;;  %v1079_v27 = vunpack.c.0.s8 %v245_v47 }
 0x206   :  { %v2657_v9 = vpack.c.bf16 %v2153_v30, %v2147_v28  ;;  %v2226_v48 = vpack.c.bf16 %v1290_v56, %v1284_v31  ;;  %v1085_v11 = vunpack.c.1.s8 %v245_v47  ;;  %v1175_v57 = vunpack.c.0.s8 %v269_v5  ;;  %v48_v47 = vld [vmem:[%s7099_s1 + $0x28] sm:$0xff] }
 0x207   :  { %3346 = vmatpush.bf16.msra.mxu0 %v2609_v37  ;;  %v1386_v42 = vcvt.s32.f32 %v426_v10  ;;  %v2039_v44 = vcvt.s32.f32 %v1079_v27  ;;  %v1181_v18 = vunpack.c.1.s8 %v269_v5  ;;  %v312_v49 = vunpack.c.0.s8 %v54_v8 }
 0x208   :  { %3359 = vmatpush.bf16.msra.mxu1 %v2657_v9  ;;  %3372 = vmatpush.bf16.msra.mxu2 %v2226_v48  ;;  %v2045_v50 = vcvt.s32.f32 %v1085_v11  ;;  %v2135_v55 = vcvt.s32.f32 %v1175_v57  ;;  %v318_v46 = vunpack.c.1.s8 %v54_v8  ;;  %v408_v52 = vunpack.c.0.s8 %v78_v40 }
 0x209   :  { %v2274_v17 = vpack.c.bf16 %v1386_v42, %v1380_v53  ;;  %v2141_v43 = vcvt.s32.f32 %v1181_v18  ;;  %v1272_v0 = vcvt.s32.f32 %v312_v49  ;;  %v414_v19 = vunpack.c.1.s8 %v78_v40 }
 0x20a   :  { %v2603_v61 = vpack.c.bf16 %v2045_v50, %v2039_v44  ;;  %v1278_v1 = vcvt.s32.f32 %v318_v46  ;;  %v1067_v2 = vunpack.c.2.s8 %v239_v51  ;;  %v1073_v14 = vunpack.c.3.s8 %v239_v51  ;;  %v114_v44 = vld [vmem:[%s7099_s1 + $0x238] sm:$0xff]  ;;  %v6178_v46 = vpop.f32.mrf.mxu1 }
 0x20b   :  { %3385 = vmatpush.bf16.msra.mxu3 %v2274_v17  ;;  %v2651_v5 = vpack.c.bf16 %v2141_v43, %v2135_v55  ;;  %v1368_v7 = vcvt.s32.f32 %v408_v52  ;;  %v1374_v6 = vcvt.s32.f32 %v414_v19  ;;  %v1163_v8 = vunpack.c.2.s8 %v263_v63  ;;  %v6176_v55 = vpop.f32.mrf.mxu0 }
 0x20c   :  { %3347 = vmatpush.bf16.msra.mxu0 %v2603_v61  ;;  %v2220_v13 = vpack.c.bf16 %v1278_v1, %v1272_v0  ;;  %v2027_v20 = vcvt.s32.f32 %v1067_v2  ;;  %v2033_v4 = vcvt.s32.f32 %v1073_v14  ;;  %v1169_v40 = vunpack.c.3.s8 %v263_v63  ;;  %v162_v14 = vld [vmem:[%s7099_s1 + $0x3b8] sm:$0xff] }
 0x20d   :  { %3360 = vmatpush.bf16.msra.mxu1 %v2651_v5  ;;  %v2268_v29 = vpack.c.bf16 %v1374_v6, %v1368_v7  ;;  %v2123_v45 = vcvt.s32.f32 %v1163_v8  ;;  %v300_v16 = vunpack.c.2.s8 %v48_v47  ;;  %v306_v15 = vunpack.c.3.s8 %v48_v47  ;;  %v186_v8 = vld [vmem:[%s7099_s1 + $0x478] sm:$0xff] }
 0x20e   :  { %3373 = vmatpush.bf16.msra.mxu2 %v2220_v13  ;;  %v2597_v21 = vpack.c.bf16 %v2033_v4, %v2027_v20  ;;  %v2129_v59 = vcvt.s32.f32 %v1169_v40  ;;  %v396_v28 = vunpack.c.2.s8 %v72_v24  ;;  %v402_v30 = vunpack.c.3.s8 %v72_v24 }
 0x20f   :  { %3386 = vmatpush.bf16.msra.mxu3 %v2268_v29  ;;  %v1260_v31 = vcvt.s32.f32 %v300_v16  ;;  %v1266_v56 = vcvt.s32.f32 %v306_v15  ;;  %v1055_v35 = vunpack.c.0.s8 %v239_v51  ;;  %v1061_v37 = vunpack.c.1.s8 %v239_v51  ;;  %v6174_v51 = vld [vmem:[%s7099_s1 + $0x2f8] sm:$0xff] }
 0x210   :  { %3348 = vmatpush.bf16.msra.mxu0 %v2597_v21  ;;  %v2645_v10 = vpack.c.bf16 %v2129_v59, %v2123_v45  ;;  %v1356_v9 = vcvt.s32.f32 %v396_v28  ;;  %v1362_v48 = vcvt.s32.f32 %v402_v30  ;;  %v1151_v53 = vunpack.c.0.s8 %v263_v63  ;;  %v6189_v59 = vpop.f32.mrf.mxu2  ;;  %v6191_v28 = vpop.f32.mrf.mxu3 }
 0x211   :  { %v2214_v27 = vpack.c.bf16 %v1266_v56, %v1260_v31  ;;  %v2015_v42 = vcvt.s32.f32 %v1055_v35  ;;  %v2021_v11 = vcvt.s32.f32 %v1061_v37  ;;  %v1157_v57 = vunpack.c.1.s8 %v263_v63 }
 0x212   :  { %3361 = vmatpush.bf16.msra.mxu1 %v2645_v10  ;;  %v2262_v18 = vpack.c.bf16 %v1362_v48, %v1356_v9  ;;  %v2111_v49 = vcvt.s32.f32 %v1151_v53  ;;  %v288_v17 = vunpack.c.0.s8 %v48_v47  ;;  %v294_v50 = vunpack.c.1.s8 %v48_v47 }
 0x213   :  { %3374 = vmatpush.bf16.msra.mxu2 %v2214_v27  ;;  %v2591_v63 = vpack.c.bf16 %v2021_v11, %v2015_v42  ;;  %v2117_v43 = vcvt.s32.f32 %v1157_v57  ;;  %v384_v0 = vunpack.c.0.s8 %v72_v24  ;;  %v390_v52 = vunpack.c.1.s8 %v72_v24  ;;  %v3145_v53 = vpop.f32.mrf.mxu0  ;;  %v3158_v27 = vpop.f32.mrf.mxu1 }
 0x214   :  { %3387 = vmatpush.bf16.msra.mxu3 %v2262_v18  ;;  %v1248_v19 = vcvt.s32.f32 %v288_v17  ;;  %v1254_v61 = vcvt.s32.f32 %v294_v50  ;;  %v564_v1 = vunpack.c.2.s8 %v114_v44  ;;  %v570_v2 = vunpack.c.3.s8 %v114_v44 }
 0x215   :  { %3349 = vmatpush.bf16.msra.mxu0 %v2591_v63  ;;  %v2639_v47 = vpack.c.bf16 %v2117_v43, %v2111_v49  ;;  %v1344_v5 = vcvt.s32.f32 %v384_v0  ;;  %v1350_v7 = vcvt.s32.f32 %v390_v52  ;;  %v660_v6 = vunpack.c.2.s8 %v6174_v51  ;;  %v108_v49 = vld [vmem:[%s7099_s1 + $0x208] sm:$0xff] }
 0x216   :  { %v2208_v24 = vpack.c.bf16 %v1254_v61, %v1248_v19  ;;  %v1524_v39 = vcvt.s32.f32 %v564_v1  ;;  %v1530_v12 = vcvt.s32.f32 %v570_v2  ;;  %v666_v13 = vunpack.c.3.s8 %v6174_v51 }
 0x217   :  { %3362 = vmatpush.bf16.msra.mxu1 %v2639_v47  ;;  %v2256_v20 = vpack.c.bf16 %v1350_v7, %v1344_v5  ;;  %v1620_v4 = vcvt.s32.f32 %v660_v6  ;;  %v756_v40 = vunpack.c.2.s8 %v162_v14  ;;  %v762_v29 = vunpack.c.3.s8 %v162_v14  ;;  %v180_v6 = vld [vmem:[%s7099_s1 + $0x448] sm:$0xff] }
 0x218   :  { %3375 = vmatpush.bf16.msra.mxu2 %v2208_v24  ;;  %v2346_v45 = vpack.c.bf16 %v1530_v12, %v1524_v39  ;;  %v1626_v16 = vcvt.s32.f32 %v666_v13  ;;  %v852_v15 = vunpack.c.2.s8 %v186_v8  ;;  %v858_v21 = vunpack.c.3.s8 %v186_v8  ;;  %3350 = vmatmul.bf16.vlgmr.msra.gmra.mxu0 %v5506_v22 }
 0x219   :  { %3388 = vmatpush.bf16.msra.mxu3 %v2256_v20  ;;  %v1716_v30 = vcvt.s32.f32 %v756_v40  ;;  %v1722_v31 = vcvt.s32.f32 %v762_v29  ;;  %v552_v56 = vunpack.c.0.s8 %v114_v44  ;;  %v558_v35 = vunpack.c.1.s8 %v114_v44 }
 0x21a   :  { %3394 = vmatpush.bf16.msrb.mxu0 %v2346_v45  ;;  %v2394_v37 = vpack.c.bf16 %v1626_v16, %v1620_v4  ;;  %v1812_v10 = vcvt.s32.f32 %v852_v15  ;;  %v1818_v9 = vcvt.s32.f32 %v858_v21  ;;  %3363 = vmatmul.bf16.vlgmr.msra.gmra.mxu1 %v5511_v26  ;;  %v648_v48 = vunpack.c.0.s8 %v6174_v51 }
 0x21b   :  { %v2442_v42 = vpack.c.bf16 %v1722_v31, %v1716_v30  ;;  %v1512_v11 = vcvt.s32.f32 %v552_v56  ;;  %v1518_v57 = vcvt.s32.f32 %v558_v35  ;;  %v654_v18 = vunpack.c.1.s8 %v6174_v51  ;;  %3376 = vmatmul.bf16.vlgmr.msra.gmra.mxu2 %v5406_v58  ;;  %v132_v51 = vld [vmem:[%s7099_s1 + $0x2c8] sm:$0xff] }
 0x21c   :  { %3407 = vmatpush.bf16.msrb.mxu1 %v2394_v37  ;;  %v2490_v44 = vpack.c.bf16 %v1818_v9, %v1812_v10  ;;  %v1608_v17 = vcvt.s32.f32 %v648_v48  ;;  %v744_v50 = vunpack.c.0.s8 %v162_v14  ;;  %v750_v63 = vunpack.c.1.s8 %v162_v14  ;;  %3389 = vmatmul.bf16.vlgmr.msra.gmra.mxu3 %v5417_v3  ;;  %v156_v3 = vld [vmem:[%s7099_s1 + $0x388] sm:$0xff] }
 0x21d   :  { %3420 = vmatpush.bf16.msrb.mxu2 %v2442_v42  ;;  %v2340_v43 = vpack.c.bf16 %v1518_v57, %v1512_v11  ;;  %v1614_v0 = vcvt.s32.f32 %v654_v18  ;;  %v840_v52 = vunpack.c.0.s8 %v186_v8  ;;  %v846_v19 = vunpack.c.1.s8 %v186_v8  ;;  %v102_v11 = vld [vmem:[%s7099_s1 + $0x1d8] sm:$0xff] }
 0x21e   :  { %3433 = vmatpush.bf16.msrb.mxu3 %v2490_v44  ;;  %v1704_v61 = vcvt.s32.f32 %v744_v50  ;;  %v1710_v1 = vcvt.s32.f32 %v750_v63  ;;  %v6206_v58 = vadd.f32 %v6154_v54, %v6152_v23  ;;  %v540_v2 = vunpack.c.2.s8 %v108_v49  ;;  %v3171_v23 = vpop.f32.mrf.mxu2  ;;  %v3184_v54 = vpop.f32.mrf.mxu3 }
 0x21f   :  { %3395 = vmatpush.bf16.msrb.mxu0 %v2340_v43  ;;  %v2388_v14 = vpack.c.bf16 %v1614_v0, %v1608_v17  ;;  %v1800_v47 = vcvt.s32.f32 %v840_v52  ;;  %v1806_v5 = vcvt.s32.f32 %v846_v19  ;;  %v546_v7 = vunpack.c.3.s8 %v108_v49 }
 0x220   :  { %v2436_v8 = vpack.c.bf16 %v1710_v1, %v1704_v61  ;;  %v1500_v24 = vcvt.s32.f32 %v540_v2  ;;  %v636_v39 = vunpack.c.2.s8 %v132_v51  ;;  %v642_v12 = vunpack.c.3.s8 %v132_v51  ;;  %v150_v1 = vld [vmem:[%s7099_s1 + $0x358] sm:$0xff] }
 0x221   :  { %3408 = vmatpush.bf16.msrb.mxu1 %v2388_v14  ;;  %v2484_v13 = vpack.c.bf16 %v1806_v5, %v1800_v47  ;;  %v1506_v20 = vcvt.s32.f32 %v546_v7  ;;  %v732_v4 = vunpack.c.2.s8 %v156_v3  ;;  %v738_v40 = vunpack.c.3.s8 %v156_v3  ;;  %v174_v5 = vld [vmem:[%s7099_s1 + $0x418] sm:$0xff] }
 0x222   :  { %3421 = vmatpush.bf16.msrb.mxu2 %v2436_v8  ;;  %v1596_v29 = vcvt.s32.f32 %v636_v39  ;;  %v1602_v45 = vcvt.s32.f32 %v642_v12  ;;  %v828_v16 = vunpack.c.2.s8 %v180_v6  ;;  %v834_v15 = vunpack.c.3.s8 %v180_v6 }
 0x223   :  { %3434 = vmatpush.bf16.msrb.mxu3 %v2484_v13  ;;  %v2334_v21 = vpack.c.bf16 %v1506_v20, %v1500_v24  ;;  %v1692_v30 = vcvt.s32.f32 %v732_v4  ;;  %v1698_v31 = vcvt.s32.f32 %v738_v40  ;;  %v528_v56 = vunpack.c.0.s8 %v108_v49 }
 0x224   :  { %v2382_v35 = vpack.c.bf16 %v1602_v45, %v1596_v29  ;;  %v1788_v37 = vcvt.s32.f32 %v828_v16  ;;  %v1794_v10 = vcvt.s32.f32 %v834_v15  ;;  %v534_v9 = vunpack.c.1.s8 %v108_v49  ;;  %v126_v49 = vld [vmem:[%s7099_s1 + $0x298] sm:$0xff] }
 0x225   :  { %3396 = vmatpush.bf16.msrb.mxu0 %v2334_v21  ;;  %v2430_v48 = vpack.c.bf16 %v1698_v31, %v1692_v30  ;;  %v1488_v53 = vcvt.s32.f32 %v528_v56  ;;  %v624_v27 = vunpack.c.0.s8 %v132_v51  ;;  %v630_v42 = vunpack.c.1.s8 %v132_v51 }
 0x226   :  { %3409 = vmatpush.bf16.msrb.mxu1 %v2382_v35  ;;  %v2478_v57 = vpack.c.bf16 %v1794_v10, %v1788_v37  ;;  %v1494_v18 = vcvt.s32.f32 %v534_v9  ;;  %v720_v44 = vunpack.c.0.s8 %v156_v3  ;;  %v726_v17 = vunpack.c.1.s8 %v156_v3 }
 0x227   :  { %3422 = vmatpush.bf16.msrb.mxu2 %v2430_v48  ;;  %v1584_v50 = vcvt.s32.f32 %v624_v27  ;;  %v1590_v63 = vcvt.s32.f32 %v630_v42  ;;  %v816_v43 = vunpack.c.0.s8 %v180_v6  ;;  %v822_v0 = vunpack.c.1.s8 %v180_v6 }
 0x228   :  { %3435 = vmatpush.bf16.msrb.mxu3 %v2478_v57  ;;  %v2328_v52 = vpack.c.bf16 %v1494_v18, %v1488_v53  ;;  %v1680_v19 = vcvt.s32.f32 %v720_v44  ;;  %v1686_v51 = vcvt.s32.f32 %v726_v17  ;;  %v516_v61 = vunpack.c.2.s8 %v102_v11  ;;  %v96_v57 = vld [vmem:[%s7099_s1 + $0x1a8] sm:$0xff]  ;;  %v6232_v17 = vpop.f32.mrf.mxu0 }
 0x229   :  { %v2376_v2 = vpack.c.bf16 %v1590_v63, %v1584_v50  ;;  %v1776_v3 = vcvt.s32.f32 %v816_v43  ;;  %v1782_v14 = vcvt.s32.f32 %v822_v0  ;;  %v522_v47 = vunpack.c.3.s8 %v102_v11  ;;  %v120_v43 = vld [vmem:[%s7099_s1 + $0x268] sm:$0xff] }
 0x22a   :  { %3397 = vmatpush.bf16.msrb.mxu0 %v2328_v52  ;;  %v2424_v7 = vpack.c.bf16 %v1686_v51, %v1680_v19  ;;  %v1476_v6 = vcvt.s32.f32 %v516_v61  ;;  %v612_v8 = vunpack.c.2.s8 %v126_v49  ;;  %v618_v24 = vunpack.c.3.s8 %v126_v49  ;;  %v144_v51 = vld [vmem:[%s7099_s1 + $0x328] sm:$0xff] }
 0x22b   :  { %3410 = vmatpush.bf16.msrb.mxu1 %v2376_v2  ;;  %v2472_v39 = vpack.c.bf16 %v1782_v14, %v1776_v3  ;;  %v1482_v12 = vcvt.s32.f32 %v522_v47  ;;  %v708_v23 = vunpack.c.2.s8 %v150_v1  ;;  %v714_v54 = vunpack.c.3.s8 %v150_v1 }
 0x22c   :  { %3423 = vmatpush.bf16.msrb.mxu2 %v2424_v7  ;;  %v1572_v13 = vcvt.s32.f32 %v612_v8  ;;  %v1578_v20 = vcvt.s32.f32 %v618_v24  ;;  %v804_v4 = vunpack.c.2.s8 %v174_v5  ;;  %v810_v40 = vunpack.c.3.s8 %v174_v5 }
 0x22d   :  { %3436 = vmatpush.bf16.msrb.mxu3 %v2472_v39  ;;  %v2322_v29 = vpack.c.bf16 %v1482_v12, %v1476_v6  ;;  %v1668_v45 = vcvt.s32.f32 %v708_v23  ;;  %v1674_v16 = vcvt.s32.f32 %v714_v54  ;;  %v3144_v15 = vadd.f32 %v6176_v55, %v6206_v58 }
 0x22e   :  { %v2370_v21 = vpack.c.bf16 %v1578_v20, %v1572_v13  ;;  %v1764_v30 = vcvt.s32.f32 %v804_v4  ;;  %v1770_v31 = vcvt.s32.f32 %v810_v40  ;;  %v504_v56 = vunpack.c.0.s8 %v102_v11  ;;  %v6247_v13 = vpop.f32.mrf.mxu1 }
 0x22f   :  { %3398 = vmatpush.bf16.msrb.mxu0 %v2322_v29  ;;  %v2418_v35 = vpack.c.bf16 %v1674_v16, %v1668_v45  ;;  %v3157_v37 = vadd.f32 %v6178_v46, %v3144_v15  ;;  %v510_v10 = vunpack.c.1.s8 %v102_v11  ;;  %v600_v9 = vunpack.c.0.s8 %v126_v49 }
 0x230   :  { %3411 = vmatpush.bf16.msrb.mxu1 %v2370_v21  ;;  %v2466_v48 = vpack.c.bf16 %v1770_v31, %v1764_v30  ;;  %v1464_v53 = vcvt.s32.f32 %v504_v56  ;;  %v606_v27 = vunpack.c.1.s8 %v126_v49  ;;  %v696_v42 = vunpack.c.0.s8 %v150_v1  ;;  %v3197_v30 = vpop.f32.mrf.mxu0 }
 0x231   :  { %3424 = vmatpush.bf16.msrb.mxu2 %v2418_v35  ;;  %v1470_v55 = vcvt.s32.f32 %v510_v10  ;;  %v1560_v58 = vcvt.s32.f32 %v600_v9  ;;  %v702_v18 = vunpack.c.1.s8 %v150_v1  ;;  %v792_v44 = vunpack.c.0.s8 %v174_v5  ;;  %v6252_v10 = vld [vmem:[%s7099_s1 + $0x538] sm:$0xff] }
 0x232   :  { %3437 = vmatpush.bf16.msrb.mxu3 %v2466_v48  ;;  %v1566_v46 = vcvt.s32.f32 %v606_v27  ;;  %v1656_v11 = vcvt.s32.f32 %v696_v42  ;;  %v798_v50 = vunpack.c.1.s8 %v174_v5  ;;  %v3170_v63 = vadd.f32 %v6189_v59, %v3157_v37  ;;  %v168_v59 = vld [vmem:[%s7099_s1 + $0x3e8] sm:$0xff] }
 0x233   :  { %v2316_v0 = vpack.c.bf16 %v1470_v55, %v1464_v53  ;;  %v1662_v49 = vcvt.s32.f32 %v702_v18  ;;  %v1752_v52 = vcvt.s32.f32 %v792_v44  ;;  %v492_v19 = vunpack.c.2.s8 %v96_v57  ;;  %v234_v18 = vld [vmem:[%s7099_s1 + $0x5f8] sm:$0xff]  ;;  %v6257_v44 = vpop.f32.mrf.mxu2 }
 0x234   :  { %v2364_v61 = vpack.c.bf16 %v1566_v46, %v1560_v58  ;;  %v1758_v1 = vcvt.s32.f32 %v798_v50  ;;  %v6242_v2 = vadd.f32 %v6191_v28, %v3170_v63  ;;  %v498_v3 = vunpack.c.3.s8 %v96_v57  ;;  %v6259_v46 = vpop.f32.mrf.mxu3 }
 0x235   :  { %3399 = vmatpush.bf16.msrb.mxu0 %v2316_v0  ;;  %v2412_v14 = vpack.c.bf16 %v1662_v49, %v1656_v11  ;;  %v1452_v47 = vcvt.s32.f32 %v492_v19  ;;  %v588_v5 = vunpack.c.2.s8 %v120_v43  ;;  %v594_v7 = vunpack.c.3.s8 %v120_v43  ;;  %v258_v0 = vld [vmem:[%s7099_s1 + $0x6b8] sm:$0xff] }
 0x236   :  { %3412 = vmatpush.bf16.msrb.mxu1 %v2364_v61  ;;  %v2460_v6 = vpack.c.bf16 %v1758_v1, %v1752_v52  ;;  %v1458_v8 = vcvt.s32.f32 %v498_v3  ;;  %v684_v24 = vunpack.c.2.s8 %v144_v51  ;;  %v690_v39 = vunpack.c.3.s8 %v144_v51  ;;  %v282_v61 = vld [vmem:[%s7099_s1 + $0x778] sm:$0xff] }
 0x237   :  { %3425 = vmatpush.bf16.msrb.mxu2 %v2412_v14  ;;  %v1548_v12 = vcvt.s32.f32 %v588_v5  ;;  %v1554_v23 = vcvt.s32.f32 %v594_v7  ;;  %v780_v28 = vunpack.c.2.s8 %v168_v59  ;;  %v786_v54 = vunpack.c.3.s8 %v168_v59 }
 0x238   :  { %3438 = vmatpush.bf16.msrb.mxu3 %v2460_v6  ;;  %v2310_v20 = vpack.c.bf16 %v1458_v8, %v1452_v47  ;;  %v1644_v4 = vcvt.s32.f32 %v684_v24  ;;  %v1650_v40 = vcvt.s32.f32 %v690_v39  ;;  %v480_v29 = vunpack.c.0.s8 %v96_v57  ;;  %v3210_v47 = vpop.f32.mrf.mxu1 }
 0x239   :  { %v2358_v45 = vpack.c.bf16 %v1554_v23, %v1548_v12  ;;  %v1740_v16 = vcvt.s32.f32 %v780_v28  ;;  %v1746_v15 = vcvt.s32.f32 %v786_v54  ;;  %v486_v21 = vunpack.c.1.s8 %v96_v57 }
 0x23a   :  { %3400 = vmatpush.bf16.msrb.mxu0 %v2310_v20  ;;  %v2406_v31 = vpack.c.bf16 %v1650_v40, %v1644_v4  ;;  %v1440_v56 = vcvt.s32.f32 %v480_v29  ;;  %v576_v35 = vunpack.c.0.s8 %v120_v43  ;;  %v582_v37 = vunpack.c.1.s8 %v120_v43 }
 0x23b   :  { %3413 = vmatpush.bf16.msrb.mxu1 %v2358_v45  ;;  %v2454_v9 = vpack.c.bf16 %v1746_v15, %v1740_v16  ;;  %v1446_v48 = vcvt.s32.f32 %v486_v21  ;;  %v672_v53 = vunpack.c.0.s8 %v144_v51  ;;  %v678_v27 = vunpack.c.1.s8 %v144_v51 }
 0x23c   :  { %3426 = vmatpush.bf16.msrb.mxu2 %v2406_v31  ;;  %v1536_v42 = vcvt.s32.f32 %v576_v35  ;;  %v1542_v55 = vcvt.s32.f32 %v582_v37  ;;  %v768_v57 = vunpack.c.0.s8 %v168_v59  ;;  %v774_v58 = vunpack.c.1.s8 %v168_v59  ;;  %v3223_v35 = vpop.f32.mrf.mxu2 }
 0x23d   :  { %3439 = vmatpush.bf16.msrb.mxu3 %v2454_v9  ;;  %v2304_v11 = vpack.c.bf16 %v1446_v48, %v1440_v56  ;;  %v1632_v50 = vcvt.s32.f32 %v672_v53  ;;  %v1638_v63 = vcvt.s32.f32 %v678_v27  ;;  %v948_v43 = vunpack.c.2.s8 %v6252_v10  ;;  %v204_v56 = vld [vmem:[%s7099_s1 + $0x508] sm:$0xff] }
 0x23e   :  { %v2352_v49 = vpack.c.bf16 %v1542_v55, %v1536_v42  ;;  %v1728_v52 = vcvt.s32.f32 %v768_v57  ;;  %v1734_v19 = vcvt.s32.f32 %v774_v58  ;;  %v954_v51 = vunpack.c.3.s8 %v6252_v10 }
 0x23f   :  { %3401 = vmatpush.bf16.msrb.mxu0 %v2304_v11  ;;  %v2400_v1 = vpack.c.bf16 %v1638_v63, %v1632_v50  ;;  %v1908_v3 = vcvt.s32.f32 %v948_v43  ;;  %v1044_v59 = vunpack.c.2.s8 %v234_v18  ;;  %v1050_v14 = vunpack.c.3.s8 %v234_v18  ;;  %v252_v11 = vld [vmem:[%s7099_s1 + $0x688] sm:$0xff] }
 0x240   :  { %3414 = vmatpush.bf16.msrb.mxu1 %v2352_v49  ;;  %v2448_v5 = vpack.c.bf16 %v1734_v19, %v1728_v52  ;;  %v1914_v7 = vcvt.s32.f32 %v954_v51  ;;  %v1140_v6 = vunpack.c.2.s8 %v258_v0  ;;  %v1146_v8 = vunpack.c.3.s8 %v258_v0 }
 0x241   :  { %3427 = vmatpush.bf16.msrb.mxu2 %v2400_v1  ;;  %v2004_v24 = vcvt.s32.f32 %v1044_v59  ;;  %v2010_v39 = vcvt.s32.f32 %v1050_v14  ;;  %v1236_v12 = vunpack.c.2.s8 %v282_v61  ;;  %v1242_v23 = vunpack.c.3.s8 %v282_v61 }
 0x242   :  { %3440 = vmatpush.bf16.msrb.mxu3 %v2448_v5  ;;  %v2538_v28 = vpack.c.bf16 %v1914_v7, %v1908_v3  ;;  %v2100_v54 = vcvt.s32.f32 %v1140_v6  ;;  %v2106_v20 = vcvt.s32.f32 %v1146_v8  ;;  %v936_v4 = vunpack.c.0.s8 %v6252_v10  ;;  %3402 = vmatmul.bf16.vlgmr.msrb.gmra.mxu0 %v5394_v34  ;;  %v3236_v34 = vpop.f32.mrf.mxu3 }
 0x243   :  { %v2586_v40 = vpack.c.bf16 %v2010_v39, %v2004_v24  ;;  %v2196_v29 = vcvt.s32.f32 %v1236_v12  ;;  %v2202_v45 = vcvt.s32.f32 %v1242_v23  ;;  %v942_v16 = vunpack.c.1.s8 %v6252_v10  ;;  %3415 = vmatmul.bf16.vlgmr.msrb.gmra.mxu1 %v5411_v62 }
 0x244   :  { %3446 = vmatpush.bf16.msra.mxu0 %v2538_v28  ;;  %v2634_v15 = vpack.c.bf16 %v2106_v20, %v2100_v54  ;;  %v1896_v21 = vcvt.s32.f32 %v936_v4  ;;  %v1032_v30 = vunpack.c.0.s8 %v234_v18  ;;  %v1038_v31 = vunpack.c.1.s8 %v234_v18  ;;  %3428 = vmatmul.bf16.vlgmr.msrb.gmra.mxu2 %v5453_v38  ;;  %v228_v38 = vld [vmem:[%s7099_s1 + $0x5c8] sm:$0xff] }
 0x245   :  { %3459 = vmatpush.bf16.msra.mxu1 %v2586_v40  ;;  %v2682_v37 = vpack.c.bf16 %v2202_v45, %v2196_v29  ;;  %v1902_v9 = vcvt.s32.f32 %v942_v16  ;;  %v1128_v48 = vunpack.c.0.s8 %v258_v0  ;;  %v1134_v10 = vunpack.c.1.s8 %v258_v0  ;;  %3441 = vmatmul.bf16.vlgmr.msrb.gmra.mxu3 %v5460_v60  ;;  %v276_v0 = vld [vmem:[%s7099_s1 + $0x748] sm:$0xff] }
 0x246   :  { %3472 = vmatpush.bf16.msra.mxu2 %v2634_v15  ;;  %v1992_v62 = vcvt.s32.f32 %v1032_v30  ;;  %v1998_v53 = vcvt.s32.f32 %v1038_v31  ;;  %v1224_v27 = vunpack.c.0.s8 %v282_v61  ;;  %v1230_v42 = vunpack.c.1.s8 %v282_v61  ;;  %v198_v30 = vld [vmem:[%s7099_s1 + $0x4d8] sm:$0xff] }
 0x247   :  { %3485 = vmatpush.bf16.msra.mxu3 %v2682_v37  ;;  %v2532_v55 = vpack.c.bf16 %v1902_v9, %v1896_v21  ;;  %v2088_v57 = vcvt.s32.f32 %v1128_v48  ;;  %v2094_v58 = vcvt.s32.f32 %v1134_v10  ;;  %v924_v18 = vunpack.c.2.s8 %v204_v56  ;;  %v246_v10 = vld [vmem:[%s7099_s1 + $0x658] sm:$0xff] }
 0x248   :  { %v2580_v50 = vpack.c.bf16 %v1998_v53, %v1992_v62  ;;  %v2184_v60 = vcvt.s32.f32 %v1224_v27  ;;  %v2190_v63 = vcvt.s32.f32 %v1230_v42  ;;  %v930_v43 = vunpack.c.3.s8 %v204_v56 }
 0x249   :  { %3447 = vmatpush.bf16.msra.mxu0 %v2532_v55  ;;  %v2628_v49 = vpack.c.bf16 %v2094_v58, %v2088_v57  ;;  %v1884_v52 = vcvt.s32.f32 %v924_v18  ;;  %v1020_v19 = vunpack.c.2.s8 %v228_v38  ;;  %v1026_v51 = vunpack.c.3.s8 %v228_v38 }
 0x24a   :  { %3460 = vmatpush.bf16.msra.mxu1 %v2580_v50  ;;  %v2676_v61 = vpack.c.bf16 %v2190_v63, %v2184_v60  ;;  %v1890_v1 = vcvt.s32.f32 %v930_v43  ;;  %v1116_v3 = vunpack.c.2.s8 %v252_v11  ;;  %v1122_v59 = vunpack.c.3.s8 %v252_v11 }
 0x24b   :  { %3473 = vmatpush.bf16.msra.mxu2 %v2628_v49  ;;  %v1980_v14 = vcvt.s32.f32 %v1020_v19  ;;  %v1986_v47 = vcvt.s32.f32 %v1026_v51  ;;  %v1212_v5 = vunpack.c.2.s8 %v276_v0  ;;  %v1218_v7 = vunpack.c.3.s8 %v276_v0 }
 0x24c   :  { %3486 = vmatpush.bf16.msra.mxu3 %v2676_v61  ;;  %v2526_v6 = vpack.c.bf16 %v1890_v1, %v1884_v52  ;;  %v2076_v8 = vcvt.s32.f32 %v1116_v3  ;;  %v2082_v24 = vcvt.s32.f32 %v1122_v59  ;;  %v3196_v39 = vadd.f32 %v6232_v17, %v6242_v2 }
 0x24d   :  { %v2574_v12 = vpack.c.bf16 %v1986_v47, %v1980_v14  ;;  %v2172_v23 = vcvt.s32.f32 %v1212_v5  ;;  %v2178_v28 = vcvt.s32.f32 %v1218_v7  ;;  %v912_v54 = vunpack.c.0.s8 %v204_v56 }
 0x24e   :  { %3448 = vmatpush.bf16.msra.mxu0 %v2526_v6  ;;  %v2622_v20 = vpack.c.bf16 %v2082_v24, %v2076_v8  ;;  %v918_v4 = vunpack.c.1.s8 %v204_v56  ;;  %v1008_v40 = vunpack.c.0.s8 %v228_v38  ;;  %v1014_v29 = vunpack.c.1.s8 %v228_v38  ;;  %v222_v56 = vld [vmem:[%s7099_s1 + $0x598] sm:$0xff] }
 0x24f   :  { %3461 = vmatpush.bf16.msra.mxu1 %v2574_v12  ;;  %v2670_v45 = vpack.c.bf16 %v2178_v28, %v2172_v23  ;;  %v1872_v16 = vcvt.s32.f32 %v912_v54  ;;  %v1104_v15 = vunpack.c.0.s8 %v252_v11  ;;  %v1110_v21 = vunpack.c.1.s8 %v252_v11  ;;  %v270_v38 = vld [vmem:[%s7099_s1 + $0x718] sm:$0xff] }
 0x250   :  { %3474 = vmatpush.bf16.msra.mxu2 %v2622_v20  ;;  %v1878_v17 = vcvt.s32.f32 %v918_v4  ;;  %v1968_v2 = vcvt.s32.f32 %v1008_v40  ;;  %v1974_v31 = vcvt.s32.f32 %v1014_v29  ;;  %v1200_v35 = vunpack.c.0.s8 %v276_v0 }
 0x251   :  { %3487 = vmatpush.bf16.msra.mxu3 %v2670_v45  ;;  %v2064_v34 = vcvt.s32.f32 %v1104_v15  ;;  %v2070_v37 = vcvt.s32.f32 %v1110_v21  ;;  %v1206_v9 = vunpack.c.1.s8 %v276_v0  ;;  %v3209_v48 = vadd.f32 %v6247_v13, %v3196_v39 }
 0x252   :  { %v2520_v62 = vpack.c.bf16 %v1878_v17, %v1872_v16  ;;  %v2568_v53 = vpack.c.bf16 %v1974_v31, %v1968_v2  ;;  %v2160_v27 = vcvt.s32.f32 %v1200_v35  ;;  %v900_v42 = vunpack.c.2.s8 %v198_v30  ;;  %v240_v17 = vld [vmem:[%s7099_s1 + $0x628] sm:$0xff] }
 0x253   :  { %v2616_v55 = vpack.c.bf16 %v2070_v37, %v2064_v34  ;;  %v2166_v57 = vcvt.s32.f32 %v1206_v9  ;;  %v906_v58 = vunpack.c.3.s8 %v198_v30  ;;  %v996_v18 = vunpack.c.2.s8 %v222_v56  ;;  %v6318_v34 = vld [vmem:[%s7099_s1 + $0x6e8] sm:$0xff] }
 0x254   :  { %3449 = vmatpush.bf16.msra.mxu0 %v2520_v62  ;;  %3462 = vmatpush.bf16.msra.mxu1 %v2568_v53  ;;  %v1860_v11 = vcvt.s32.f32 %v900_v42  ;;  %v1002_v13 = vunpack.c.3.s8 %v222_v56  ;;  %v1092_v50 = vunpack.c.2.s8 %v246_v10  ;;  %v1098_v60 = vunpack.c.3.s8 %v246_v10 }
 0x255   :  { %3475 = vmatpush.bf16.msra.mxu2 %v2616_v55  ;;  %v2664_v63 = vpack.c.bf16 %v2166_v57, %v2160_v27  ;;  %v1866_v43 = vcvt.s32.f32 %v906_v58  ;;  %v1956_v0 = vcvt.s32.f32 %v996_v18  ;;  %v1188_v49 = vunpack.c.2.s8 %v270_v38 }
 0x256   :  { %v1962_v52 = vcvt.s32.f32 %v1002_v13  ;;  %v2052_v19 = vcvt.s32.f32 %v1092_v50  ;;  %v2058_v51 = vcvt.s32.f32 %v1098_v60  ;;  %v1194_v61 = vunpack.c.3.s8 %v270_v38 }
 0x257   :  { %3488 = vmatpush.bf16.msra.mxu3 %v2664_v63  ;;  %v2514_v1 = vpack.c.bf16 %v1866_v43, %v1860_v11  ;;  %v2148_v3 = vcvt.s32.f32 %v1188_v49  ;;  %v3222_v59 = vadd.f32 %v6257_v44, %v3209_v48  ;;  %v888_v6 = vunpack.c.0.s8 %v198_v30  ;;  %v192_v44 = vld [vmem:[%s7099_s1 + $0x4a8] sm:$0xff] }
 0x258   :  { %v2562_v14 = vpack.c.bf16 %v1962_v52, %v1956_v0  ;;  %v2610_v47 = vpack.c.bf16 %v2058_v51, %v2052_v19  ;;  %v2154_v5 = vcvt.s32.f32 %v1194_v61  ;;  %v894_v8 = vunpack.c.1.s8 %v198_v30  ;;  %v216_v30 = vld [vmem:[%s7099_s1 + $0x568] sm:$0xff]  ;;  %v4701_v61 = vld [vmem:[%s7102_s2 + $0x70] sm:$0xf] }
 0x259   :  { %3450 = vmatpush.bf16.msra.mxu0 %v2514_v1  ;;  %v6304_v7 = vadd.f32 %v6259_v46, %v3222_v59  ;;  %v984_v24 = vunpack.c.0.s8 %v222_v56  ;;  %v990_v12 = vunpack.c.1.s8 %v222_v56  ;;  %v1080_v23 = vunpack.c.0.s8 %v246_v10  ;;  %v5140_v1 = vld [vmem:[%s7102_s2 + $0x74] sm:$0xf0] }
 0x25a   :  { %3463 = vmatpush.bf16.msra.mxu1 %v2562_v14  ;;  %3476 = vmatpush.bf16.msra.mxu2 %v2610_v47  ;;  %v2658_v39 = vpack.c.bf16 %v2154_v5, %v2148_v3  ;;  %v1086_v28 = vunpack.c.1.s8 %v246_v10  ;;  %v1848_v54 = vcvt.s32.f32 %v888_v6  ;;  %v1854_v20 = vcvt.s32.f32 %v894_v8  ;;  %v4765_v3 = vld [vmem:[%s7102_s2 + $0xf0] sm:$0xf]  ;;  %v5156_v6 = vld [vmem:[%s7102_s2 + $0xf4] sm:$0xf0] }
 0x25b   :  { %v1944_v4 = vcvt.s32.f32 %v984_v24  ;;  %v1950_v40 = vcvt.s32.f32 %v990_v12  ;;  %v2040_v46 = vcvt.s32.f32 %v1080_v23  ;;  %v1176_v45 = vunpack.c.0.s8 %v270_v38  ;;  %v4829_v8 = vld [vmem:[%s7102_s2 + $0x170] sm:$0xf]  ;;  %v5172_v24 = vld [vmem:[%s7102_s2 + $0x174] sm:$0xf0] }
 0x25c   :  { %3489 = vmatpush.bf16.msra.mxu3 %v2658_v39  ;;  %v2046_v29 = vcvt.s32.f32 %v1086_v28  ;;  %v2508_v16 = vpack.c.bf16 %v1854_v20, %v1848_v54  ;;  %v1182_v15 = vunpack.c.1.s8 %v270_v38  ;;  %v876_v21 = vunpack.c.2.s8 %v192_v44 }
 0x25d   :  { %v2556_v2 = vpack.c.bf16 %v1950_v40, %v1944_v4  ;;  %v2136_v35 = vcvt.s32.f32 %v1176_v45  ;;  %v882_v56 = vunpack.c.3.s8 %v192_v44  ;;  %v972_v10 = vunpack.c.2.s8 %v216_v30  ;;  %v4893_v40 = vld [vmem:[%s7102_s2 + $0x1f0] sm:$0xf] }
 0x25e   :  { %v2604_v31 = vpack.c.bf16 %v2046_v29, %v2040_v46  ;;  %3451 = vmatpush.bf16.msra.mxu0 %v2508_v16  ;;  %v2142_v37 = vcvt.s32.f32 %v1182_v15  ;;  %v1836_v9 = vcvt.s32.f32 %v876_v21  ;;  %v978_v62 = vunpack.c.3.s8 %v216_v30  ;;  %v5188_v46 = vld [vmem:[%s7102_s2 + $0x1f4] sm:$0xf0]  ;;  %v4693_v29 = vld [vmem:[%s7102_s2 + $0x60] sm:$0xf] }
 0x25f   :  { %3464 = vmatpush.bf16.msra.mxu1 %v2556_v2  ;;  %v1842_v48 = vcvt.s32.f32 %v882_v56  ;;  %v1068_v53 = vunpack.c.2.s8 %v240_v17  ;;  %v1074_v42 = vunpack.c.3.s8 %v240_v17  ;;  %v1164_v38 = vunpack.c.2.s8 %v6318_v34  ;;  %v5154_v2 = vld [vmem:[%s7102_s2 + $0xe4] sm:$0xf0]  ;;  %v4821_v56 = vld [vmem:[%s7102_s2 + $0x160] sm:$0xf] }
 0x260   :  { %3477 = vmatpush.bf16.msra.mxu2 %v2604_v31  ;;  %v2652_v27 = vpack.c.bf16 %v2142_v37, %v2136_v35  ;;  %v1932_v57 = vcvt.s32.f32 %v972_v10  ;;  %v1938_v58 = vcvt.s32.f32 %v978_v62  ;;  %v1170_v13 = vunpack.c.3.s8 %v6318_v34  ;;  %v4885_v62 = vld [vmem:[%s7102_s2 + $0x1e0] sm:$0xf] }
 0x261   :  { %v2502_v55 = vpack.c.bf16 %v1842_v48, %v1836_v9  ;;  %v2028_v18 = vcvt.s32.f32 %v1068_v53  ;;  %v2034_v11 = vcvt.s32.f32 %v1074_v42  ;;  %v2124_v50 = vcvt.s32.f32 %v1164_v38  ;;  %v5186_v53 = vld [vmem:[%s7102_s2 + $0x1e4] sm:$0xf0]  ;;  %v6375_v42 = vpop.f32.mrf.mxu0 }
 0x262   :  { %3490 = vmatpush.bf16.msra.mxu3 %v2652_v27  ;;  %v2550_v60 = vpack.c.bf16 %v1938_v58, %v1932_v57  ;;  %v864_v63 = vunpack.c.0.s8 %v192_v44  ;;  %v870_v43 = vunpack.c.1.s8 %v192_v44  ;;  %v960_v0 = vunpack.c.0.s8 %v216_v30  ;;  %v4685_v27 = vld [vmem:[%s7102_s2 + $0x50] sm:$0xf]  ;;  %v5152_v58 = vld [vmem:[%s7102_s2 + $0xd4] sm:$0xf0] }
 0x263   :  { %3452 = vmatpush.bf16.msra.mxu0 %v2502_v55  ;;  %v2598_v49 = vpack.c.bf16 %v2034_v11, %v2028_v18  ;;  %v2130_v52 = vcvt.s32.f32 %v1170_v13  ;;  %v966_v19 = vunpack.c.1.s8 %v216_v30  ;;  %v1056_v51 = vunpack.c.0.s8 %v240_v17  ;;  %v5138_v30 = vld [vmem:[%s7102_s2 + $0x64] sm:$0xf0]  ;;  %v5136_v55 = vld [vmem:[%s7102_s2 + $0x54] sm:$0xf0]  ;;  %v4749_v57 = vld [vmem:[%s7102_s2 + $0xd0] sm:$0xf]  ;;  %v6394_v11 = vpop.f32.mrf.mxu1 }
 0x264   :  { %3465 = vmatpush.bf16.msra.mxu1 %v2550_v60  ;;  %v1824_v59 = vcvt.s32.f32 %v864_v63  ;;  %v1830_v14 = vcvt.s32.f32 %v870_v43  ;;  %v1920_v47 = vcvt.s32.f32 %v960_v0  ;;  %v1062_v5 = vunpack.c.1.s8 %v240_v17  ;;  %v4757_v17 = vld [vmem:[%s7102_s2 + $0xe0] sm:$0xf]  ;;  %v5168_v18 = vld [vmem:[%s7102_s2 + $0x154] sm:$0xf0]  ;;  %v6399_v13 = vld [vmem:[%s7101_s6 + $0xd] sm:$0x3f] }
 0x265   :  { %3478 = vmatpush.bf16.msra.mxu2 %v2598_v49  ;;  %v2646_v39 = vpack.c.bf16 %v2130_v52, %v2124_v50  ;;  %v1926_v12 = vcvt.s32.f32 %v966_v19  ;;  %v2016_v23 = vcvt.s32.f32 %v1056_v51  ;;  %v1152_v28 = vunpack.c.0.s8 %v6318_v34  ;;  %v4877_v63 = vld [vmem:[%s7102_s2 + $0x1d0] sm:$0xf]  ;;  %v5184_v43 = vld [vmem:[%s7102_s2 + $0x1d4] sm:$0xf0]  ;;  %v4677_v0 = vld [vmem:[%s7102_s2 + $0x40] sm:$0xf]  ;;  %v6411_v49 = vpop.f32.mrf.mxu2 }
 0x266   :  { %v2496_v44 = vpack.c.bf16 %v1830_v14, %v1824_v59  ;;  %v2022_v54 = vcvt.s32.f32 %v1062_v5  ;;  %v1158_v20 = vunpack.c.1.s8 %v6318_v34  ;;  %v4702_v4 = vor.u32 %v5140_v1, %v4701_v61  ;;  %v5170_v34 = vld [vmem:[%s7102_s2 + $0x164] sm:$0xf0]  ;;  %v4741_v51 = vld [vmem:[%s7102_s2 + $0xc0] sm:$0xf] }
 0x267   :  { %3491 = vmatpush.bf16.msra.mxu3 %v2646_v39  ;;  %v2544_v45 = vpack.c.bf16 %v1926_v12, %v1920_v47  ;;  %v2112_v16 = vcvt.s32.f32 %v1152_v28  ;;  %v4766_v15 = vor.u32 %v5156_v6, %v4765_v3  ;;  %v4830_v21 = vor.u32 %v5172_v24, %v4829_v8  ;;  %v5134_v19 = vld [vmem:[%s7102_s2 + $0x44] sm:$0xf0]  ;;  %v6436_v14 = vld [vmem:[%s7101_s6] sm:$0x3f]  ;;  %v4669_v39 = vld [vmem:[%s7102_s2 + $0x30] sm:$0xf] }
 0x268   :  { %3453 = vmatpush.bf16.msra.mxu0 %v2496_v44  ;;  %v2592_v31 = vpack.c.bf16 %v2022_v54, %v2016_v23  ;;  %v2118_v35 = vcvt.s32.f32 %v1158_v20  ;;  %v4894_v37 = vor.u32 %v5188_v46, %v4893_v40  ;;  %v4694_v48 = vor.u32 %v5138_v30, %v4693_v29  ;;  %v5150_v61 = vld [vmem:[%s7102_s2 + $0xc4] sm:$0xf0]  ;;  %v4869_v8 = vld [vmem:[%s7102_s2 + $0x1c0] sm:$0xf]  ;;  %v5132_v28 = vld [vmem:[%s7102_s2 + $0x34] sm:$0xf0] }
 0x269   :  { %3466 = vmatpush.bf16.msra.mxu1 %v2544_v45  ;;  %v4758_v10 = vor.u32 %v5154_v2, %v4757_v17  ;;  %v4822_v38 = vor.u32 %v5170_v34, %v4821_v56  ;;  %v4886_v50 = vor.u32 %v5186_v53, %v4885_v62  ;;  %v4750_v60 = vor.u32 %v5152_v58, %v4749_v57  ;;  %v5166_v59 = vld [vmem:[%s7102_s2 + $0x144] sm:$0xf0]  ;;  %v3249_v12 = vpop.f32.mrf.mxu0  ;;  %v4733_v44 = vld [vmem:[%s7102_s2 + $0xb0] sm:$0xf]  ;;  %v5148_v54 = vld [vmem:[%s7102_s2 + $0xb4] sm:$0xf0] }
 0x26a   :  { %3479 = vmatpush.bf16.msra.mxu2 %v2592_v31  ;;  %v2640_v9 = vpack.c.bf16 %v2118_v35, %v2112_v16  ;;  %v3499_v1 = vperm.slane %v6399_v13, 0  ;;  %v3500_v3 = vperm.slane %v6399_v13, 1  ;;  %v4878_v47 = vor.u32 %v5184_v43, %v4877_v63  ;;  %v5182_v24 = vld [vmem:[%s7102_s2 + $0x1c4] sm:$0xf0]  ;;  %v4797_v29 = vld [vmem:[%s7102_s2 + $0x130] sm:$0xf] }
 0x26b   :  { %3454 = vmatmul.bf16.vlgmr.msra.gmra.mxu0 %v5448_v32  ;;  %v4813_v32 = vld [vmem:[%s7102_s2 + $0x150] sm:$0xf]  ;;  %v4678_v5 = vor.u32 %v5134_v19, %v4677_v0  ;;  %v4742_v6 = vor.u32 %v5150_v61, %v4741_v51  ;;  %v3519_v46 = vperm.slane %v6436_v14, 1  ;;  %v5164_v45 = vld [vmem:[%s7102_s2 + $0x134] sm:$0xf0]  ;;  %v3262_v16 = vpop.f32.mrf.mxu1  ;;  %v4734_v30 = vor.u32 %v5148_v54, %v4733_v44 }
 0x26c   :  { %4141 = vmatpush.bf16.msrb.mxu0 %v4702_v4  ;;  %3492 = vmatpush.bf16.msra.mxu3 %v2640_v9  ;;  %v4814_v52 = vor.u32 %v5168_v18, %v4813_v32  ;;  %v3511_v20 = vmul.f32 %v3499_v1, %v5781_v25  ;;  %v3518_v4 = vperm.slane %v6436_v14, 0  ;;  %v3512_v40 = vmul.f32 %v3500_v3, %v5938_v36  ;;  %v4861_v17 = vld [vmem:[%s7102_s2 + $0x1b0] sm:$0xf]  ;;  %v5180_v2 = vld [vmem:[%s7102_s2 + $0x1b4] sm:$0xf0] }
 0x26d   :  { %4154 = vmatpush.bf16.msrb.mxu1 %v4766_v15  ;;  %3480 = vmatmul.bf16.vlgmr.msra.gmra.mxu2 %v5506_v22  ;;  %v6413_v22 = vpop.f32.mrf.mxu3  ;;  %v3501_v15 = vperm.slane %v6399_v13, 2  ;;  %v4870_v25 = vor.u32 %v5182_v24, %v4869_v8  ;;  %v4670_v36 = vor.u32 %v5132_v28, %v4669_v39  ;;  %v4661_v31 = vld [vmem:[%s7102_s2 + $0x20] sm:$0xf]  ;;  %v3275_v35 = vpop.f32.mrf.mxu2  ;;  %v4798_v34 = vor.u32 %v5164_v45, %v4797_v29  ;;  %v4717_v19 = vld [vmem:[%s7102_s2 + $0x90] sm:$0xf] }
 0x26e   :  { %4167 = vmatpush.bf16.msrb.mxu2 %v4830_v21  ;;  %3467 = vmatmul.bf16.vlgmr.msra.gmra.mxu1 %v5455_v41  ;;  %v4686_v41 = vor.u32 %v5136_v55, %v4685_v27  ;;  %v3502_v21 = vperm.slane %v6399_v13, 3  ;;  %v4725_v9 = vld [vmem:[%s7102_s2 + $0xa0] sm:$0xf]  ;;  %v6488_v62 = vadd.f32 %v3519_v46, %v3512_v40  ;;  %v5162_v27 = vld [vmem:[%s7102_s2 + $0x124] sm:$0xf0]  ;;  %v3520_v55 = vperm.slane %v6436_v14, 2 }
 0x26f   :  { %3493 = vmatmul.bf16.vlgmr.msra.gmra.mxu3 %v5511_v26  ;;  %v4805_v26 = vld [vmem:[%s7102_s2 + $0x140] sm:$0xf]  ;;  %v3521_v57 = vperm.slane %v6436_v14, 3  ;;  %v4862_v58 = vor.u32 %v5180_v2, %v4861_v17  ;;  %v5144_v51 = vld [vmem:[%s7102_s2 + $0x94] sm:$0xf0] }
 0x270   :  { %4180 = vmatpush.bf16.msrb.mxu3 %v4894_v37  ;;  %4142 = vmatpush.bf16.msrb.mxu0 %v4694_v48  ;;  %v4806_v23 = vor.u32 %v5166_v59, %v4805_v26  ;;  %v5130_v37 = vld [vmem:[%s7102_s2 + $0x24] sm:$0xf0]  ;;  %v4789_v53 = vld [vmem:[%s7102_s2 + $0x120] sm:$0xf]  ;;  %v3514_v43 = vmul.f32 %v3502_v21, %v6304_v7  ;;  %v4781_v7 = vld [vmem:[%s7102_s2 + $0x110] sm:$0xf] }
 0x271   :  { %4155 = vmatpush.bf16.msrb.mxu1 %v4758_v10  ;;  %v5146_v48 = vld [vmem:[%s7102_s2 + $0xa4] sm:$0xf0]  ;;  %v6486_v10 = vadd.f32 %v3518_v4, %v3511_v20  ;;  %v4662_v32 = vor.u32 %v5130_v37, %v4661_v31  ;;  %v6510_v63 = vpop.f32.mrf.mxu0  ;;  %v4790_v0 = vor.u32 %v5162_v27, %v4789_v53  ;;  %v3543_v1 = vmul.f32 0.01, %v6488_v62  ;;  %v4845_v59 = vld [vmem:[%s7102_s2 + $0x190] sm:$0xf] }
 0x272   :  { %4168 = vmatpush.bf16.msrb.mxu2 %v4822_v38  ;;  %v3513_v38 = vmul.f32 %v3501_v15, %v6144_v33  ;;  %v4726_v18 = vor.u32 %v5146_v48, %v4725_v9  ;;  %v4653_v33 = vld [vmem:[%s7102_s2 + $0x10] sm:$0xf]  ;;  %v4645_v8 = vld [vmem:[%s7102_s2] sm:$0xf]  ;;  %v5126_v24 = vld [vmem:[%s7102_s2 + $0x4] sm:$0xf0]  ;;  %v3533_v28 = vadd.f32 %v3521_v57, %v3514_v43 }
 0x273   :  { %vm3536_vm0 = vcmp.gt.f32.partialorder %v6486_v10, 0.0  ;;  %v3542_v61 = vmul.f32 0.01, %v6486_v10  ;;  %v4709_v54 = vld [vmem:[%s7102_s2 + $0x80] sm:$0xf]  ;;  %vm3537_vm1 = vcmp.gt.f32.partialorder %v6488_v62, 0.0  ;;  %v4646_v21 = vor.u32 %v5126_v24, %v4645_v8 }
 0x274   :  { %4181 = vmatpush.bf16.msrb.mxu3 %v4886_v50  ;;  %4143 = vmatpush.bf16.msrb.mxu0 %v4686_v41  ;;  %v4853_v50 = vld [vmem:[%s7102_s2 + $0x1a0] sm:$0xf]  ;;  %v5178_v41 = vld [vmem:[%s7102_s2 + $0x1a4] sm:$0xf0]  ;;  %v3532_v3 = vadd.f32 %v3520_v55, %v3513_v38  ;;  %v4957_v40 = vld [vmem:[%s7102_s2 + $0x270] sm:$0xf]  ;;  %v3549_v38 = vsel %vm3537_vm1, %v6488_v62, %v3543_v1 }
 0x275   :  { %4156 = vmatpush.bf16.msrb.mxu1 %v4750_v60  ;;  %v3288_v56 = vpop.f32.mrf.mxu3  ;;  %v3261_v60 = vadd.f32 %v6394_v11, %v6375_v42  ;;  %v5160_v42 = vld [vmem:[%s7102_s2 + $0x114] sm:$0xf0]  ;;  %v6529_v11 = vpop.f32.mrf.mxu1  ;;  %v4854_v26 = vor.u32 %v5178_v41, %v4853_v50  ;;  %v5142_v20 = vld [vmem:[%s7102_s2 + $0x84] sm:$0xf0]  ;;  %v4773_v4 = vld [vmem:[%s7102_s2 + $0x100] sm:$0xf]  ;;  %v3548_v9 = vsel %vm3536_vm0, %v6486_v10, %v3542_v61 }
 0x276   :  { %4169 = vmatpush.bf16.msrb.mxu2 %v4814_v52  ;;  %v5128_v52 = vld [vmem:[%s7102_s2 + $0x14] sm:$0xf0]  ;;  %v6546_v12 = vpop.f32.mrf.mxu2  ;;  %v4782_v44 = vor.u32 %v5160_v42, %v4781_v7  ;;  %vm3538_vm2 = vcmp.gt.f32.partialorder %v3532_v3, 0.0  ;;  %v5139_v45 = vld [vmem:[%s7102_s2 + $0x74] sm:$0xf]  ;;  %vm3539_vm3 = vcmp.gt.f32.partialorder %v3533_v28, 0.0  ;;  %v6608_v62 = vpack.c.bf16 %v3548_v9, %v3548_v9 }
 0x277   :  { %v3274_v39 = vadd.f32 %v6411_v49, %v3261_v60  ;;  %v5158_v49 = vld [vmem:[%s7102_s2 + $0x104] sm:$0xf0]  ;;  %v5204_v46 = vld [vmem:[%s7102_s2 + $0x274] sm:$0xf0]  ;;  %v4703_v16 = vld [vmem:[%s7102_s2 + $0x78] sm:$0xf0] }
 0x278   :  { %4182 = vmatpush.bf16.msrb.mxu3 %v4878_v47  ;;  %4144 = vmatpush.bf16.msrb.mxu0 %v4678_v5  ;;  %v4654_v47 = vor.u32 %v5128_v52, %v4653_v33  ;;  %v4718_v5 = vor.u32 %v5144_v51, %v4717_v19  ;;  %v3544_v15 = vmul.f32 0.01, %v3532_v3  ;;  %v3545_v31 = vmul.f32 0.01, %v3533_v28  ;;  %v5155_v56 = vld [vmem:[%s7102_s2 + $0xf4] sm:$0xf] }
 0x279   :  { %4157 = vmatpush.bf16.msrb.mxu1 %v4742_v6  ;;  %v5176_v6 = vld [vmem:[%s7102_s2 + $0x194] sm:$0xf0]  ;;  %v3287_v17 = vadd.f32 %v6413_v22, %v3274_v39  ;;  %v3301_v2 = vpop.f32.mrf.mxu0  ;;  %v4774_v35 = vor.u32 %v5158_v49, %v4773_v4  ;;  %v4958_v37 = vor.u32 %v5204_v46, %v4957_v40  ;;  %v4706_v48 = vor.u32 %v5139_v45, %v4703_v16  ;;  %v4949_v22 = vld [vmem:[%s7102_s2 + $0x260] sm:$0xf]  ;;  %v5202_v53 = vld [vmem:[%s7102_s2 + $0x264] sm:$0xf0] }
 0x27a   :  { %4170 = vmatpush.bf16.msrb.mxu2 %v4806_v23  ;;  %v4846_v29 = vor.u32 %v5176_v6, %v4845_v59  ;;  %v5137_v10 = vld [vmem:[%s7102_s2 + $0x64] sm:$0xf]  ;;  %v4695_v57 = vld [vmem:[%s7102_s2 + $0x68] sm:$0xf0]  ;;  %v3551_v33 = vsel %vm3539_vm3, %v3533_v28, %v3545_v31  ;;  %v6617_v52 = vpack.c.bf16 %v3549_v38, %v3549_v38  ;;  %v4941_v19 = vld [vmem:[%s7102_s2 + $0x250] sm:$0xf] }
 0x27b   :  { %v5153_v60 = vld [vmem:[%s7102_s2 + $0xe4] sm:$0xf]  ;;  %v4759_v43 = vld [vmem:[%s7102_s2 + $0xe8] sm:$0xf0]  ;;  %v5200_v51 = vld [vmem:[%s7102_s2 + $0x254] sm:$0xf0]  ;;  %v6634_v1 = vpack.c.bf16 %v3551_v33, %v3551_v33 }
 0x27c   :  { %4183 = vmatpush.bf16.msrb.mxu3 %v4870_v25  ;;  %4145 = vmatpush.bf16.msrb.mxu0 %v4670_v36  ;;  %v4710_v25 = vor.u32 %v5142_v20, %v4709_v54  ;;  %v4837_v36 = vld [vmem:[%s7102_s2 + $0x180] sm:$0xf]  ;;  %v5135_v42 = vld [vmem:[%s7102_s2 + $0x54] sm:$0xf]  ;;  %v4687_v61 = vld [vmem:[%s7102_s2 + $0x58] sm:$0xf0] }
 0x27d   :  { %4158 = vmatpush.bf16.msrb.mxu1 %v4734_v30  ;;  %v6548_v23 = vpop.f32.mrf.mxu3  ;;  %v5174_v30 = vld [vmem:[%s7102_s2 + $0x184] sm:$0xf0]  ;;  %v3314_v27 = vpop.f32.mrf.mxu1  ;;  %v5151_v59 = vld [vmem:[%s7102_s2 + $0xd4] sm:$0xf]  ;;  %v4690_v6 = vor.u32 %v5135_v42, %v4687_v61  ;;  %v5133_v24 = vld [vmem:[%s7102_s2 + $0x44] sm:$0xf] }
 0x27e   :  { %4171 = vmatpush.bf16.msrb.mxu2 %v4798_v34  ;;  %v4767_v34 = vld [vmem:[%s7102_s2 + $0xf8] sm:$0xf0]  ;;  %v4838_v55 = vor.u32 %v5174_v30, %v4837_v36  ;;  %v3327_v50 = vpop.f32.mrf.mxu2  ;;  %v5198_v8 = vld [vmem:[%s7102_s2 + $0x244] sm:$0xf0]  ;;  %v4679_v39 = vld [vmem:[%s7102_s2 + $0x48] sm:$0xf0] }
 0x27f   :  { %v5149_v54 = vld [vmem:[%s7102_s2 + $0xc4] sm:$0xf]  ;;  %v4743_v20 = vld [vmem:[%s7102_s2 + $0xc8] sm:$0xf0]  ;;  %v4682_v49 = vor.u32 %v5133_v24, %v4679_v39  ;;  %v4925_v40 = vld [vmem:[%s7102_s2 + $0x230] sm:$0xf] }
 0x280   :  { %4184 = vmatpush.bf16.msrb.mxu3 %v4862_v58  ;;  %4146 = vmatpush.bf16.msrb.mxu0 %v4662_v32  ;;  %v3550_v58 = vsel %vm3538_vm2, %v3532_v3, %v3544_v15  ;;  %v4770_v32 = vor.u32 %v5155_v56, %v4767_v34  ;;  %v4762_v3 = vor.u32 %v5153_v60, %v4759_v43  ;;  %v5131_v46 = vld [vmem:[%s7102_s2 + $0x34] sm:$0xf]  ;;  %v3503_v31 = vperm.slane %v6399_v13, 4  ;;  %v4663_v56 = vld [vmem:[%s7102_s2 + $0x28] sm:$0xf0] }
 0x281   :  { %4159 = vmatpush.bf16.msrb.mxu1 %v4726_v18  ;;  %v3300_v18 = vadd.f32 %v6510_v63, %v3287_v17  ;;  %v4698_v63 = vor.u32 %v5137_v10, %v4695_v57  ;;  %v6625_v7 = vpack.c.bf16 %v3550_v58, %v3550_v58  ;;  %v4746_v45 = vor.u32 %v5149_v54, %v4743_v20  ;;  %v5147_v15 = vld [vmem:[%s7102_s2 + $0xb4] sm:$0xf]  ;;  %v4917_v17 = vld [vmem:[%s7102_s2 + $0x220] sm:$0xf]  ;;  %v5192_v10 = vld [vmem:[%s7102_s2 + $0x214] sm:$0xf0] }
 0x282   :  { %4172 = vmatpush.bf16.msrb.mxu2 %v4790_v0  ;;  %v4950_v0 = vor.u32 %v5202_v53, %v4949_v22  ;;  %v5145_v22 = vld [vmem:[%s7102_s2 + $0xa4] sm:$0xf]  ;;  %v4727_v53 = vld [vmem:[%s7102_s2 + $0xa8] sm:$0xf0]  ;;  %v5127_v58 = vld [vmem:[%s7102_s2 + $0x14] sm:$0xf] }
 0x283   :  { %v5143_v50 = vld [vmem:[%s7102_s2 + $0x94] sm:$0xf]  ;;  %v4719_v33 = vld [vmem:[%s7102_s2 + $0x98] sm:$0xf0]  ;;  %v5125_v60 = vld [vmem:[%s7102_s2 + $0x4] sm:$0xf] }
 0x284   :  { %4185 = vmatpush.bf16.msrb.mxu3 %v4854_v26  ;;  %4147 = vmatpush.bf16.msrb.mxu0 %v4654_v47  ;;  %v3313_v26 = vadd.f32 %v6529_v11, %v3300_v18  ;;  %v4751_v47 = vld [vmem:[%s7102_s2 + $0xd8] sm:$0xf0]  ;;  %v4933_v11 = vld [vmem:[%s7102_s2 + $0x240] sm:$0xf]  ;;  %v4730_v18 = vor.u32 %v5145_v22, %v4727_v53  ;;  %v4647_v61 = vld [vmem:[%s7102_s2 + $0x8] sm:$0xf0] }
 0x285   :  { %4160 = vmatpush.bf16.msrb.mxu1 %v4718_v5  ;;  %v3340_v41 = vpop.f32.mrf.mxu3  ;;  %v4942_v5 = vor.u32 %v5200_v51, %v4941_v19  ;;  %v4754_v28 = vor.u32 %v5151_v59, %v4751_v47  ;;  %v4934_v4 = vor.u32 %v5198_v8, %v4933_v11  ;;  %v5190_v51 = vld [vmem:[%s7102_s2 + $0x204] sm:$0xf0]  ;;  %v4722_v47 = vor.u32 %v5143_v50, %v4719_v33  ;;  %v5141_v11 = vld [vmem:[%s7102_s2 + $0x84] sm:$0xf]  ;;  %v4711_v8 = vld [vmem:[%s7102_s2 + $0x88] sm:$0xf0] }
 0x286   :  { %4173 = vmatpush.bf16.msrb.mxu2 %v4782_v44  ;;  %v3326_v44 = vadd.f32 %v6546_v12, %v3313_v26  ;;  %v5196_v12 = vld [vmem:[%s7102_s2 + $0x234] sm:$0xf0]  ;;  %v4831_v26 = vld [vmem:[%s7102_s2 + $0x178] sm:$0xf0]  ;;  %v5169_v20 = vld [vmem:[%s7102_s2 + $0x164] sm:$0xf] }
 0x287   :  { %v5216_v22 = vld [vmem:[%s7102_s2 + $0x2d4] sm:$0xf0]  ;;  %v5219_v53 = vld [vmem:[%s7102_s2 + $0x2f4] sm:$0xf]  ;;  %v4997_v33 = vld [vmem:[%s7102_s2 + $0x2c0] sm:$0xf] }
 0x288   :  { %4186 = vmatpush.bf16.msrb.mxu3 %v4846_v29  ;;  %4148 = vmatpush.bf16.msrb.mxu0 %v4646_v21  ;;  %v4671_v29 = vld [vmem:[%s7102_s2 + $0x38] sm:$0xf0]  ;;  %v3339_v16 = vadd.f32 %v6548_v23, %v3326_v44  ;;  %v5194_v23 = vld [vmem:[%s7102_s2 + $0x224] sm:$0xf0]  ;;  %vm4635_vm0 = vcmask 130048   ;;  %vm4637_vm1 = vcmask 392192  }
 0x289   :  { %4161 = vmatpush.bf16.msrb.mxu1 %v4710_v25  ;;  %v4735_v21 = vld [vmem:[%s7102_s2 + $0xb8] sm:$0xf0]  ;;  %v4926_v25 = vor.u32 %v5196_v12, %v4925_v40  ;;  %v4674_v30 = vor.u32 %v5131_v46, %v4671_v29  ;;  %v4918_v27 = vor.u32 %v5194_v23, %v4917_v17  ;;  %v5201_v40 = vld [vmem:[%s7102_s2 + $0x264] sm:$0xf]  ;;  %v4951_v12 = vld [vmem:[%s7102_s2 + $0x268] sm:$0xf0] }
 0x28a   :  { %4174 = vmatpush.bf16.msrb.mxu2 %v4774_v35  ;;  %v5129_v35 = vld [vmem:[%s7102_s2 + $0x24] sm:$0xf]  ;;  %v5199_v29 = vld [vmem:[%s7102_s2 + $0x254] sm:$0xf]  ;;  %v5220_v17 = vld [vmem:[%s7102_s2 + $0x2f4] sm:$0xf0] }
 0x28b   :  { %4149 = vmatmul.bf16.vlgmr.msrb.gmra.mxu0 %v6608_v62  ;;  %v4666_v38 = vor.u32 %v5129_v35, %v4663_v56  ;;  %v4943_v23 = vld [vmem:[%s7102_s2 + $0x258] sm:$0xf0]  ;;  %v5218_v35 = vld [vmem:[%s7102_s2 + $0x2e4] sm:$0xf0] }
 0x28c   :  { %4193 = vmatpush.bf16.msra.mxu0 %v4958_v37  ;;  %4187 = vmatpush.bf16.msrb.mxu3 %v4838_v55  ;;  %v4738_v37 = vor.u32 %v5147_v15, %v4735_v21  ;;  %v4909_v55 = vld [vmem:[%s7102_s2 + $0x210] sm:$0xf] }
 0x28d   :  { %4162 = vmatmul.bf16.vlgmr.msrb.gmra.mxu1 %v6617_v52  ;;  %4175 = vmatmul.bf16.vlgmr.msrb.gmra.mxu2 %v6625_v7  ;;  %v4910_v43 = vor.u32 %v5192_v10, %v4909_v55 }
 0x28e   :  { %4219 = vmatpush.bf16.msra.mxu2 %v4706_v48  ;;  %v3522_v48 = vperm.slane %v6436_v14, 4 }
 0x28f   :  { %4188 = vmatmul.bf16.vlgmr.msrb.gmra.mxu3 %v6634_v1 }
 0x290   :  { %4232 = vmatpush.bf16.msra.mxu3 %v4770_v32  ;;  %4194 = vmatpush.bf16.msra.mxu0 %v4950_v0  ;;  %v4655_v32 = vld [vmem:[%s7102_s2 + $0x18] sm:$0xf0]  ;;  %v4901_v0 = vld [vmem:[%s7102_s2 + $0x200] sm:$0xf] }
 0x291   :  { %v4658_v19 = vor.u32 %v5127_v58, %v4655_v32  ;;  %v4902_v24 = vor.u32 %v5190_v51, %v4901_v0  ;;  %v4927_v0 = vld [vmem:[%s7102_s2 + $0x238] sm:$0xf0] }
 0x292   :  { %4220 = vmatpush.bf16.msra.mxu2 %v4698_v63 }
 0x294   :  { %4233 = vmatpush.bf16.msra.mxu3 %v4762_v3  ;;  %4195 = vmatpush.bf16.msra.mxu0 %v4942_v5  ;;  %v5171_v3 = vld [vmem:[%s7102_s2 + $0x174] sm:$0xf] }
 0x295   :  { %v3351_v36 = vpop.f32.mrf.mxu0  ;;  %v5203_v5 = vld [vmem:[%s7102_s2 + $0x274] sm:$0xf]  ;;  %v4834_v44 = vor.u32 %v5171_v3, %v4831_v26 }
 0x296   :  { %4221 = vmatpush.bf16.msra.mxu2 %v4690_v6  ;;  %v3352_v2 = vadd.f32 %v3351_v36, %v3339_v16  ;;  %v4959_v6 = vld [vmem:[%s7102_s2 + $0x278] sm:$0xf0]  ;;  %v5167_v16 = vld [vmem:[%s7102_s2 + $0x154] sm:$0xf] }
 0x297   :  { %v3364_v34 = vpop.f32.mrf.mxu1  ;;  %v4962_v54 = vor.u32 %v5203_v5, %v4959_v6  ;;  %v4815_v36 = vld [vmem:[%s7102_s2 + $0x158] sm:$0xf0]  ;;  %v5215_v26 = vld [vmem:[%s7102_s2 + $0x2d4] sm:$0xf]  ;;  %v4791_v5 = vld [vmem:[%s7102_s2 + $0x128] sm:$0xf0] }
 0x298   :  { %4234 = vmatpush.bf16.msra.mxu3 %v4754_v28  ;;  %4196 = vmatpush.bf16.msra.mxu0 %v4934_v4  ;;  %v3365_v9 = vadd.f32 %v3364_v34, %v3352_v2  ;;  %v4650_v28 = vor.u32 %v5125_v60, %v4647_v61  ;;  %v4823_v4 = vld [vmem:[%s7102_s2 + $0x168] sm:$0xf0]  ;;  %v4818_v56 = vor.u32 %v5167_v16, %v4815_v36  ;;  %v5165_v34 = vld [vmem:[%s7102_s2 + $0x144] sm:$0xf]  ;;  %v5214_v60 = vld [vmem:[%s7102_s2 + $0x2c4] sm:$0xf0] }
 0x299   :  { %v4998_v61 = vor.u32 %v5214_v60, %v4997_v33  ;;  %v4989_v6 = vld [vmem:[%s7102_s2 + $0x2b0] sm:$0xf]  ;;  %v5157_v36 = vld [vmem:[%s7102_s2 + $0x104] sm:$0xf] }
 0x29a   :  { %4222 = vmatpush.bf16.msra.mxu2 %v4682_v49  ;;  %v3515_v57 = vmul.f32 %v3503_v31, %v3365_v9  ;;  %v4714_v49 = vor.u32 %v5141_v11, %v4711_v8  ;;  %v5013_v31 = vld [vmem:[%s7102_s2 + $0x2e0] sm:$0xf]  ;;  %v5212_v11 = vld [vmem:[%s7102_s2 + $0x2b4] sm:$0xf0]  ;;  %v5193_v8 = vld [vmem:[%s7102_s2 + $0x224] sm:$0xf] }
 0x29b   :  { %v5014_v9 = vor.u32 %v5218_v35, %v5013_v31  ;;  %v5185_v60 = vld [vmem:[%s7102_s2 + $0x1e4] sm:$0xf] }
 0x29c   :  { %4235 = vmatpush.bf16.msra.mxu3 %v4746_v45  ;;  %4197 = vmatpush.bf16.msra.mxu0 %v4926_v25  ;;  %v3534_v41 = vadd.f32 %v3522_v48, %v3515_v57  ;;  %v4826_v45 = vor.u32 %v5169_v20, %v4823_v4  ;;  %v4954_v25 = vor.u32 %v5201_v40, %v4951_v12  ;;  %v5005_v48 = vld [vmem:[%s7102_s2 + $0x2d0] sm:$0xf]  ;;  %v5163_v57 = vld [vmem:[%s7102_s2 + $0x134] sm:$0xf]  ;;  %v4783_v4 = vld [vmem:[%s7102_s2 + $0x118] sm:$0xf0] }
 0x29d   :  { %v3353_v63 = vpop.f32.mrf.mxu0  ;;  %v5210_v40 = vld [vmem:[%s7102_s2 + $0x2a4] sm:$0xf0]  ;;  %v5191_v12 = vld [vmem:[%s7102_s2 + $0x214] sm:$0xf] }
 0x29e   :  { %4223 = vmatpush.bf16.msra.mxu2 %v4674_v30  ;;  %vm3540_vm4 = vcmp.gt.f32.partialorder %v3534_v41, 0.0  ;;  %v3546_v42 = vmul.f32 0.01, %v3534_v41  ;;  %v6772_v15 = vpop.f32.mrf.mxu2  ;;  %v5021_v30 = vld [vmem:[%s7102_s2 + $0x2f0] sm:$0xf] }
 0x29f   :  { %v3366_v59 = vpop.f32.mrf.mxu1  ;;  %v6774_v21 = vpop.f32.mrf.mxu3  ;;  %v5022_v2 = vor.u32 %v5220_v17, %v5021_v30  ;;  %v5217_v63 = vld [vmem:[%s7102_s2 + $0x2e4] sm:$0xf]  ;;  %v4775_v30 = vld [vmem:[%s7102_s2 + $0x108] sm:$0xf0] }
 0x2a0   :  { %4236 = vmatpush.bf16.msra.mxu3 %v4738_v37  ;;  %4198 = vmatpush.bf16.msra.mxu0 %v4918_v27  ;;  %v3552_v39 = vsel %vm3540_vm4, %v3534_v41, %v3546_v42  ;;  %v4807_v37 = vld [vmem:[%s7102_s2 + $0x148] sm:$0xf0]  ;;  %v5023_v27 = vld [vmem:[%s7102_s2 + $0x2f8] sm:$0xf0]  ;;  %v5161_v42 = vld [vmem:[%s7102_s2 + $0x124] sm:$0xf] }
 0x2a1   :  { %v6764_v46 = vpack.c.bf16 %v3552_v39, %v3552_v39  ;;  %4206 = vmatpush.bf16.msra.mxu1 %v5022_v2  ;;  %v5026_v55 = vor.u32 %v5219_v53, %v5023_v27  ;;  %v4810_v10 = vor.u32 %v5165_v34, %v4807_v37  ;;  %v4799_v41 = vld [vmem:[%s7102_s2 + $0x138] sm:$0xf0]  ;;  %v5189_v17 = vld [vmem:[%s7102_s2 + $0x204] sm:$0xf]  ;;  %v4778_v2 = vor.u32 %v5157_v36, %v4775_v30 }
 0x2a2   :  { %4224 = vmatpush.bf16.msra.mxu2 %v4666_v38  ;;  %v5197_v38 = vld [vmem:[%s7102_s2 + $0x244] sm:$0xf]  ;;  %v4802_v51 = vor.u32 %v5163_v57, %v4799_v41  ;;  %v5007_v59 = vld [vmem:[%s7102_s2 + $0x2d8] sm:$0xf0] }
 0x2a3   :  { %v5010_v39 = vor.u32 %v5215_v26, %v5007_v59  ;;  %v4895_v57 = vld [vmem:[%s7102_s2 + $0x1f8] sm:$0xf0] }
 0x2a4   :  { %4237 = vmatpush.bf16.msra.mxu3 %v4730_v18  ;;  %4199 = vmatpush.bf16.msra.mxu0 %v4910_v43  ;;  %v5006_v18 = vor.u32 %v5216_v22, %v5005_v48  ;;  %v5195_v43 = vld [vmem:[%s7102_s2 + $0x234] sm:$0xf]  ;;  %v5208_v22 = vld [vmem:[%s7102_s2 + $0x294] sm:$0xf0]  ;;  %v4975_v59 = vld [vmem:[%s7102_s2 + $0x298] sm:$0xf0] }
 0x2a5   :  { %4207 = vmatpush.bf16.msra.mxu1 %v5014_v9 }
 0x2a6   :  { %4225 = vmatpush.bf16.msra.mxu2 %v4658_v19  ;;  %v3379_v58 = vpop.f32.mrf.mxu2  ;;  %v5015_v19 = vld [vmem:[%s7102_s2 + $0x2e8] sm:$0xf0] }
 0x2a7   :  { %v3392_v32 = vpop.f32.mrf.mxu3  ;;  %v5018_v3 = vor.u32 %v5217_v63, %v5015_v19  ;;  %v5211_v58 = vld [vmem:[%s7102_s2 + $0x2b4] sm:$0xf]  ;;  %v4983_v19 = vld [vmem:[%s7102_s2 + $0x2a8] sm:$0xf0] }
 0x2a8   :  { %4238 = vmatpush.bf16.msra.mxu3 %v4722_v47  ;;  %4200 = vmatpush.bf16.msra.mxu0 %v4902_v24  ;;  %v4930_v47 = vor.u32 %v5195_v43, %v4927_v0  ;;  %v4919_v24 = vld [vmem:[%s7102_s2 + $0x228] sm:$0xf0]  ;;  %v4991_v32 = vld [vmem:[%s7102_s2 + $0x2b8] sm:$0xf0]  ;;  %v5209_v0 = vld [vmem:[%s7102_s2 + $0x2a4] sm:$0xf] }
 0x2a9   :  { %4208 = vmatpush.bf16.msra.mxu1 %v5006_v18  ;;  %v4922_v20 = vor.u32 %v5193_v8, %v4919_v24  ;;  %v4994_v41 = vor.u32 %v5211_v58, %v4991_v32  ;;  %v4887_v43 = vld [vmem:[%s7102_s2 + $0x1e8] sm:$0xf0]  ;;  %v5205_v8 = vld [vmem:[%s7102_s2 + $0x284] sm:$0xf] }
 0x2aa   :  { %4226 = vmatpush.bf16.msra.mxu2 %v4650_v28  ;;  %v4794_v28 = vor.u32 %v5161_v42, %v4791_v5  ;;  %v4890_v63 = vor.u32 %v5185_v60, %v4887_v43  ;;  %v5183_v42 = vld [vmem:[%s7102_s2 + $0x1d4] sm:$0xf]  ;;  %v3391_v5 = vadd.f32 %v6774_v21, %v6772_v15 }
 0x2ab   :  { %4201 = vmatmul.bf16.vlgmr.msra.gmra.mxu0 %v6764_v46 }
 0x2ac   :  { %4245 = vmatpush.bf16.msrb.mxu0 %v4834_v44  ;;  %4239 = vmatpush.bf16.msra.mxu3 %v4714_v49  ;;  %v5159_v44 = vld [vmem:[%s7102_s2 + $0x114] sm:$0xf]  ;;  %v4981_v49 = vld [vmem:[%s7102_s2 + $0x2a0] sm:$0xf] }
 0x2ad   :  { %4227 = vmatmul.bf16.vlgmr.msra.gmra.mxu2 %v6608_v62  ;;  %v4946_v62 = vor.u32 %v5199_v29, %v4943_v23  ;;  %4209 = vmatpush.bf16.msra.mxu1 %v4998_v61  ;;  %v4911_v29 = vld [vmem:[%s7102_s2 + $0x218] sm:$0xf0]  ;;  %v4982_v16 = vor.u32 %v5210_v40, %v4981_v49  ;;  %v4903_v23 = vld [vmem:[%s7102_s2 + $0x208] sm:$0xf0] }
 0x2ae   :  { %4271 = vmatpush.bf16.msrb.mxu2 %v4962_v54  ;;  %v4990_v54 = vor.u32 %v5212_v11, %v4989_v6  ;;  %v4906_v31 = vor.u32 %v5189_v17, %v4903_v23  ;;  %v4879_v61 = vld [vmem:[%s7102_s2 + $0x1d8] sm:$0xf0]  ;;  %v5181_v6 = vld [vmem:[%s7102_s2 + $0x1c4] sm:$0xf]  ;;  %v4871_v11 = vld [vmem:[%s7102_s2 + $0x1c8] sm:$0xf0] }
 0x2af   :  { %4240 = vmatmul.bf16.vlgmr.msra.gmra.mxu3 %v6617_v52  ;;  %v4935_v52 = vld [vmem:[%s7102_s2 + $0x248] sm:$0xf0]  ;;  %v4882_v26 = vor.u32 %v5183_v42, %v4879_v61  ;;  %v4874_v24 = vor.u32 %v5181_v6, %v4871_v11  ;;  %v5173_v17 = vld [vmem:[%s7102_s2 + $0x184] sm:$0xf]  ;;  %v5228_v6 = vld [vmem:[%s7103_s3 + $0x38] sm:$0xff] }
 0x2b0   :  { %4246 = vmatpush.bf16.msrb.mxu0 %v4826_v45  ;;  %v4938_v50 = vor.u32 %v5197_v38, %v4935_v52  ;;  %4284 = vmatpush.bf16.msrb.mxu3 %v5026_v55  ;;  %v4786_v45 = vor.u32 %v5159_v44, %v4783_v4  ;;  %v4965_v38 = vld [vmem:[%s7102_s2 + $0x280] sm:$0xf]  ;;  %v5206_v52 = vld [vmem:[%s7102_s2 + $0x284] sm:$0xf0]  ;;  %v5187_v55 = vld [vmem:[%s7102_s2 + $0x1f4] sm:$0xf] }
 0x2b1   :  { %4210 = vmatpush.bf16.msra.mxu1 %v4990_v54  ;;  %v4863_v44 = vld [vmem:[%s7102_s2 + $0x1b8] sm:$0xf0]  ;;  %v5177_v54 = vld [vmem:[%s7102_s2 + $0x1a4] sm:$0xf]  ;;  %v4855_v4 = vld [vmem:[%s7102_s2 + $0x1a8] sm:$0xf0] }
 0x2b2   :  { %4272 = vmatpush.bf16.msrb.mxu2 %v4954_v25  ;;  %v4914_v25 = vor.u32 %v5191_v12, %v4911_v29  ;;  %v4858_v40 = vor.u32 %v5177_v54, %v4855_v4  ;;  %v5175_v29 = vld [vmem:[%s7102_s2 + $0x194] sm:$0xf]  ;;  %v4839_v23 = vld [vmem:[%s7102_s2 + $0x188] sm:$0xf0]  ;;  %v5236_v11 = vld [vmem:[%s7103_s3 + $0x78] sm:$0xff] }
 0x2b3   :  { %v5223_v54 = vld [vmem:[%s7103_s3 + $0x10] sm:$0xff] }
 0x2b4   :  { %4247 = vmatpush.bf16.msrb.mxu0 %v4818_v56  ;;  %4285 = vmatpush.bf16.msrb.mxu3 %v5018_v3  ;;  %v5207_v3 = vld [vmem:[%s7102_s2 + $0x294] sm:$0xf] }
 0x2b5   :  { %4211 = vmatpush.bf16.msra.mxu1 %v4982_v16 }
 0x2b6   :  { %4273 = vmatpush.bf16.msrb.mxu2 %v4946_v62  ;;  %v4973_v62 = vld [vmem:[%s7102_s2 + $0x290] sm:$0xf] }
 0x2b7   :  { %v4974_v53 = vor.u32 %v5208_v22, %v4973_v62 }
 0x2b8   :  { %4248 = vmatpush.bf16.msrb.mxu0 %v4810_v10  ;;  %4286 = vmatpush.bf16.msrb.mxu3 %v5010_v39  ;;  %v4966_v10 = vor.u32 %v5206_v52, %v4965_v38  ;;  %v4967_v39 = vld [vmem:[%s7102_s2 + $0x288] sm:$0xf0] }
 0x2b9   :  { %4212 = vmatpush.bf16.msra.mxu1 %v4974_v53  ;;  %v4970_v15 = vor.u32 %v5205_v8, %v4967_v39  ;;  %v3523_v53 = vperm.slane %v6436_v14, 5  ;;  %v5226_v39 = vld [vmem:[%s7103_s3 + $0x28] sm:$0xff] }
 0x2ba   :  { %4274 = vmatpush.bf16.msrb.mxu2 %v4938_v50  ;;  %v4898_v50 = vor.u32 %v5187_v55, %v4895_v57  ;;  %v31_v57 = vld [vmem:[%s7101_s6 + $0x6] sm:$0x3] }
 0x2bb   :  { %v3658_v61 = vperm.slane %v31_v57, 1 }
 0x2bc   :  { %4249 = vmatpush.bf16.msrb.mxu0 %v4802_v51  ;;  %v4986_v51 = vor.u32 %v5209_v0, %v4983_v19 }
 0x2bd   :  { %4213 = vmatpush.bf16.msra.mxu1 %v4966_v10 }
 0x2be   :  { %4275 = vmatpush.bf16.msrb.mxu2 %v4930_v47  ;;  %v4978_v47 = vor.u32 %v5207_v3, %v4975_v59 }
 0x2bf   :  { %v3403_v35 = vpop.f32.mrf.mxu0 }
 0x2c0   :  { %4250 = vmatpush.bf16.msrb.mxu0 %v4794_v28  ;;  %v3416_v56 = vpop.f32.mrf.mxu1  ;;  %v3404_v21 = vadd.f32 %v3403_v35, %v3391_v5  ;;  %v5179_v28 = vld [vmem:[%s7102_s2 + $0x1b4] sm:$0xf] }
 0x2c1   :  { %4258 = vmatpush.bf16.msrb.mxu1 %v4898_v50 }
 0x2c2   :  { %4276 = vmatpush.bf16.msrb.mxu2 %v4922_v20  ;;  %v4866_v20 = vor.u32 %v5179_v28, %v4863_v44  ;;  %v3417_v49 = vadd.f32 %v3416_v56, %v3404_v21  ;;  %v5224_v21 = vld [vmem:[%s7103_s3 + $0x18] sm:$0xff] }
 0x2c4   :  { %4251 = vmatpush.bf16.msrb.mxu0 %v4786_v45  ;;  %v4847_v45 = vld [vmem:[%s7102_s2 + $0x198] sm:$0xf0] }
 0x2c5   :  { %4259 = vmatpush.bf16.msrb.mxu1 %v4890_v63  ;;  %v4850_v16 = vor.u32 %v5175_v29, %v4847_v45  ;;  %v5221_v29 = vld [vmem:[%s7103_s3] sm:$0xff]  ;;  %v5234_v45 = vld [vmem:[%s7103_s3 + $0x68] sm:$0xff] }
 0x2c6   :  { %4277 = vmatpush.bf16.msrb.mxu2 %v4914_v25 }
 0x2c7   :  { %v3429_v34 = vpop.f32.mrf.mxu2  ;;  %v3405_v37 = vpop.f32.mrf.mxu0 }
 0x2c8   :  { %4252 = vmatpush.bf16.msrb.mxu0 %v4778_v2  ;;  %v6901_v9 = vpop.f32.mrf.mxu3  ;;  %v3418_v48 = vpop.f32.mrf.mxu1  ;;  %v3430_v12 = vadd.f32 %v3429_v34, %v3417_v49  ;;  %v4842_v2 = vor.u32 %v5173_v17, %v4839_v23  ;;  %v5229_v17 = vld [vmem:[%s7103_s3 + $0x40] sm:$0xff] }
 0x2c9   :  { %4260 = vmatpush.bf16.msrb.mxu1 %v4882_v26  ;;  %v3504_v48 = vperm.slane %v6399_v13, 5  ;;  %v3657_v13 = vperm.slane %v31_v57, 0  ;;  %v5237_v57 = vld [vmem:[%s7104_s4] sm:$0xff] }
 0x2ca   :  { %4278 = vmatpush.bf16.msrb.mxu2 %v4906_v31  ;;  %v3443_v36 = vadd.f32 %v6901_v9, %v3430_v12  ;;  %v5235_v12 = vld [vmem:[%s7103_s3 + $0x70] sm:$0xff] }
 0x2cb   :  { %4253 = vmatmul.bf16.vlgmr.msrb.gmra.mxu0 %v6625_v7  ;;  %v5213_v7 = vld [vmem:[%s7102_s2 + $0x2c4] sm:$0xf] }
 0x2cc   :  { %4436 = vmatpush.bf16.msra.mxu0 %v5228_v6 }
 0x2cd   :  { %4279 = vmatmul.bf16.vlgmr.msrb.gmra.mxu2 %v6764_v46  ;;  %v4999_v46 = vld [vmem:[%s7102_s2 + $0x2c8] sm:$0xf0]  ;;  %4261 = vmatpush.bf16.msrb.mxu1 %v4874_v24 }
 0x2ce   :  { %v5002_v27 = vor.u32 %v5213_v7, %v4999_v46 }
 0x2cf   :  { %v3431_v18 = vpop.f32.mrf.mxu2 }
 0x2d0   :  { %4287 = vmatpush.bf16.msrb.mxu3 %v5002_v27  ;;  %v3444_v33 = vpop.f32.mrf.mxu3 }
 0x2d1   :  { %4262 = vmatpush.bf16.msrb.mxu1 %v4866_v20 }
 0x2d4   :  { %4288 = vmatpush.bf16.msrb.mxu3 %v4994_v41 }
 0x2d5   :  { %4263 = vmatpush.bf16.msrb.mxu1 %v4858_v40  ;;  %v5222_v40 = vld [vmem:[%s7103_s3 + $0x8] sm:$0xff] }
 0x2d8   :  { %4289 = vmatpush.bf16.msrb.mxu3 %v4986_v51 }
 0x2d9   :  { %4264 = vmatpush.bf16.msrb.mxu1 %v4850_v16  ;;  %v5233_v16 = vld [vmem:[%s7103_s3 + $0x60] sm:$0xff] }
 0x2dc   :  { %4290 = vmatpush.bf16.msrb.mxu3 %v4978_v47 }
 0x2dd   :  { %4265 = vmatpush.bf16.msrb.mxu1 %v4842_v2 }
 0x2e0   :  { %4291 = vmatpush.bf16.msrb.mxu3 %v4970_v15  ;;  %v5225_v15 = vld [vmem:[%s7103_s3 + $0x20] sm:$0xff] }
 0x2e8   :  { %v3455_v25 = vpop.f32.mrf.mxu0 }
 0x2e9   :  { %v3456_v31 = vadd.f32 %v3455_v25, %v3443_v36  ;;  %v5232_v25 = vld [vmem:[%s7103_s3 + $0x58] sm:$0xff]  ;;  %v5231_v36 = vld [vmem:[%s7103_s3 + $0x50] sm:$0xff] }
 0x2eb   :  { %v3468_v30 = vpop.f32.mrf.mxu1 }
 0x2ec   :  { %v3469_v35 = vadd.f32 %v3468_v30, %v3456_v31  ;;  %v5230_v30 = vld [vmem:[%s7103_s3 + $0x48] sm:$0xff] }
 0x2f0   :  { %v3481_v56 = vpop.f32.mrf.mxu2  ;;  %v3457_v34 = vpop.f32.mrf.mxu0 }
 0x2f1   :  { %v3482_v37 = vadd.f32 %v3481_v56, %v3469_v35 }
 0x2f2   :  { %v3494_v62 = vpop.f32.mrf.mxu3 }
 0x2f3   :  { %v3470_v9 = vpop.f32.mrf.mxu1  ;;  %v3495_v22 = vadd.f32 %v3494_v62, %v3482_v37 }
 0x2f5   :  { %v3516_v7 = vmul.f32 %v3504_v48, %v3495_v22 }
 0x2f7   :  { %v3535_v46 = vadd.f32 %v3523_v53, %v3516_v7 }
 0x2f8   :  { %v3483_v27 = vpop.f32.mrf.mxu2 }
 0x2f9   :  { %vm3541_vm5 = vcmp.gt.f32.partialorder %v3535_v46, 0.0  ;;  %v3547_v38 = vmul.f32 0.01, %v3535_v46 }
 0x2fa   :  { %v3496_v52 = vpop.f32.mrf.mxu3 }
 0x2fb   :  { %v3553_v55 = vsel %vm3541_vm5, %v3535_v46, %v3547_v38  ;;  %v5240_v52 = vld [vmem:[%s7104_s4 + $0x18] sm:$0xff] }
 0x2fc   :  { %v3559_v10 = vpack.c.bf16 %v3553_v55, %v3553_v55  ;;  %4509 = vmatpush.bf16.msra.mxu2 %v5240_v52  ;;  %v5239_v55 = vld [vmem:[%s7104_s4 + $0x10] sm:$0xff] }
 0x2fe   :  { %4214 = vmatmul.bf16.vlgmr.msra.gmra.mxu1 %v3559_v10  ;;  %4292 = vmatmul.bf16.vlgmr.msrb.gmra.mxu3 %v3559_v10  ;;  %v5238_v10 = vld [vmem:[%s7104_s4 + $0x8] sm:$0xff] }
 0x2ff   :  { %4449 = vmatpush.bf16.msra.mxu1 %v5236_v11 }
 0x300   :  { %4510 = vmatpush.bf16.msra.mxu2 %v5239_v55 }
 0x303   :  { %4450 = vmatpush.bf16.msra.mxu1 %v5235_v12 }
 0x304   :  { %4511 = vmatpush.bf16.msra.mxu2 %v5238_v10 }
 0x307   :  { %4451 = vmatpush.bf16.msra.mxu1 %v5234_v45  ;;  %v5242_v45 = vld [vmem:[%s7105_s5 + $0x8] sm:$0xff] }
 0x308   :  { %v4150_v58 = vpop.f32.mrf.mxu0  ;;  %4512 = vmatpush.bf16.msra.mxu2 %v5237_v57 }
 0x309   :  { %v4151_v32 = vadd.f32 %v4150_v58, %v3657_v13 }
 0x30a   :  { %v4163_v18 = vpop.f32.mrf.mxu1 }
 0x30b   :  { %v4164_v50 = vadd.f32 %v4163_v18, %v4151_v32  ;;  %4452 = vmatpush.bf16.msra.mxu1 %v5233_v16  ;;  %v5248_v32 = vld [vmem:[%s7101_s6 + $0x8] ss:$0 sm:$0xff] }
 0x30e   :  { %4266 = vmatmul.bf16.vlgmr.msrb.gmra.mxu1 %v6634_v1  ;;  %v5227_v1 = vld [vmem:[%s7103_s3 + $0x30] sm:$0xff] }
 0x30f   :  { %4437 = vmatpush.bf16.msra.mxu0 %v5227_v1  ;;  %4453 = vmatpush.bf16.msra.mxu1 %v5232_v25 }
 0x310   :  { %v4176_v14 = vpop.f32.mrf.mxu2  ;;  %v4152_v41 = vpop.f32.mrf.mxu0 }
 0x311   :  { %v4177_v33 = vadd.f32 %v4176_v14, %v4164_v50 }
 0x312   :  { %v4189_v60 = vpop.f32.mrf.mxu3  ;;  %v4165_v43 = vpop.f32.mrf.mxu1 }
 0x313   :  { %v4190_v0 = vadd.f32 %v4189_v60, %v4177_v33  ;;  %4438 = vmatpush.bf16.msra.mxu0 %v5226_v39  ;;  %4454 = vmatpush.bf16.msra.mxu1 %v5231_v36  ;;  %v5241_v36 = vld [vmem:[%s7105_s5] sm:$0xff] }
 0x317   :  { %4439 = vmatpush.bf16.msra.mxu0 %v5225_v15  ;;  %4455 = vmatpush.bf16.msra.mxu1 %v5230_v30 }
 0x318   :  { %v4178_v63 = vpop.f32.mrf.mxu2 }
 0x31a   :  { %v4191_v19 = vpop.f32.mrf.mxu3 }
 0x31b   :  { %4440 = vmatpush.bf16.msra.mxu0 %v5224_v21  ;;  %4456 = vmatpush.bf16.msra.mxu1 %v5229_v17  ;;  %v5249_v19 = vld [vmem:[%s7101_s6 + $0x9] ss:$0 sm:$0xff] }
 0x31f   :  { %4441 = vmatpush.bf16.msra.mxu0 %v5223_v54  ;;  %v5244_v54 = vld [vmem:[%s7105_s5 + $0x18] sm:$0xff] }
 0x320   :  { %4609 = vmatpush.bf16.msra.mxu3 %v5244_v54 }
 0x323   :  { %4442 = vmatpush.bf16.msra.mxu0 %v5222_v40  ;;  %v5243_v40 = vld [vmem:[%s7105_s5 + $0x10] sm:$0xff] }
 0x324   :  { %4610 = vmatpush.bf16.msra.mxu3 %v5243_v40 }
 0x327   :  { %4443 = vmatpush.bf16.msra.mxu0 %v5221_v29 }
 0x328   :  { %v4202_v51 = vpop.f32.mrf.mxu0  ;;  %4611 = vmatpush.bf16.msra.mxu3 %v5242_v45 }
 0x329   :  { %v4203_v42 = vadd.f32 %v4202_v51, %v4190_v0  ;;  %v5259_v0 = vmov 8.0  }
 0x32a   :  { %5253 = vrcp.f32 %v5259_v0 }
 0x32c   :  { %4612 = vmatpush.bf16.msra.mxu3 %v5241_v36 }
 0x330   :  { %v4228_v3 = vpop.f32.mrf.mxu2  ;;  %v4204_v59 = vpop.f32.mrf.mxu0 }
 0x331   :  { %v4229_v26 = vadd.f32 %v4228_v3, %v3658_v61  ;;  %v5254_v63 = vpop.eup %5253 }
 0x332   :  { %v4241_v47 = vpop.f32.mrf.mxu3  ;;  %v4526_v51 = vmul.f32 8.0, %v5254_v63  ;;  %vm4530_vm10 = vweird.f32 %v5254_v63 }
 0x333   :  { %v4242_v5 = vadd.f32 %v4241_v47, %v4229_v26 }
 0x334   :  { %v4527_v3 = vsub.f32 1.0, %v4526_v51 }
 0x336   :  { %v4528_v47 = vmul.f32 %v5254_v63, %v4527_v3 }
 0x338   :  { %v4230_v8 = vpop.f32.mrf.mxu2  ;;  %v4529_v11 = vadd.f32 %v5254_v63, %v4528_v47 }
 0x33a   :  { %v4243_v24 = vpop.f32.mrf.mxu3  ;;  %v4531_v39 = vsel %vm4530_vm10, %v5254_v63, %v4529_v11 }
 0x348   :  { %v4254_v28 = vpop.f32.mrf.mxu0 }
 0x349   :  { %v4255_v44 = vadd.f32 %v4254_v28, %v4242_v5 }
 0x350   :  { %v4280_v20 = vpop.f32.mrf.mxu2  ;;  %v4256_v4 = vpop.f32.mrf.mxu0 }
 0x358   :  { %v4282_v49 = vpop.f32.mrf.mxu2 }
 0x37b   :  { %v4215_v23 = vpop.f32.mrf.mxu1 }
 0x37c   :  { %v4216_v2 = vadd.f32 %v4215_v23, %v4203_v42 }
 0x37e   :  { %vm4297_vm6 = vcmp.gt.f32.partialorder %v4216_v2, 0.0  ;;  %v4299_v31 = vmul.f32 0.01, %v4216_v2 }
 0x380   :  { %v4301_v35 = vsel %vm4297_vm6, %v4216_v2, %v4299_v31 }
 0x381   :  { %v4303_v56 = vpack.c.bf16 %v4301_v35, %v4301_v35  ;;  %v4293_v34 = vpop.f32.mrf.mxu3 }
 0x383   :  { %v4217_v37 = vpop.f32.mrf.mxu1  ;;  %4444 = vmatmul.bf16.vlgmr.msra.gmra.mxu0 %v4303_v56 }
 0x384   :  { %v5250_v37 = vld [vmem:[%s7101_s6 + $0xa] ss:$0 sm:$0xff] }
 0x389   :  { %v4295_v48 = vpop.f32.mrf.mxu3 }
 0x38b   :  { %v4267_v9 = vpop.f32.mrf.mxu1 }
 0x38c   :  { %v4268_v62 = vadd.f32 %v4267_v9, %v4255_v44 }
 0x38e   :  { %v4281_v22 = vadd.f32 %v4280_v20, %v4268_v62  ;;  %v5251_v62 = vld [vmem:[%s7101_s6 + $0xb] ss:$0 sm:$0xff] }
 0x390   :  { %v4294_v53 = vadd.f32 %v4293_v34, %v4281_v22 }
 0x392   :  { %vm4298_vm7 = vcmp.gt.f32.partialorder %v4294_v53, 0.0  ;;  %v4300_v7 = vmul.f32 0.01, %v4294_v53 }
 0x393   :  { %v4269_v46 = vpop.f32.mrf.mxu1 }
 0x394   :  { %v4302_v27 = vsel %vm4298_vm7, %v4294_v53, %v4300_v7 }
 0x395   :  { %v4304_v38 = vpack.c.bf16 %v4302_v27, %v4302_v27 }
 0x397   :  { %4457 = vmatmul.bf16.vlgmr.msra.gmra.mxu1 %v4304_v38  ;;  %v5252_v38 = vld [vmem:[%s7101_s6 + $0xc] ss:$0 sm:$0xff] }
 0x400   :  { %v4445_v13 = vpop.f32.mrf.mxu0 }
 0x401   :  { %v4446_v18 = vadd.f32 %v5248_v32, %v4445_v13 }
 0x408   :  { %v4447_v58 = vpop.f32.mrf.mxu0 }
 0x414   :  { %v4458_v50 = vpop.f32.mrf.mxu1 }
 0x415   :  { %v4459_v14 = vadd.f32 %v4458_v50, %v4446_v18  ;;  %v4619_v18 = vld [vmem:[%s7106_s7] sm:$0xff] }
 0x417   :  { %vm4462_vm8 = vcmp.gt.f32.partialorder %v4459_v14, 0.0  ;;  %v4463_v41 = vmul.f32 0.01, %v4459_v14 }
 0x419   :  { %v4464_v33 = vsel %vm4462_vm8, %v4459_v14, %v4463_v41 }
 0x41a   :  { %v4465_v60 = vpack.c.bf16 %v4464_v33, %v4464_v33 }
 0x41c   :  { %v4460_v43 = vpop.f32.mrf.mxu1  ;;  %5107 = vmatmul.msk.bf16.vlgmr.msra.gmra.mxu2 %vm4501_vm9, %v4465_v60 }
 0x49f   :  { %v4514_v42 = vpop.f32.mrf.mxu2 }
 0x4a0   :  { %v4515_v61 = vadd.f32 %v5249_v19, %v4514_v42 }
 0x4a2   :  { %v4518_v26 = vsel %vm4501_vm9, %v4515_v61, 0.0 }
 0x4a3   :  { %v4519_v59 = vrot.slane %v4518_v26, 4 }
 0x4a5   :  { %v4520_v5 = vadd.f32 %v4519_v59, %v4518_v26 }
 0x4a7   :  { %v4521_v6 = vrot.slane %v4520_v5, 2  ;;  %v4516_v1 = vpop.f32.mrf.mxu2 }
 0x4a9   :  { %v4522_v8 = vadd.f32 %v4521_v6, %v4520_v5 }
 0x4ab   :  { %v4523_v24 = vrot.slane %v4522_v8, 1 }
 0x4ad   :  { %v4524_v15 = vadd.f32 %v4523_v24, %v4522_v8 }
 0x4af   :  { %v4532_v21 = vmul.f32 %v4531_v39, %v4524_v15 }
 0x4b1   :  { %v4533_v28 = vsub.f32 %v4515_v61, %v4532_v21 }
 0x4b3   :  { %v4534_v44 = vmul.f32 %v4533_v28, %v4533_v28 }
 0x4b5   :  { %v4535_v20 = vsel %vm4501_vm9, %v4534_v44, 0.0 }
 0x4b6   :  { %v4536_v4 = vrot.slane %v4535_v20, 4 }
 0x4b8   :  { %v4537_v49 = vadd.f32 %v4536_v4, %v4535_v20 }
 0x4ba   :  { %v4538_v12 = vrot.slane %v4537_v49, 2 }
 0x4bc   :  { %v4539_v29 = vadd.f32 %v4538_v12, %v4537_v49 }
 0x4be   :  { %v4540_v16 = vrot.slane %v4539_v29, 1 }
 0x4c0   :  { %v4541_v25 = vadd.f32 %v4540_v16, %v4539_v29 }
 0x4c2   :  { %v4542_v30 = vmul.f32 %v4541_v25, %v4531_v39 }
 0x4c4   :  { %v4543_v17 = vadd.f32 1e-05, %v4542_v30 }
 0x4c6   :  { %5255 = vrsqrt.f32 %v4543_v17  ;;  %vm4550_vm12 = vweird.f32 %v4543_v17 }
 0x4cc   :  { %v5256_v23 = vpop.eup %5255 }
 0x4cd   :  { %v4545_v2 = vmul.f32 %v5256_v23, %v4543_v17  ;;  %vm4551_vm11 = vweird.f32 %v5256_v23 }
 0x4ce   :  { %vm4552_vm13 = vmor %vm4550_vm12, %vm4551_vm11 }
 0x4cf   :  { %v4546_v31 = vmul.f32 %v5256_v23, %v4545_v2 }
 0x4d1   :  { %v4547_v35 = vmul.f32 0.5, %v4546_v31 }
 0x4d3   :  { %v4548_v56 = vsub.f32 1.5, %v4547_v35 }
 0x4d5   :  { %v4549_v34 = vmul.f32 %v5256_v23, %v4548_v56 }
 0x4d7   :  { %v4553_v48 = vsel %vm4552_vm13, %v5256_v23, %v4549_v34 }
 0x4d8   :  { %v4554_v9 = vmul.f32 %v4553_v48, %v4533_v28 }
 0x4da   :  { %v4558_v22 = vmul.f32 %v5250_v37, %v4554_v9 }
 0x4dc   :  { %v4562_v53 = vadd.f32 %v5251_v62, %v4558_v22 }
 0x4de   :  { %vm4563_vm14 = vcmp.gt.f32.partialorder %v4562_v53, 0.0  ;;  %v4564_v7 = vmul.f32 0.01, %v4562_v53 }
 0x4e0   :  { %v4565_v46 = vsel %vm4563_vm14, %v4562_v53, %v4564_v7 }
 0x4e1   :  { %v4566_v27 = vpack.c.bf16 %v4565_v46, %v4565_v46 }
 0x4e3   :  { %5124 = vmatmul.msk.bf16.vlgmr.msra.gmra.mxu3 %vm4501_vm9, %v4566_v27 }
 0x566   :  { %v4614_v52 = vpop.f32.mrf.mxu3 }
 0x567   :  { %v4615_v55 = vadd.f32 %v5252_v38, %v4614_v52 }
 0x569   :  { %v4618_v10 = vmax.f32 %v4615_v55, 0.0 }
 0x56b   :  { %v4620_v57 = vmul.f32 0.5, %v4618_v10 }
 0x56d   :  { %v4621_v13 = vmul.f32 1.442695, %v4620_v57 }
 0x56e   :  { %v4616_v58 = vpop.f32.mrf.mxu3 }
 0x56f   :  { %5257 = vpow2.f32 %v4621_v13 }
 0x575   :  { %v5258_v32 = vpop.eup %5257 }
 0x576   :  { %4624 = vrot.lane.b32.xlu0 %v5258_v32, %s5260_s25 }
 0x57e   :  { %4630 = vrot.lane.b32.xlu0 %v4618_v10, %s5261_s26 }
 0x5e8   :  { %v4625_v50 = vpop.permute.xlu0 %4624 }
 0x5e9   :  { %v4627_v14 = vmul.f32 %v4625_v50, %v4619_v18 }
 0x5eb   :  { %v4628_v41 = vadd.f32 %v4627_v14, %v4618_v10 }
 0x5ed   :  { %v4634_v33 = vsel %vm4633_vm15, %v4628_v41, 0.0 }
 0x5f0   :  { %v4631_v60 = vpop.permute.xlu0 %4630 }
 0x5f1   :  { %v4636_v43 = vsel %vm4635_vm0, %v4634_v33, %v4631_v60 }
 0x5f2   :  { %4638 = vst.msk [vmem:[%s7107_s8] sm:$0xff] %vm4637_vm1, %v4636_v43 }

</bundles_post_ra>
